<compile_context>
chip_gen: v6e
topology: v6e:2x2x1
jax: 0.10.0
libtpu: 0.0.40
codegen_flags: <defaults>
</compile_context>

<pallas_src>
import functools

import jax
import jax.numpy as jnp
from jax.experimental import pallas as pl
from jax.experimental.pallas import tpu as pltpu


def _spatial_attention_kernel(w_ref, x_ref, o_ref, plane_ref, *, K, H, W, NB):
    """One grid step processes NB batch elements.

    w_ref     : SMEM (2*K*K,) f32 -- flattened conv weights:
                [avg-plane KxK (pre-scaled by 1/C), max-plane KxK]
    x_ref     : VMEM (NB, C, H, W)  (input dtype; upcast to f32 for arithmetic)
    o_ref     : VMEM (NB, H, W)     (output dtype = input dtype)
    plane_ref : VMEM (2, NB, H+2p, W+2p) f32 scratch
                index 0 = zero-padded channel-sum plane, 1 = channel-max plane.
    """
    pad = K // 2
    Hp = H + 2 * pad
    Wp = W + 2 * pad

    x = x_ref[...].astype(jnp.float32)            # (NB, C, H, W)

    # Channel reduction, vectorized over the NB sub-batch.
    s = jnp.sum(x, axis=1)                        # (NB, H, W); 1/C folded into weights
    mx = jnp.max(x, axis=1)                       # (NB, H, W)

    # Refresh only the zero halo border; the interior is fully overwritten below.
    # (Scratch is uninitialized on first use and persists across steps, so the
    #  border must be written at least once per step that uses it.)
    if pad > 0:
        zrow = jnp.zeros((2, NB, pad, Wp), jnp.float32)
        zcol = jnp.zeros((2, NB, H, pad), jnp.float32)
        plane_ref[:, :, 0:pad, :] = zrow                       # top rows
        plane_ref[:, :, pad + H:Hp, :] = zrow                  # bottom rows
        plane_ref[:, :, pad:pad + H, 0:pad] = zcol             # left cols
        plane_ref[:, :, pad:pad + H, pad + W:Wp] = zcol        # right cols

    plane_ref[0, :, pad:pad + H, pad:pad + W] = s
    plane_ref[1, :, pad:pad + H, pad:pad + W] = mx

    # 2-in / 1-out KxK "same" convolution, unrolled as shifted slice mul-adds.
    # A single slice load per tap covers both (sum, max) planes.
    acc = jnp.zeros((NB, H, W), jnp.float32)
    for di in range(K):
        for dj in range(K):
            tap = plane_ref[:, :, di:di + H, dj:dj + W]        # (2, NB, H, W)
            w_a = w_ref[0 * K * K + di * K + dj]               # avg-plane weight (already / C)
            w_m = w_ref[1 * K * K + di * K + dj]               # max-plane weight
            acc = acc + w_a * tap[0] + w_m * tap[1]

    o_ref[...] = jax.nn.sigmoid(acc).astype(o_ref.dtype)


def _pick_block_batch(N, per_elem_bytes, target_bytes=2 * 1024 * 1024):
    """Largest NB such that the x block is ~target_bytes, N % NB == 0, and the
    grid keeps >= 2 steps when N allows (v7x megacore sharding)."""
    nb = int(max(1, min(N, target_bytes // max(per_elem_bytes, 1))))
    while nb > 1 and N // nb < 2:
        nb -= 1
    while N % nb:
        nb -= 1
    return nb


def spatial_attention(x, weight, *, block_batch=None):
    """x: (N, C, H, W) f32/bf16. weight: (1, 2, K, K) OIHW, odd K, no bias.

    Returns the spatial attention map of shape (N, 1, H, W) in x.dtype.
    """
    N, C, H, W = x.shape
    O, I, K, K2 = weight.shape
    assert O == 1 and I == 2 and K == K2 and K % 2 == 1, "expect (1, 2, K, K) odd-K conv weight"
    pad = K // 2
    Hp, Wp = H + 2 * pad, W + 2 * pad

    # Fold the channel-mean 1/C into the avg-plane weights -> kernel does a pure sum.
    w = weight.astype(jnp.float32).reshape(2, K * K)
    w = w * jnp.array([[1.0 / C], [1.0]], jnp.float32)
    w_flat = w.reshape(-1)                                     # (2*K*K,)

    per_elem_bytes = C * H * W * x.dtype.itemsize
    NB = block_batch if block_batch is not None else _pick_block_batch(N, per_elem_bytes)
    NB = max(1, min(NB, N))
    while N % NB:
        NB -= 1
    grid = (N // NB,)

    # Explicit VMEM budget: double-buffered input + output blocks plus scratch.
    est_bytes = (2 * NB * per_elem_bytes                       # x block, double-buffered
                 + 2 * NB * H * W * x.dtype.itemsize           # out block, double-buffered
                 + 2 * NB * Hp * Wp * 4)                       # stacked padded planes
    vmem_limit = int(max(16 * 1024 * 1024, 2 * est_bytes))

    kernel = functools.partial(_spatial_attention_kernel, K=K, H=H, W=W, NB=NB)

    out = pl.pallas_call(
        kernel,
        out_shape=jax.ShapeDtypeStruct((N, H, W), x.dtype),
        grid_spec=pltpu.PrefetchScalarGridSpec(
            num_scalar_prefetch=0,
            grid=grid,
            in_specs=[
                pl.BlockSpec(memory_space=pltpu.MemorySpace.SMEM),        # conv weights
                pl.BlockSpec((NB, C, H, W), lambda n: (n, 0, 0, 0)),      # NB batch elements
            ],
            out_specs=pl.BlockSpec((NB, H, W), lambda n: (n, 0, 0)),
            scratch_shapes=[
                pltpu.VMEM((2, NB, Hp, Wp), jnp.float32),                 # stacked padded sum/max planes
            ],
        ),
        compiler_params=pltpu.CompilerParams(
            dimension_semantics=("parallel",),
            vmem_limit_bytes=vmem_limit,
        ),
    )(w_flat, x)

    return out[:, None, :, :]                                  # (N, 1, H, W)


def spatial_attention_ref(x, weight):
    """Plain-JAX reference matching the PyTorch forward."""
    pad = weight.shape[-1] // 2
    avg = jnp.mean(x.astype(jnp.float32), axis=1, keepdims=True)
    mx = jnp.max(x.astype(jnp.float32), axis=1, keepdims=True)
    xin = jnp.concatenate([avg, mx], axis=1)
    conv = jax.lax.conv_general_dilated(
        xin, weight.astype(jnp.float32), window_strides=(1, 1),
        padding=[(pad, pad), (pad, pad)],
        dimension_numbers=("NCHW", "OIHW", "NCHW"),
    )
    return jax.nn.sigmoid(conv).astype(x.dtype)


if __name__ == "__main__":
    key = jax.random.PRNGKey(0)
    k_x, k_w, k_x2 = jax.random.split(key, 3)

    # Primary (module-consistent) small shape: batch=2, channels=4, spatial=16, K=7.
    N, C, H, W = 2, 4, 16, 16
    K = 7
    x = jax.random.normal(k_x, (N, C, H, W), dtype=jnp.float32)

    # nn.Conv2d default-style init: uniform(-1/sqrt(fan_in), 1/sqrt(fan_in)), fan_in = 2*K*K
    bound = 1.0 / (2 * K * K) ** 0.5
    weight = jax.random.uniform(k_w, (1, 2, K, K), dtype=jnp.float32,
                                minval=-bound, maxval=bound)

    out = jax.block_until_ready(spatial_attention(x, weight))
    ref = spatial_attention_ref(x, weight)
    assert out.shape == (N, 1, H, W)
    assert jnp.allclose(out, ref, rtol=1e-4, atol=1e-5), "mismatch vs reference (NB=1 path)"

    # Second check exercising the NB>1 (multi-image-per-grid-step) path.
    N2 = 8
    x2 = jax.random.normal(k_x2, (N2, C, H, W), dtype=jnp.float32)
    out2 = jax.block_until_ready(spatial_attention(x2, weight))
    ref2 = spatial_attention_ref(x2, weight)
    assert out2.shape == (N2, 1, H, W)
    assert jnp.allclose(out2, ref2, rtol=1e-4, atol=1e-5), "mismatch vs reference (NB>1 path)"

    print("KERNEL_OK")
</pallas_src>

<mosaic_0001>
module attributes {stable_mosaic.version = 11 : i64} {
  func.func @_spatial_attention_kernel(%arg0: i32, %arg1: memref<98xf32, #tpu.memory_space<smem>>, %arg2: memref<1x4x16x16xf32, #tpu.memory_space<vmem>>, %arg3: memref<1x16x16xf32, #tpu.memory_space<vmem>>, %arg4: memref<2x1x22x22xf32, #tpu.memory_space<vmem>>) attributes {dimension_semantics = [#tpu.dimension_semantics<parallel>], iteration_bounds = array<i64: 2>, scalar_prefetch = 0 : i64, scratch_operands = 1 : i64, tpu.core_type = #tpu.core_type<tc>, window_params = [{transform_indices = @transform_0, window_bounds = array<i64: 98>}, {transform_indices = @transform_1, window_bounds = array<i64: 1, 4, 16, 16>}, {transform_indices = @transform_2, window_bounds = array<i64: 1, 16, 16>}]} {
    %c0 = arith.constant 0 : index
    %c0_0 = arith.constant 0 : index
    %c0_1 = arith.constant 0 : index
    %c0_2 = arith.constant 0 : index
    %0 = vector.load %arg2[%c0, %c0_0, %c0_1, %c0_2] : memref<1x4x16x16xf32, #tpu.memory_space<vmem>>, vector<1x4x16x16xf32>
    %cst = arith.constant dense<0.000000e+00> : vector<1x16x16xf32>
    %1 = vector.multi_reduction <add>, %0, %cst [1] : vector<1x4x16x16xf32> to vector<1x16x16xf32>
    %cst_3 = arith.constant dense<0xFF800000> : vector<1x16x16xf32>
    %2 = vector.multi_reduction <maximumf>, %0, %cst_3 [1] : vector<1x4x16x16xf32> to vector<1x16x16xf32>
    %cst_4 = arith.constant 0.000000e+00 : f32
    %3 = vector.broadcast %cst_4 : f32 to vector<2x1x3x22xf32>
    %cst_5 = arith.constant 0.000000e+00 : f32
    %4 = vector.broadcast %cst_5 : f32 to vector<2x1x16x3xf32>
    %c0_6 = arith.constant 0 : index
    %c0_7 = arith.constant 0 : index
    %c0_8 = arith.constant 0 : index
    %c0_9 = arith.constant 0 : index
    %5 = vector.load %arg4[%c0_6, %c0_7, %c0_8, %c0_9] : memref<2x1x22x22xf32, #tpu.memory_space<vmem>>, vector<2x1x3x22xf32>
    tpu.vector_store %arg4[%c0_6, %c0_7, %c0_8, %c0_9], %3 {strides = array<i32>} : memref<2x1x22x22xf32, #tpu.memory_space<vmem>>, vector<2x1x3x22xf32>,
    %c0_10 = arith.constant 0 : index
    %c0_11 = arith.constant 0 : index
    %c19 = arith.constant 19 : index
    %c0_12 = arith.constant 0 : index
    %6 = vector.load %arg4[%c0_10, %c0_11, %c19, %c0_12] : memref<2x1x22x22xf32, #tpu.memory_space<vmem>>, vector<2x1x3x22xf32>
    tpu.vector_store %arg4[%c0_10, %c0_11, %c19, %c0_12], %3 {strides = array<i32>} : memref<2x1x22x22xf32, #tpu.memory_space<vmem>>, vector<2x1x3x22xf32>,
    %c0_13 = arith.constant 0 : index
    %c0_14 = arith.constant 0 : index
    %c3 = arith.constant 3 : index
    %c0_15 = arith.constant 0 : index
    %7 = vector.load %arg4[%c0_13, %c0_14, %c3, %c0_15] : memref<2x1x22x22xf32, #tpu.memory_space<vmem>>, vector<2x1x16x3xf32>
    tpu.vector_store %arg4[%c0_13, %c0_14, %c3, %c0_15], %4 {strides = array<i32>} : memref<2x1x22x22xf32, #tpu.memory_space<vmem>>, vector<2x1x16x3xf32>,
    %c0_16 = arith.constant 0 : index
    %c0_17 = arith.constant 0 : index
    %c3_18 = arith.constant 3 : index
    %c19_19 = arith.constant 19 : index
    %8 = vector.load %arg4[%c0_16, %c0_17, %c3_18, %c19_19] : memref<2x1x22x22xf32, #tpu.memory_space<vmem>>, vector<2x1x16x3xf32>
    tpu.vector_store %arg4[%c0_16, %c0_17, %c3_18, %c19_19], %4 {strides = array<i32>} : memref<2x1x22x22xf32, #tpu.memory_space<vmem>>, vector<2x1x16x3xf32>,
    %c0_20 = arith.constant 0 : index
    %c0_21 = arith.constant 0 : index
    %c3_22 = arith.constant 3 : index
    %c3_23 = arith.constant 3 : index
    %9 = vector.load %arg4[%c0_20, %c0_21, %c3_22, %c3_23] : memref<2x1x22x22xf32, #tpu.memory_space<vmem>>, vector<1x1x16x16xf32>
    %10 = vector.shape_cast %9 : vector<1x1x16x16xf32> to vector<1x16x16xf32>
    %11 = vector.shape_cast %1 : vector<1x16x16xf32> to vector<1x1x16x16xf32>
    tpu.vector_store %arg4[%c0_20, %c0_21, %c3_22, %c3_23], %11 {strides = array<i32>} : memref<2x1x22x22xf32, #tpu.memory_space<vmem>>, vector<1x1x16x16xf32>,
    %c1 = arith.constant 1 : index
    %c0_24 = arith.constant 0 : index
    %c3_25 = arith.constant 3 : index
    %c3_26 = arith.constant 3 : index
    %12 = vector.load %arg4[%c1, %c0_24, %c3_25, %c3_26] : memref<2x1x22x22xf32, #tpu.memory_space<vmem>>, vector<1x1x16x16xf32>
    %13 = vector.shape_cast %12 : vector<1x1x16x16xf32> to vector<1x16x16xf32>
    %14 = vector.shape_cast %2 : vector<1x16x16xf32> to vector<1x1x16x16xf32>
    tpu.vector_store %arg4[%c1, %c0_24, %c3_25, %c3_26], %14 {strides = array<i32>} : memref<2x1x22x22xf32, #tpu.memory_space<vmem>>, vector<1x1x16x16xf32>,
    %cst_27 = arith.constant 0.000000e+00 : f32
    %15 = vector.broadcast %cst_27 : f32 to vector<1x16x16xf32>
    %c0_28 = arith.constant 0 : index
    %c0_29 = arith.constant 0 : index
    %c0_30 = arith.constant 0 : index
    %c0_31 = arith.constant 0 : index
    %16 = vector.load %arg4[%c0_28, %c0_29, %c0_30, %c0_31] : memref<2x1x22x22xf32, #tpu.memory_space<vmem>>, vector<2x1x16x16xf32>
    %c0_32 = arith.constant 0 : index
    %17 = memref.load %arg1[%c0_32] : memref<98xf32, #tpu.memory_space<smem>>
    %c49 = arith.constant 49 : index
    %18 = memref.load %arg1[%c49] : memref<98xf32, #tpu.memory_space<smem>>
    %19 = vector.extract_strided_slice %16 {offsets = [0, 0, 0, 0], sizes = [1, 1, 16, 16], strides = [1, 1, 1, 1]} : vector<2x1x16x16xf32> to vector<1x1x16x16xf32>
    %20 = vector.shape_cast %19 : vector<1x1x16x16xf32> to vector<1x16x16xf32>
    %21 = vector.broadcast %17 : f32 to vector<1x16x16xf32>
    %22 = arith.mulf %21, %20 : vector<1x16x16xf32>
    %23 = arith.addf %15, %22 : vector<1x16x16xf32>
    %24 = vector.extract_strided_slice %16 {offsets = [1, 0, 0, 0], sizes = [1, 1, 16, 16], strides = [1, 1, 1, 1]} : vector<2x1x16x16xf32> to vector<1x1x16x16xf32>
    %25 = vector.shape_cast %24 : vector<1x1x16x16xf32> to vector<1x16x16xf32>
    %26 = vector.broadcast %18 : f32 to vector<1x16x16xf32>
    %27 = arith.mulf %26, %25 : vector<1x16x16xf32>
    %28 = arith.addf %23, %27 : vector<1x16x16xf32>
    %c0_33 = arith.constant 0 : index
    %c0_34 = arith.constant 0 : index
    %c0_35 = arith.constant 0 : index
    %c1_36 = arith.constant 1 : index
    %29 = vector.load %arg4[%c0_33, %c0_34, %c0_35, %c1_36] : memref<2x1x22x22xf32, #tpu.memory_space<vmem>>, vector<2x1x16x16xf32>
    %c1_37 = arith.constant 1 : index
    %30 = memref.load %arg1[%c1_37] : memref<98xf32, #tpu.memory_space<smem>>
    %c50 = arith.constant 50 : index
    %31 = memref.load %arg1[%c50] : memref<98xf32, #tpu.memory_space<smem>>
    %32 = vector.extract_strided_slice %29 {offsets = [0, 0, 0, 0], sizes = [1, 1, 16, 16], strides = [1, 1, 1, 1]} : vector<2x1x16x16xf32> to vector<1x1x16x16xf32>
    %33 = vector.shape_cast %32 : vector<1x1x16x16xf32> to vector<1x16x16xf32>
    %34 = vector.broadcast %30 : f32 to vector<1x16x16xf32>
    %35 = arith.mulf %34, %33 : vector<1x16x16xf32>
    %36 = arith.addf %28, %35 : vector<1x16x16xf32>
    %37 = vector.extract_strided_slice %29 {offsets = [1, 0, 0, 0], sizes = [1, 1, 16, 16], strides = [1, 1, 1, 1]} : vector<2x1x16x16xf32> to vector<1x1x16x16xf32>
    %38 = vector.shape_cast %37 : vector<1x1x16x16xf32> to vector<1x16x16xf32>
    %39 = vector.broadcast %31 : f32 to vector<1x16x16xf32>
    %40 = arith.mulf %39, %38 : vector<1x16x16xf32>
    %41 = arith.addf %36, %40 : vector<1x16x16xf32>
    %c0_38 = arith.constant 0 : index
    %c0_39 = arith.constant 0 : index
    %c0_40 = arith.constant 0 : index
    %c2 = arith.constant 2 : index
    %42 = vector.load %arg4[%c0_38, %c0_39, %c0_40, %c2] : memref<2x1x22x22xf32, #tpu.memory_space<vmem>>, vector<2x1x16x16xf32>
    %c2_41 = arith.constant 2 : index
    %43 = memref.load %arg1[%c2_41] : memref<98xf32, #tpu.memory_space<smem>>
    %c51 = arith.constant 51 : index
    %44 = memref.load %arg1[%c51] : memref<98xf32, #tpu.memory_space<smem>>
    %45 = vector.extract_strided_slice %42 {offsets = [0, 0, 0, 0], sizes = [1, 1, 16, 16], strides = [1, 1, 1, 1]} : vector<2x1x16x16xf32> to vector<1x1x16x16xf32>
    %46 = vector.shape_cast %45 : vector<1x1x16x16xf32> to vector<1x16x16xf32>
    %47 = vector.broadcast %43 : f32 to vector<1x16x16xf32>
    %48 = arith.mulf %47, %46 : vector<1x16x16xf32>
    %49 = arith.addf %41, %48 : vector<1x16x16xf32>
    %50 = vector.extract_strided_slice %42 {offsets = [1, 0, 0, 0], sizes = [1, 1, 16, 16], strides = [1, 1, 1, 1]} : vector<2x1x16x16xf32> to vector<1x1x16x16xf32>
    %51 = vector.shape_cast %50 : vector<1x1x16x16xf32> to vector<1x16x16xf32>
    %52 = vector.broadcast %44 : f32 to vector<1x16x16xf32>
    %53 = arith.mulf %52, %51 : vector<1x16x16xf32>
    %54 = arith.addf %49, %53 : vector<1x16x16xf32>
    %c0_42 = arith.constant 0 : index
    %c0_43 = arith.constant 0 : index
    %c0_44 = arith.constant 0 : index
    %c3_45 = arith.constant 3 : index
    %55 = vector.load %arg4[%c0_42, %c0_43, %c0_44, %c3_45] : memref<2x1x22x22xf32, #tpu.memory_space<vmem>>, vector<2x1x16x16xf32>
    %c3_46 = arith.constant 3 : index
    %56 = memref.load %arg1[%c3_46] : memref<98xf32, #tpu.memory_space<smem>>
    %c52 = arith.constant 52 : index
    %57 = memref.load %arg1[%c52] : memref<98xf32, #tpu.memory_space<smem>>
    %58 = vector.extract_strided_slice %55 {offsets = [0, 0, 0, 0], sizes = [1, 1, 16, 16], strides = [1, 1, 1, 1]} : vector<2x1x16x16xf32> to vector<1x1x16x16xf32>
    %59 = vector.shape_cast %58 : vector<1x1x16x16xf32> to vector<1x16x16xf32>
    %60 = vector.broadcast %56 : f32 to vector<1x16x16xf32>
    %61 = arith.mulf %60, %59 : vector<1x16x16xf32>
    %62 = arith.addf %54, %61 : vector<1x16x16xf32>
    %63 = vector.extract_strided_slice %55 {offsets = [1, 0, 0, 0], sizes = [1, 1, 16, 16], strides = [1, 1, 1, 1]} : vector<2x1x16x16xf32> to vector<1x1x16x16xf32>
    %64 = vector.shape_cast %63 : vector<1x1x16x16xf32> to vector<1x16x16xf32>
    %65 = vector.broadcast %57 : f32 to vector<1x16x16xf32>
    %66 = arith.mulf %65, %64 : vector<1x16x16xf32>
    %67 = arith.addf %62, %66 : vector<1x16x16xf32>
    %c0_47 = arith.constant 0 : index
    %c0_48 = arith.constant 0 : index
    %c0_49 = arith.constant 0 : index
    %c4 = arith.constant 4 : index
    %68 = vector.load %arg4[%c0_47, %c0_48, %c0_49, %c4] : memref<2x1x22x22xf32, #tpu.memory_space<vmem>>, vector<2x1x16x16xf32>
    %c4_50 = arith.constant 4 : index
    %69 = memref.load %arg1[%c4_50] : memref<98xf32, #tpu.memory_space<smem>>
    %c53 = arith.constant 53 : index
    %70 = memref.load %arg1[%c53] : memref<98xf32, #tpu.memory_space<smem>>
    %71 = vector.extract_strided_slice %68 {offsets = [0, 0, 0, 0], sizes = [1, 1, 16, 16], strides = [1, 1, 1, 1]} : vector<2x1x16x16xf32> to vector<1x1x16x16xf32>
    %72 = vector.shape_cast %71 : vector<1x1x16x16xf32> to vector<1x16x16xf32>
    %73 = vector.broadcast %69 : f32 to vector<1x16x16xf32>
    %74 = arith.mulf %73, %72 : vector<1x16x16xf32>
    %75 = arith.addf %67, %74 : vector<1x16x16xf32>
    %76 = vector.extract_strided_slice %68 {offsets = [1, 0, 0, 0], sizes = [1, 1, 16, 16], strides = [1, 1, 1, 1]} : vector<2x1x16x16xf32> to vector<1x1x16x16xf32>
    %77 = vector.shape_cast %76 : vector<1x1x16x16xf32> to vector<1x16x16xf32>
    %78 = vector.broadcast %70 : f32 to vector<1x16x16xf32>
    %79 = arith.mulf %78, %77 : vector<1x16x16xf32>
    %80 = arith.addf %75, %79 : vector<1x16x16xf32>
    %c0_51 = arith.constant 0 : index
    %c0_52 = arith.constant 0 : index
    %c0_53 = arith.constant 0 : index
    %c5 = arith.constant 5 : index
    %81 = vector.load %arg4[%c0_51, %c0_52, %c0_53, %c5] : memref<2x1x22x22xf32, #tpu.memory_space<vmem>>, vector<2x1x16x16xf32>
    %c5_54 = arith.constant 5 : index
    %82 = memref.load %arg1[%c5_54] : memref<98xf32, #tpu.memory_space<smem>>
    %c54 = arith.constant 54 : index
    %83 = memref.load %arg1[%c54] : memref<98xf32, #tpu.memory_space<smem>>
    %84 = vector.extract_strided_slice %81 {offsets = [0, 0, 0, 0], sizes = [1, 1, 16, 16], strides = [1, 1, 1, 1]} : vector<2x1x16x16xf32> to vector<1x1x16x16xf32>
    %85 = vector.shape_cast %84 : vector<1x1x16x16xf32> to vector<1x16x16xf32>
    %86 = vector.broadcast %82 : f32 to vector<1x16x16xf32>
    %87 = arith.mulf %86, %85 : vector<1x16x16xf32>
    %88 = arith.addf %80, %87 : vector<1x16x16xf32>
    %89 = vector.extract_strided_slice %81 {offsets = [1, 0, 0, 0], sizes = [1, 1, 16, 16], strides = [1, 1, 1, 1]} : vector<2x1x16x16xf32> to vector<1x1x16x16xf32>
    %90 = vector.shape_cast %89 : vector<1x1x16x16xf32> to vector<1x16x16xf32>
    %91 = vector.broadcast %83 : f32 to vector<1x16x16xf32>
    %92 = arith.mulf %91, %90 : vector<1x16x16xf32>
    %93 = arith.addf %88, %92 : vector<1x16x16xf32>
    %c0_55 = arith.constant 0 : index
    %c0_56 = arith.constant 0 : index
    %c0_57 = arith.constant 0 : index
    %c6 = arith.constant 6 : index
    %94 = vector.load %arg4[%c0_55, %c0_56, %c0_57, %c6] : memref<2x1x22x22xf32, #tpu.memory_space<vmem>>, vector<2x1x16x16xf32>
    %c6_58 = arith.constant 6 : index
    %95 = memref.load %arg1[%c6_58] : memref<98xf32, #tpu.memory_space<smem>>
    %c55 = arith.constant 55 : index
    %96 = memref.load %arg1[%c55] : memref<98xf32, #tpu.memory_space<smem>>
    %97 = vector.extract_strided_slice %94 {offsets = [0, 0, 0, 0], sizes = [1, 1, 16, 16], strides = [1, 1, 1, 1]} : vector<2x1x16x16xf32> to vector<1x1x16x16xf32>
    %98 = vector.shape_cast %97 : vector<1x1x16x16xf32> to vector<1x16x16xf32>
    %99 = vector.broadcast %95 : f32 to vector<1x16x16xf32>
    %100 = arith.mulf %99, %98 : vector<1x16x16xf32>
    %101 = arith.addf %93, %100 : vector<1x16x16xf32>
    %102 = vector.extract_strided_slice %94 {offsets = [1, 0, 0, 0], sizes = [1, 1, 16, 16], strides = [1, 1, 1, 1]} : vector<2x1x16x16xf32> to vector<1x1x16x16xf32>
    %103 = vector.shape_cast %102 : vector<1x1x16x16xf32> to vector<1x16x16xf32>
    %104 = vector.broadcast %96 : f32 to vector<1x16x16xf32>
    %105 = arith.mulf %104, %103 : vector<1x16x16xf32>
    %106 = arith.addf %101, %105 : vector<1x16x16xf32>
    %c0_59 = arith.constant 0 : index
    %c0_60 = arith.constant 0 : index
    %c1_61 = arith.constant 1 : index
    %c0_62 = arith.constant 0 : index
    %107 = vector.load %arg4[%c0_59, %c0_60, %c1_61, %c0_62] : memref<2x1x22x22xf32, #tpu.memory_space<vmem>>, vector<2x1x16x16xf32>
    %c7 = arith.constant 7 : index
    %108 = memref.load %arg1[%c7] : memref<98xf32, #tpu.memory_space<smem>>
    %c56 = arith.constant 56 : index
    %109 = memref.load %arg1[%c56] : memref<98xf32, #tpu.memory_space<smem>>
    %110 = vector.extract_strided_slice %107 {offsets = [0, 0, 0, 0], sizes = [1, 1, 16, 16], strides = [1, 1, 1, 1]} : vector<2x1x16x16xf32> to vector<1x1x16x16xf32>
    %111 = vector.shape_cast %110 : vector<1x1x16x16xf32> to vector<1x16x16xf32>
    %112 = vector.broadcast %108 : f32 to vector<1x16x16xf32>
    %113 = arith.mulf %112, %111 : vector<1x16x16xf32>
    %114 = arith.addf %106, %113 : vector<1x16x16xf32>
    %115 = vector.extract_strided_slice %107 {offsets = [1, 0, 0, 0], sizes = [1, 1, 16, 16], strides = [1, 1, 1, 1]} : vector<2x1x16x16xf32> to vector<1x1x16x16xf32>
    %116 = vector.shape_cast %115 : vector<1x1x16x16xf32> to vector<1x16x16xf32>
    %117 = vector.broadcast %109 : f32 to vector<1x16x16xf32>
    %118 = arith.mulf %117, %116 : vector<1x16x16xf32>
    %119 = arith.addf %114, %118 : vector<1x16x16xf32>
    %c0_63 = arith.constant 0 : index
    %c0_64 = arith.constant 0 : index
    %c1_65 = arith.constant 1 : index
    %c1_66 = arith.constant 1 : index
    %120 = vector.load %arg4[%c0_63, %c0_64, %c1_65, %c1_66] : memref<2x1x22x22xf32, #tpu.memory_space<vmem>>, vector<2x1x16x16xf32>
    %c8 = arith.constant 8 : index
    %121 = memref.load %arg1[%c8] : memref<98xf32, #tpu.memory_space<smem>>
    %c57 = arith.constant 57 : index
    %122 = memref.load %arg1[%c57] : memref<98xf32, #tpu.memory_space<smem>>
    %123 = vector.extract_strided_slice %120 {offsets = [0, 0, 0, 0], sizes = [1, 1, 16, 16], strides = [1, 1, 1, 1]} : vector<2x1x16x16xf32> to vector<1x1x16x16xf32>
    %124 = vector.shape_cast %123 : vector<1x1x16x16xf32> to vector<1x16x16xf32>
    %125 = vector.broadcast %121 : f32 to vector<1x16x16xf32>
    %126 = arith.mulf %125, %124 : vector<1x16x16xf32>
    %127 = arith.addf %119, %126 : vector<1x16x16xf32>
    %128 = vector.extract_strided_slice %120 {offsets = [1, 0, 0, 0], sizes = [1, 1, 16, 16], strides = [1, 1, 1, 1]} : vector<2x1x16x16xf32> to vector<1x1x16x16xf32>
    %129 = vector.shape_cast %128 : vector<1x1x16x16xf32> to vector<1x16x16xf32>
    %130 = vector.broadcast %122 : f32 to vector<1x16x16xf32>
    %131 = arith.mulf %130, %129 : vector<1x16x16xf32>
    %132 = arith.addf %127, %131 : vector<1x16x16xf32>
    %c0_67 = arith.constant 0 : index
    %c0_68 = arith.constant 0 : index
    %c1_69 = arith.constant 1 : index
    %c2_70 = arith.constant 2 : index
    %133 = vector.load %arg4[%c0_67, %c0_68, %c1_69, %c2_70] : memref<2x1x22x22xf32, #tpu.memory_space<vmem>>, vector<2x1x16x16xf32>
    %c9 = arith.constant 9 : index
    %134 = memref.load %arg1[%c9] : memref<98xf32, #tpu.memory_space<smem>>
    %c58 = arith.constant 58 : index
    %135 = memref.load %arg1[%c58] : memref<98xf32, #tpu.memory_space<smem>>
    %136 = vector.extract_strided_slice %133 {offsets = [0, 0, 0, 0], sizes = [1, 1, 16, 16], strides = [1, 1, 1, 1]} : vector<2x1x16x16xf32> to vector<1x1x16x16xf32>
    %137 = vector.shape_cast %136 : vector<1x1x16x16xf32> to vector<1x16x16xf32>
    %138 = vector.broadcast %134 : f32 to vector<1x16x16xf32>
    %139 = arith.mulf %138, %137 : vector<1x16x16xf32>
    %140 = arith.addf %132, %139 : vector<1x16x16xf32>
    %141 = vector.extract_strided_slice %133 {offsets = [1, 0, 0, 0], sizes = [1, 1, 16, 16], strides = [1, 1, 1, 1]} : vector<2x1x16x16xf32> to vector<1x1x16x16xf32>
    %142 = vector.shape_cast %141 : vector<1x1x16x16xf32> to vector<1x16x16xf32>
    %143 = vector.broadcast %135 : f32 to vector<1x16x16xf32>
    %144 = arith.mulf %143, %142 : vector<1x16x16xf32>
    %145 = arith.addf %140, %144 : vector<1x16x16xf32>
    %c0_71 = arith.constant 0 : index
    %c0_72 = arith.constant 0 : index
    %c1_73 = arith.constant 1 : index
    %c3_74 = arith.constant 3 : index
    %146 = vector.load %arg4[%c0_71, %c0_72, %c1_73, %c3_74] : memref<2x1x22x22xf32, #tpu.memory_space<vmem>>, vector<2x1x16x16xf32>
    %c10 = arith.constant 10 : index
    %147 = memref.load %arg1[%c10] : memref<98xf32, #tpu.memory_space<smem>>
    %c59 = arith.constant 59 : index
    %148 = memref.load %arg1[%c59] : memref<98xf32, #tpu.memory_space<smem>>
    %149 = vector.extract_strided_slice %146 {offsets = [0, 0, 0, 0], sizes = [1, 1, 16, 16], strides = [1, 1, 1, 1]} : vector<2x1x16x16xf32> to vector<1x1x16x16xf32>
    %150 = vector.shape_cast %149 : vector<1x1x16x16xf32> to vector<1x16x16xf32>
    %151 = vector.broadcast %147 : f32 to vector<1x16x16xf32>
    %152 = arith.mulf %151, %150 : vector<1x16x16xf32>
    %153 = arith.addf %145, %152 : vector<1x16x16xf32>
    %154 = vector.extract_strided_slice %146 {offsets = [1, 0, 0, 0], sizes = [1, 1, 16, 16], strides = [1, 1, 1, 1]} : vector<2x1x16x16xf32> to vector<1x1x16x16xf32>
    %155 = vector.shape_cast %154 : vector<1x1x16x16xf32> to vector<1x16x16xf32>
    %156 = vector.broadcast %148 : f32 to vector<1x16x16xf32>
    %157 = arith.mulf %156, %155 : vector<1x16x16xf32>
    %158 = arith.addf %153, %157 : vector<1x16x16xf32>
    %c0_75 = arith.constant 0 : index
    %c0_76 = arith.constant 0 : index
    %c1_77 = arith.constant 1 : index
    %c4_78 = arith.constant 4 : index
    %159 = vector.load %arg4[%c0_75, %c0_76, %c1_77, %c4_78] : memref<2x1x22x22xf32, #tpu.memory_space<vmem>>, vector<2x1x16x16xf32>
    %c11 = arith.constant 11 : index
    %160 = memref.load %arg1[%c11] : memref<98xf32, #tpu.memory_space<smem>>
    %c60 = arith.constant 60 : index
    %161 = memref.load %arg1[%c60] : memref<98xf32, #tpu.memory_space<smem>>
    %162 = vector.extract_strided_slice %159 {offsets = [0, 0, 0, 0], sizes = [1, 1, 16, 16], strides = [1, 1, 1, 1]} : vector<2x1x16x16xf32> to vector<1x1x16x16xf32>
    %163 = vector.shape_cast %162 : vector<1x1x16x16xf32> to vector<1x16x16xf32>
    %164 = vector.broadcast %160 : f32 to vector<1x16x16xf32>
    %165 = arith.mulf %164, %163 : vector<1x16x16xf32>
    %166 = arith.addf %158, %165 : vector<1x16x16xf32>
    %167 = vector.extract_strided_slice %159 {offsets = [1, 0, 0, 0], sizes = [1, 1, 16, 16], strides = [1, 1, 1, 1]} : vector<2x1x16x16xf32> to vector<1x1x16x16xf32>
    %168 = vector.shape_cast %167 : vector<1x1x16x16xf32> to vector<1x16x16xf32>
    %169 = vector.broadcast %161 : f32 to vector<1x16x16xf32>
    %170 = arith.mulf %169, %168 : vector<1x16x16xf32>
    %171 = arith.addf %166, %170 : vector<1x16x16xf32>
    %c0_79 = arith.constant 0 : index
    %c0_80 = arith.constant 0 : index
    %c1_81 = arith.constant 1 : index
    %c5_82 = arith.constant 5 : index
    %172 = vector.load %arg4[%c0_79, %c0_80, %c1_81, %c5_82] : memref<2x1x22x22xf32, #tpu.memory_space<vmem>>, vector<2x1x16x16xf32>
    %c12 = arith.constant 12 : index
    %173 = memref.load %arg1[%c12] : memref<98xf32, #tpu.memory_space<smem>>
    %c61 = arith.constant 61 : index
    %174 = memref.load %arg1[%c61] : memref<98xf32, #tpu.memory_space<smem>>
    %175 = vector.extract_strided_slice %172 {offsets = [0, 0, 0, 0], sizes = [1, 1, 16, 16], strides = [1, 1, 1, 1]} : vector<2x1x16x16xf32> to vector<1x1x16x16xf32>
    %176 = vector.shape_cast %175 : vector<1x1x16x16xf32> to vector<1x16x16xf32>
    %177 = vector.broadcast %173 : f32 to vector<1x16x16xf32>
    %178 = arith.mulf %177, %176 : vector<1x16x16xf32>
    %179 = arith.addf %171, %178 : vector<1x16x16xf32>
    %180 = vector.extract_strided_slice %172 {offsets = [1, 0, 0, 0], sizes = [1, 1, 16, 16], strides = [1, 1, 1, 1]} : vector<2x1x16x16xf32> to vector<1x1x16x16xf32>
    %181 = vector.shape_cast %180 : vector<1x1x16x16xf32> to vector<1x16x16xf32>
    %182 = vector.broadcast %174 : f32 to vector<1x16x16xf32>
    %183 = arith.mulf %182, %181 : vector<1x16x16xf32>
    %184 = arith.addf %179, %183 : vector<1x16x16xf32>
    %c0_83 = arith.constant 0 : index
    %c0_84 = arith.constant 0 : index
    %c1_85 = arith.constant 1 : index
    %c6_86 = arith.constant 6 : index
    %185 = vector.load %arg4[%c0_83, %c0_84, %c1_85, %c6_86] : memref<2x1x22x22xf32, #tpu.memory_space<vmem>>, vector<2x1x16x16xf32>
    %c13 = arith.constant 13 : index
    %186 = memref.load %arg1[%c13] : memref<98xf32, #tpu.memory_space<smem>>
    %c62 = arith.constant 62 : index
    %187 = memref.load %arg1[%c62] : memref<98xf32, #tpu.memory_space<smem>>
    %188 = vector.extract_strided_slice %185 {offsets = [0, 0, 0, 0], sizes = [1, 1, 16, 16], strides = [1, 1, 1, 1]} : vector<2x1x16x16xf32> to vector<1x1x16x16xf32>
    %189 = vector.shape_cast %188 : vector<1x1x16x16xf32> to vector<1x16x16xf32>
    %190 = vector.broadcast %186 : f32 to vector<1x16x16xf32>
    %191 = arith.mulf %190, %189 : vector<1x16x16xf32>
    %192 = arith.addf %184, %191 : vector<1x16x16xf32>
    %193 = vector.extract_strided_slice %185 {offsets = [1, 0, 0, 0], sizes = [1, 1, 16, 16], strides = [1, 1, 1, 1]} : vector<2x1x16x16xf32> to vector<1x1x16x16xf32>
    %194 = vector.shape_cast %193 : vector<1x1x16x16xf32> to vector<1x16x16xf32>
    %195 = vector.broadcast %187 : f32 to vector<1x16x16xf32>
    %196 = arith.mulf %195, %194 : vector<1x16x16xf32>
    %197 = arith.addf %192, %196 : vector<1x16x16xf32>
    %c0_87 = arith.constant 0 : index
    %c0_88 = arith.constant 0 : index
    %c2_89 = arith.constant 2 : index
    %c0_90 = arith.constant 0 : index
    %198 = vector.load %arg4[%c0_87, %c0_88, %c2_89, %c0_90] : memref<2x1x22x22xf32, #tpu.memory_space<vmem>>, vector<2x1x16x16xf32>
    %c14 = arith.constant 14 : index
    %199 = memref.load %arg1[%c14] : memref<98xf32, #tpu.memory_space<smem>>
    %c63 = arith.constant 63 : index
    %200 = memref.load %arg1[%c63] : memref<98xf32, #tpu.memory_space<smem>>
    %201 = vector.extract_strided_slice %198 {offsets = [0, 0, 0, 0], sizes = [1, 1, 16, 16], strides = [1, 1, 1, 1]} : vector<2x1x16x16xf32> to vector<1x1x16x16xf32>
    %202 = vector.shape_cast %201 : vector<1x1x16x16xf32> to vector<1x16x16xf32>
    %203 = vector.broadcast %199 : f32 to vector<1x16x16xf32>
    %204 = arith.mulf %203, %202 : vector<1x16x16xf32>
    %205 = arith.addf %197, %204 : vector<1x16x16xf32>
    %206 = vector.extract_strided_slice %198 {offsets = [1, 0, 0, 0], sizes = [1, 1, 16, 16], strides = [1, 1, 1, 1]} : vector<2x1x16x16xf32> to vector<1x1x16x16xf32>
    %207 = vector.shape_cast %206 : vector<1x1x16x16xf32> to vector<1x16x16xf32>
    %208 = vector.broadcast %200 : f32 to vector<1x16x16xf32>
    %209 = arith.mulf %208, %207 : vector<1x16x16xf32>
    %210 = arith.addf %205, %209 : vector<1x16x16xf32>
    %c0_91 = arith.constant 0 : index
    %c0_92 = arith.constant 0 : index
    %c2_93 = arith.constant 2 : index
    %c1_94 = arith.constant 1 : index
    %211 = vector.load %arg4[%c0_91, %c0_92, %c2_93, %c1_94] : memref<2x1x22x22xf32, #tpu.memory_space<vmem>>, vector<2x1x16x16xf32>
    %c15 = arith.constant 15 : index
    %212 = memref.load %arg1[%c15] : memref<98xf32, #tpu.memory_space<smem>>
    %c64 = arith.constant 64 : index
    %213 = memref.load %arg1[%c64] : memref<98xf32, #tpu.memory_space<smem>>
    %214 = vector.extract_strided_slice %211 {offsets = [0, 0, 0, 0], sizes = [1, 1, 16, 16], strides = [1, 1, 1, 1]} : vector<2x1x16x16xf32> to vector<1x1x16x16xf32>
    %215 = vector.shape_cast %214 : vector<1x1x16x16xf32> to vector<1x16x16xf32>
    %216 = vector.broadcast %212 : f32 to vector<1x16x16xf32>
    %217 = arith.mulf %216, %215 : vector<1x16x16xf32>
    %218 = arith.addf %210, %217 : vector<1x16x16xf32>
    %219 = vector.extract_strided_slice %211 {offsets = [1, 0, 0, 0], sizes = [1, 1, 16, 16], strides = [1, 1, 1, 1]} : vector<2x1x16x16xf32> to vector<1x1x16x16xf32>
    %220 = vector.shape_cast %219 : vector<1x1x16x16xf32> to vector<1x16x16xf32>
    %221 = vector.broadcast %213 : f32 to vector<1x16x16xf32>
    %222 = arith.mulf %221, %220 : vector<1x16x16xf32>
    %223 = arith.addf %218, %222 : vector<1x16x16xf32>
    %c0_95 = arith.constant 0 : index
    %c0_96 = arith.constant 0 : index
    %c2_97 = arith.constant 2 : index
    %c2_98 = arith.constant 2 : index
    %224 = vector.load %arg4[%c0_95, %c0_96, %c2_97, %c2_98] : memref<2x1x22x22xf32, #tpu.memory_space<vmem>>, vector<2x1x16x16xf32>
    %c16 = arith.constant 16 : index
    %225 = memref.load %arg1[%c16] : memref<98xf32, #tpu.memory_space<smem>>
    %c65 = arith.constant 65 : index
    %226 = memref.load %arg1[%c65] : memref<98xf32, #tpu.memory_space<smem>>
    %227 = vector.extract_strided_slice %224 {offsets = [0, 0, 0, 0], sizes = [1, 1, 16, 16], strides = [1, 1, 1, 1]} : vector<2x1x16x16xf32> to vector<1x1x16x16xf32>
    %228 = vector.shape_cast %227 : vector<1x1x16x16xf32> to vector<1x16x16xf32>
    %229 = vector.broadcast %225 : f32 to vector<1x16x16xf32>
    %230 = arith.mulf %229, %228 : vector<1x16x16xf32>
    %231 = arith.addf %223, %230 : vector<1x16x16xf32>
    %232 = vector.extract_strided_slice %224 {offsets = [1, 0, 0, 0], sizes = [1, 1, 16, 16], strides = [1, 1, 1, 1]} : vector<2x1x16x16xf32> to vector<1x1x16x16xf32>
    %233 = vector.shape_cast %232 : vector<1x1x16x16xf32> to vector<1x16x16xf32>
    %234 = vector.broadcast %226 : f32 to vector<1x16x16xf32>
    %235 = arith.mulf %234, %233 : vector<1x16x16xf32>
    %236 = arith.addf %231, %235 : vector<1x16x16xf32>
    %c0_99 = arith.constant 0 : index
    %c0_100 = arith.constant 0 : index
    %c2_101 = arith.constant 2 : index
    %c3_102 = arith.constant 3 : index
    %237 = vector.load %arg4[%c0_99, %c0_100, %c2_101, %c3_102] : memref<2x1x22x22xf32, #tpu.memory_space<vmem>>, vector<2x1x16x16xf32>
    %c17 = arith.constant 17 : index
    %238 = memref.load %arg1[%c17] : memref<98xf32, #tpu.memory_space<smem>>
    %c66 = arith.constant 66 : index
    %239 = memref.load %arg1[%c66] : memref<98xf32, #tpu.memory_space<smem>>
    %240 = vector.extract_strided_slice %237 {offsets = [0, 0, 0, 0], sizes = [1, 1, 16, 16], strides = [1, 1, 1, 1]} : vector<2x1x16x16xf32> to vector<1x1x16x16xf32>
    %241 = vector.shape_cast %240 : vector<1x1x16x16xf32> to vector<1x16x16xf32>
    %242 = vector.broadcast %238 : f32 to vector<1x16x16xf32>
    %243 = arith.mulf %242, %241 : vector<1x16x16xf32>
    %244 = arith.addf %236, %243 : vector<1x16x16xf32>
    %245 = vector.extract_strided_slice %237 {offsets = [1, 0, 0, 0], sizes = [1, 1, 16, 16], strides = [1, 1, 1, 1]} : vector<2x1x16x16xf32> to vector<1x1x16x16xf32>
    %246 = vector.shape_cast %245 : vector<1x1x16x16xf32> to vector<1x16x16xf32>
    %247 = vector.broadcast %239 : f32 to vector<1x16x16xf32>
    %248 = arith.mulf %247, %246 : vector<1x16x16xf32>
    %249 = arith.addf %244, %248 : vector<1x16x16xf32>
    %c0_103 = arith.constant 0 : index
    %c0_104 = arith.constant 0 : index
    %c2_105 = arith.constant 2 : index
    %c4_106 = arith.constant 4 : index
    %250 = vector.load %arg4[%c0_103, %c0_104, %c2_105, %c4_106] : memref<2x1x22x22xf32, #tpu.memory_space<vmem>>, vector<2x1x16x16xf32>
    %c18 = arith.constant 18 : index
    %251 = memref.load %arg1[%c18] : memref<98xf32, #tpu.memory_space<smem>>
    %c67 = arith.constant 67 : index
    %252 = memref.load %arg1[%c67] : memref<98xf32, #tpu.memory_space<smem>>
    %253 = vector.extract_strided_slice %250 {offsets = [0, 0, 0, 0], sizes = [1, 1, 16, 16], strides = [1, 1, 1, 1]} : vector<2x1x16x16xf32> to vector<1x1x16x16xf32>
    %254 = vector.shape_cast %253 : vector<1x1x16x16xf32> to vector<1x16x16xf32>
    %255 = vector.broadcast %251 : f32 to vector<1x16x16xf32>
    %256 = arith.mulf %255, %254 : vector<1x16x16xf32>
    %257 = arith.addf %249, %256 : vector<1x16x16xf32>
    %258 = vector.extract_strided_slice %250 {offsets = [1, 0, 0, 0], sizes = [1, 1, 16, 16], strides = [1, 1, 1, 1]} : vector<2x1x16x16xf32> to vector<1x1x16x16xf32>
    %259 = vector.shape_cast %258 : vector<1x1x16x16xf32> to vector<1x16x16xf32>
    %260 = vector.broadcast %252 : f32 to vector<1x16x16xf32>
    %261 = arith.mulf %260, %259 : vector<1x16x16xf32>
    %262 = arith.addf %257, %261 : vector<1x16x16xf32>
    %c0_107 = arith.constant 0 : index
    %c0_108 = arith.constant 0 : index
    %c2_109 = arith.constant 2 : index
    %c5_110 = arith.constant 5 : index
    %263 = vector.load %arg4[%c0_107, %c0_108, %c2_109, %c5_110] : memref<2x1x22x22xf32, #tpu.memory_space<vmem>>, vector<2x1x16x16xf32>
    %c19_111 = arith.constant 19 : index
    %264 = memref.load %arg1[%c19_111] : memref<98xf32, #tpu.memory_space<smem>>
    %c68 = arith.constant 68 : index
    %265 = memref.load %arg1[%c68] : memref<98xf32, #tpu.memory_space<smem>>
    %266 = vector.extract_strided_slice %263 {offsets = [0, 0, 0, 0], sizes = [1, 1, 16, 16], strides = [1, 1, 1, 1]} : vector<2x1x16x16xf32> to vector<1x1x16x16xf32>
    %267 = vector.shape_cast %266 : vector<1x1x16x16xf32> to vector<1x16x16xf32>
    %268 = vector.broadcast %264 : f32 to vector<1x16x16xf32>
    %269 = arith.mulf %268, %267 : vector<1x16x16xf32>
    %270 = arith.addf %262, %269 : vector<1x16x16xf32>
    %271 = vector.extract_strided_slice %263 {offsets = [1, 0, 0, 0], sizes = [1, 1, 16, 16], strides = [1, 1, 1, 1]} : vector<2x1x16x16xf32> to vector<1x1x16x16xf32>
    %272 = vector.shape_cast %271 : vector<1x1x16x16xf32> to vector<1x16x16xf32>
    %273 = vector.broadcast %265 : f32 to vector<1x16x16xf32>
    %274 = arith.mulf %273, %272 : vector<1x16x16xf32>
    %275 = arith.addf %270, %274 : vector<1x16x16xf32>
    %c0_112 = arith.constant 0 : index
    %c0_113 = arith.constant 0 : index
    %c2_114 = arith.constant 2 : index
    %c6_115 = arith.constant 6 : index
    %276 = vector.load %arg4[%c0_112, %c0_113, %c2_114, %c6_115] : memref<2x1x22x22xf32, #tpu.memory_space<vmem>>, vector<2x1x16x16xf32>
    %c20 = arith.constant 20 : index
    %277 = memref.load %arg1[%c20] : memref<98xf32, #tpu.memory_space<smem>>
    %c69 = arith.constant 69 : index
    %278 = memref.load %arg1[%c69] : memref<98xf32, #tpu.memory_space<smem>>
    %279 = vector.extract_strided_slice %276 {offsets = [0, 0, 0, 0], sizes = [1, 1, 16, 16], strides = [1, 1, 1, 1]} : vector<2x1x16x16xf32> to vector<1x1x16x16xf32>
    %280 = vector.shape_cast %279 : vector<1x1x16x16xf32> to vector<1x16x16xf32>
    %281 = vector.broadcast %277 : f32 to vector<1x16x16xf32>
    %282 = arith.mulf %281, %280 : vector<1x16x16xf32>
    %283 = arith.addf %275, %282 : vector<1x16x16xf32>
    %284 = vector.extract_strided_slice %276 {offsets = [1, 0, 0, 0], sizes = [1, 1, 16, 16], strides = [1, 1, 1, 1]} : vector<2x1x16x16xf32> to vector<1x1x16x16xf32>
    %285 = vector.shape_cast %284 : vector<1x1x16x16xf32> to vector<1x16x16xf32>
    %286 = vector.broadcast %278 : f32 to vector<1x16x16xf32>
    %287 = arith.mulf %286, %285 : vector<1x16x16xf32>
    %288 = arith.addf %283, %287 : vector<1x16x16xf32>
    %c0_116 = arith.constant 0 : index
    %c0_117 = arith.constant 0 : index
    %c3_118 = arith.constant 3 : index
    %c0_119 = arith.constant 0 : index
    %289 = vector.load %arg4[%c0_116, %c0_117, %c3_118, %c0_119] : memref<2x1x22x22xf32, #tpu.memory_space<vmem>>, vector<2x1x16x16xf32>
    %c21 = arith.constant 21 : index
    %290 = memref.load %arg1[%c21] : memref<98xf32, #tpu.memory_space<smem>>
    %c70 = arith.constant 70 : index
    %291 = memref.load %arg1[%c70] : memref<98xf32, #tpu.memory_space<smem>>
    %292 = vector.extract_strided_slice %289 {offsets = [0, 0, 0, 0], sizes = [1, 1, 16, 16], strides = [1, 1, 1, 1]} : vector<2x1x16x16xf32> to vector<1x1x16x16xf32>
    %293 = vector.shape_cast %292 : vector<1x1x16x16xf32> to vector<1x16x16xf32>
    %294 = vector.broadcast %290 : f32 to vector<1x16x16xf32>
    %295 = arith.mulf %294, %293 : vector<1x16x16xf32>
    %296 = arith.addf %288, %295 : vector<1x16x16xf32>
    %297 = vector.extract_strided_slice %289 {offsets = [1, 0, 0, 0], sizes = [1, 1, 16, 16], strides = [1, 1, 1, 1]} : vector<2x1x16x16xf32> to vector<1x1x16x16xf32>
    %298 = vector.shape_cast %297 : vector<1x1x16x16xf32> to vector<1x16x16xf32>
    %299 = vector.broadcast %291 : f32 to vector<1x16x16xf32>
    %300 = arith.mulf %299, %298 : vector<1x16x16xf32>
    %301 = arith.addf %296, %300 : vector<1x16x16xf32>
    %c0_120 = arith.constant 0 : index
    %c0_121 = arith.constant 0 : index
    %c3_122 = arith.constant 3 : index
    %c1_123 = arith.constant 1 : index
    %302 = vector.load %arg4[%c0_120, %c0_121, %c3_122, %c1_123] : memref<2x1x22x22xf32, #tpu.memory_space<vmem>>, vector<2x1x16x16xf32>
    %c22 = arith.constant 22 : index
    %303 = memref.load %arg1[%c22] : memref<98xf32, #tpu.memory_space<smem>>
    %c71 = arith.constant 71 : index
    %304 = memref.load %arg1[%c71] : memref<98xf32, #tpu.memory_space<smem>>
    %305 = vector.extract_strided_slice %302 {offsets = [0, 0, 0, 0], sizes = [1, 1, 16, 16], strides = [1, 1, 1, 1]} : vector<2x1x16x16xf32> to vector<1x1x16x16xf32>
    %306 = vector.shape_cast %305 : vector<1x1x16x16xf32> to vector<1x16x16xf32>
    %307 = vector.broadcast %303 : f32 to vector<1x16x16xf32>
    %308 = arith.mulf %307, %306 : vector<1x16x16xf32>
    %309 = arith.addf %301, %308 : vector<1x16x16xf32>
    %310 = vector.extract_strided_slice %302 {offsets = [1, 0, 0, 0], sizes = [1, 1, 16, 16], strides = [1, 1, 1, 1]} : vector<2x1x16x16xf32> to vector<1x1x16x16xf32>
    %311 = vector.shape_cast %310 : vector<1x1x16x16xf32> to vector<1x16x16xf32>
    %312 = vector.broadcast %304 : f32 to vector<1x16x16xf32>
    %313 = arith.mulf %312, %311 : vector<1x16x16xf32>
    %314 = arith.addf %309, %313 : vector<1x16x16xf32>
    %c0_124 = arith.constant 0 : index
    %c0_125 = arith.constant 0 : index
    %c3_126 = arith.constant 3 : index
    %c2_127 = arith.constant 2 : index
    %315 = vector.load %arg4[%c0_124, %c0_125, %c3_126, %c2_127] : memref<2x1x22x22xf32, #tpu.memory_space<vmem>>, vector<2x1x16x16xf32>
    %c23 = arith.constant 23 : index
    %316 = memref.load %arg1[%c23] : memref<98xf32, #tpu.memory_space<smem>>
    %c72 = arith.constant 72 : index
    %317 = memref.load %arg1[%c72] : memref<98xf32, #tpu.memory_space<smem>>
    %318 = vector.extract_strided_slice %315 {offsets = [0, 0, 0, 0], sizes = [1, 1, 16, 16], strides = [1, 1, 1, 1]} : vector<2x1x16x16xf32> to vector<1x1x16x16xf32>
    %319 = vector.shape_cast %318 : vector<1x1x16x16xf32> to vector<1x16x16xf32>
    %320 = vector.broadcast %316 : f32 to vector<1x16x16xf32>
    %321 = arith.mulf %320, %319 : vector<1x16x16xf32>
    %322 = arith.addf %314, %321 : vector<1x16x16xf32>
    %323 = vector.extract_strided_slice %315 {offsets = [1, 0, 0, 0], sizes = [1, 1, 16, 16], strides = [1, 1, 1, 1]} : vector<2x1x16x16xf32> to vector<1x1x16x16xf32>
    %324 = vector.shape_cast %323 : vector<1x1x16x16xf32> to vector<1x16x16xf32>
    %325 = vector.broadcast %317 : f32 to vector<1x16x16xf32>
    %326 = arith.mulf %325, %324 : vector<1x16x16xf32>
    %327 = arith.addf %322, %326 : vector<1x16x16xf32>
    %c0_128 = arith.constant 0 : index
    %c0_129 = arith.constant 0 : index
    %c3_130 = arith.constant 3 : index
    %c3_131 = arith.constant 3 : index
    %328 = vector.load %arg4[%c0_128, %c0_129, %c3_130, %c3_131] : memref<2x1x22x22xf32, #tpu.memory_space<vmem>>, vector<2x1x16x16xf32>
    %c24 = arith.constant 24 : index
    %329 = memref.load %arg1[%c24] : memref<98xf32, #tpu.memory_space<smem>>
    %c73 = arith.constant 73 : index
    %330 = memref.load %arg1[%c73] : memref<98xf32, #tpu.memory_space<smem>>
    %331 = vector.extract_strided_slice %328 {offsets = [0, 0, 0, 0], sizes = [1, 1, 16, 16], strides = [1, 1, 1, 1]} : vector<2x1x16x16xf32> to vector<1x1x16x16xf32>
    %332 = vector.shape_cast %331 : vector<1x1x16x16xf32> to vector<1x16x16xf32>
    %333 = vector.broadcast %329 : f32 to vector<1x16x16xf32>
    %334 = arith.mulf %333, %332 : vector<1x16x16xf32>
    %335 = arith.addf %327, %334 : vector<1x16x16xf32>
    %336 = vector.extract_strided_slice %328 {offsets = [1, 0, 0, 0], sizes = [1, 1, 16, 16], strides = [1, 1, 1, 1]} : vector<2x1x16x16xf32> to vector<1x1x16x16xf32>
    %337 = vector.shape_cast %336 : vector<1x1x16x16xf32> to vector<1x16x16xf32>
    %338 = vector.broadcast %330 : f32 to vector<1x16x16xf32>
    %339 = arith.mulf %338, %337 : vector<1x16x16xf32>
    %340 = arith.addf %335, %339 : vector<1x16x16xf32>
    %c0_132 = arith.constant 0 : index
    %c0_133 = arith.constant 0 : index
    %c3_134 = arith.constant 3 : index
    %c4_135 = arith.constant 4 : index
    %341 = vector.load %arg4[%c0_132, %c0_133, %c3_134, %c4_135] : memref<2x1x22x22xf32, #tpu.memory_space<vmem>>, vector<2x1x16x16xf32>
    %c25 = arith.constant 25 : index
    %342 = memref.load %arg1[%c25] : memref<98xf32, #tpu.memory_space<smem>>
    %c74 = arith.constant 74 : index
    %343 = memref.load %arg1[%c74] : memref<98xf32, #tpu.memory_space<smem>>
    %344 = vector.extract_strided_slice %341 {offsets = [0, 0, 0, 0], sizes = [1, 1, 16, 16], strides = [1, 1, 1, 1]} : vector<2x1x16x16xf32> to vector<1x1x16x16xf32>
    %345 = vector.shape_cast %344 : vector<1x1x16x16xf32> to vector<1x16x16xf32>
    %346 = vector.broadcast %342 : f32 to vector<1x16x16xf32>
    %347 = arith.mulf %346, %345 : vector<1x16x16xf32>
    %348 = arith.addf %340, %347 : vector<1x16x16xf32>
    %349 = vector.extract_strided_slice %341 {offsets = [1, 0, 0, 0], sizes = [1, 1, 16, 16], strides = [1, 1, 1, 1]} : vector<2x1x16x16xf32> to vector<1x1x16x16xf32>
    %350 = vector.shape_cast %349 : vector<1x1x16x16xf32> to vector<1x16x16xf32>
    %351 = vector.broadcast %343 : f32 to vector<1x16x16xf32>
    %352 = arith.mulf %351, %350 : vector<1x16x16xf32>
    %353 = arith.addf %348, %352 : vector<1x16x16xf32>
    %c0_136 = arith.constant 0 : index
    %c0_137 = arith.constant 0 : index
    %c3_138 = arith.constant 3 : index
    %c5_139 = arith.constant 5 : index
    %354 = vector.load %arg4[%c0_136, %c0_137, %c3_138, %c5_139] : memref<2x1x22x22xf32, #tpu.memory_space<vmem>>, vector<2x1x16x16xf32>
    %c26 = arith.constant 26 : index
    %355 = memref.load %arg1[%c26] : memref<98xf32, #tpu.memory_space<smem>>
    %c75 = arith.constant 75 : index
    %356 = memref.load %arg1[%c75] : memref<98xf32, #tpu.memory_space<smem>>
    %357 = vector.extract_strided_slice %354 {offsets = [0, 0, 0, 0], sizes = [1, 1, 16, 16], strides = [1, 1, 1, 1]} : vector<2x1x16x16xf32> to vector<1x1x16x16xf32>
    %358 = vector.shape_cast %357 : vector<1x1x16x16xf32> to vector<1x16x16xf32>
    %359 = vector.broadcast %355 : f32 to vector<1x16x16xf32>
    %360 = arith.mulf %359, %358 : vector<1x16x16xf32>
    %361 = arith.addf %353, %360 : vector<1x16x16xf32>
    %362 = vector.extract_strided_slice %354 {offsets = [1, 0, 0, 0], sizes = [1, 1, 16, 16], strides = [1, 1, 1, 1]} : vector<2x1x16x16xf32> to vector<1x1x16x16xf32>
    %363 = vector.shape_cast %362 : vector<1x1x16x16xf32> to vector<1x16x16xf32>
    %364 = vector.broadcast %356 : f32 to vector<1x16x16xf32>
    %365 = arith.mulf %364, %363 : vector<1x16x16xf32>
    %366 = arith.addf %361, %365 : vector<1x16x16xf32>
    %c0_140 = arith.constant 0 : index
    %c0_141 = arith.constant 0 : index
    %c3_142 = arith.constant 3 : index
    %c6_143 = arith.constant 6 : index
    %367 = vector.load %arg4[%c0_140, %c0_141, %c3_142, %c6_143] : memref<2x1x22x22xf32, #tpu.memory_space<vmem>>, vector<2x1x16x16xf32>
    %c27 = arith.constant 27 : index
    %368 = memref.load %arg1[%c27] : memref<98xf32, #tpu.memory_space<smem>>
    %c76 = arith.constant 76 : index
    %369 = memref.load %arg1[%c76] : memref<98xf32, #tpu.memory_space<smem>>
    %370 = vector.extract_strided_slice %367 {offsets = [0, 0, 0, 0], sizes = [1, 1, 16, 16], strides = [1, 1, 1, 1]} : vector<2x1x16x16xf32> to vector<1x1x16x16xf32>
    %371 = vector.shape_cast %370 : vector<1x1x16x16xf32> to vector<1x16x16xf32>
    %372 = vector.broadcast %368 : f32 to vector<1x16x16xf32>
    %373 = arith.mulf %372, %371 : vector<1x16x16xf32>
    %374 = arith.addf %366, %373 : vector<1x16x16xf32>
    %375 = vector.extract_strided_slice %367 {offsets = [1, 0, 0, 0], sizes = [1, 1, 16, 16], strides = [1, 1, 1, 1]} : vector<2x1x16x16xf32> to vector<1x1x16x16xf32>
    %376 = vector.shape_cast %375 : vector<1x1x16x16xf32> to vector<1x16x16xf32>
    %377 = vector.broadcast %369 : f32 to vector<1x16x16xf32>
    %378 = arith.mulf %377, %376 : vector<1x16x16xf32>
    %379 = arith.addf %374, %378 : vector<1x16x16xf32>
    %c0_144 = arith.constant 0 : index
    %c0_145 = arith.constant 0 : index
    %c4_146 = arith.constant 4 : index
    %c0_147 = arith.constant 0 : index
    %380 = vector.load %arg4[%c0_144, %c0_145, %c4_146, %c0_147] : memref<2x1x22x22xf32, #tpu.memory_space<vmem>>, vector<2x1x16x16xf32>
    %c28 = arith.constant 28 : index
    %381 = memref.load %arg1[%c28] : memref<98xf32, #tpu.memory_space<smem>>
    %c77 = arith.constant 77 : index
    %382 = memref.load %arg1[%c77] : memref<98xf32, #tpu.memory_space<smem>>
    %383 = vector.extract_strided_slice %380 {offsets = [0, 0, 0, 0], sizes = [1, 1, 16, 16], strides = [1, 1, 1, 1]} : vector<2x1x16x16xf32> to vector<1x1x16x16xf32>
    %384 = vector.shape_cast %383 : vector<1x1x16x16xf32> to vector<1x16x16xf32>
    %385 = vector.broadcast %381 : f32 to vector<1x16x16xf32>
    %386 = arith.mulf %385, %384 : vector<1x16x16xf32>
    %387 = arith.addf %379, %386 : vector<1x16x16xf32>
    %388 = vector.extract_strided_slice %380 {offsets = [1, 0, 0, 0], sizes = [1, 1, 16, 16], strides = [1, 1, 1, 1]} : vector<2x1x16x16xf32> to vector<1x1x16x16xf32>
    %389 = vector.shape_cast %388 : vector<1x1x16x16xf32> to vector<1x16x16xf32>
    %390 = vector.broadcast %382 : f32 to vector<1x16x16xf32>
    %391 = arith.mulf %390, %389 : vector<1x16x16xf32>
    %392 = arith.addf %387, %391 : vector<1x16x16xf32>
    %c0_148 = arith.constant 0 : index
    %c0_149 = arith.constant 0 : index
    %c4_150 = arith.constant 4 : index
    %c1_151 = arith.constant 1 : index
    %393 = vector.load %arg4[%c0_148, %c0_149, %c4_150, %c1_151] : memref<2x1x22x22xf32, #tpu.memory_space<vmem>>, vector<2x1x16x16xf32>
    %c29 = arith.constant 29 : index
    %394 = memref.load %arg1[%c29] : memref<98xf32, #tpu.memory_space<smem>>
    %c78 = arith.constant 78 : index
    %395 = memref.load %arg1[%c78] : memref<98xf32, #tpu.memory_space<smem>>
    %396 = vector.extract_strided_slice %393 {offsets = [0, 0, 0, 0], sizes = [1, 1, 16, 16], strides = [1, 1, 1, 1]} : vector<2x1x16x16xf32> to vector<1x1x16x16xf32>
    %397 = vector.shape_cast %396 : vector<1x1x16x16xf32> to vector<1x16x16xf32>
    %398 = vector.broadcast %394 : f32 to vector<1x16x16xf32>
    %399 = arith.mulf %398, %397 : vector<1x16x16xf32>
    %400 = arith.addf %392, %399 : vector<1x16x16xf32>
    %401 = vector.extract_strided_slice %393 {offsets = [1, 0, 0, 0], sizes = [1, 1, 16, 16], strides = [1, 1, 1, 1]} : vector<2x1x16x16xf32> to vector<1x1x16x16xf32>
    %402 = vector.shape_cast %401 : vector<1x1x16x16xf32> to vector<1x16x16xf32>
    %403 = vector.broadcast %395 : f32 to vector<1x16x16xf32>
    %404 = arith.mulf %403, %402 : vector<1x16x16xf32>
    %405 = arith.addf %400, %404 : vector<1x16x16xf32>
    %c0_152 = arith.constant 0 : index
    %c0_153 = arith.constant 0 : index
    %c4_154 = arith.constant 4 : index
    %c2_155 = arith.constant 2 : index
    %406 = vector.load %arg4[%c0_152, %c0_153, %c4_154, %c2_155] : memref<2x1x22x22xf32, #tpu.memory_space<vmem>>, vector<2x1x16x16xf32>
    %c30 = arith.constant 30 : index
    %407 = memref.load %arg1[%c30] : memref<98xf32, #tpu.memory_space<smem>>
    %c79 = arith.constant 79 : index
    %408 = memref.load %arg1[%c79] : memref<98xf32, #tpu.memory_space<smem>>
    %409 = vector.extract_strided_slice %406 {offsets = [0, 0, 0, 0], sizes = [1, 1, 16, 16], strides = [1, 1, 1, 1]} : vector<2x1x16x16xf32> to vector<1x1x16x16xf32>
    %410 = vector.shape_cast %409 : vector<1x1x16x16xf32> to vector<1x16x16xf32>
    %411 = vector.broadcast %407 : f32 to vector<1x16x16xf32>
    %412 = arith.mulf %411, %410 : vector<1x16x16xf32>
    %413 = arith.addf %405, %412 : vector<1x16x16xf32>
    %414 = vector.extract_strided_slice %406 {offsets = [1, 0, 0, 0], sizes = [1, 1, 16, 16], strides = [1, 1, 1, 1]} : vector<2x1x16x16xf32> to vector<1x1x16x16xf32>
    %415 = vector.shape_cast %414 : vector<1x1x16x16xf32> to vector<1x16x16xf32>
    %416 = vector.broadcast %408 : f32 to vector<1x16x16xf32>
    %417 = arith.mulf %416, %415 : vector<1x16x16xf32>
    %418 = arith.addf %413, %417 : vector<1x16x16xf32>
    %c0_156 = arith.constant 0 : index
    %c0_157 = arith.constant 0 : index
    %c4_158 = arith.constant 4 : index
    %c3_159 = arith.constant 3 : index
    %419 = vector.load %arg4[%c0_156, %c0_157, %c4_158, %c3_159] : memref<2x1x22x22xf32, #tpu.memory_space<vmem>>, vector<2x1x16x16xf32>
    %c31 = arith.constant 31 : index
    %420 = memref.load %arg1[%c31] : memref<98xf32, #tpu.memory_space<smem>>
    %c80 = arith.constant 80 : index
    %421 = memref.load %arg1[%c80] : memref<98xf32, #tpu.memory_space<smem>>
    %422 = vector.extract_strided_slice %419 {offsets = [0, 0, 0, 0], sizes = [1, 1, 16, 16], strides = [1, 1, 1, 1]} : vector<2x1x16x16xf32> to vector<1x1x16x16xf32>
    %423 = vector.shape_cast %422 : vector<1x1x16x16xf32> to vector<1x16x16xf32>
    %424 = vector.broadcast %420 : f32 to vector<1x16x16xf32>
    %425 = arith.mulf %424, %423 : vector<1x16x16xf32>
    %426 = arith.addf %418, %425 : vector<1x16x16xf32>
    %427 = vector.extract_strided_slice %419 {offsets = [1, 0, 0, 0], sizes = [1, 1, 16, 16], strides = [1, 1, 1, 1]} : vector<2x1x16x16xf32> to vector<1x1x16x16xf32>
    %428 = vector.shape_cast %427 : vector<1x1x16x16xf32> to vector<1x16x16xf32>
    %429 = vector.broadcast %421 : f32 to vector<1x16x16xf32>
    %430 = arith.mulf %429, %428 : vector<1x16x16xf32>
    %431 = arith.addf %426, %430 : vector<1x16x16xf32>
    %c0_160 = arith.constant 0 : index
    %c0_161 = arith.constant 0 : index
    %c4_162 = arith.constant 4 : index
    %c4_163 = arith.constant 4 : index
    %432 = vector.load %arg4[%c0_160, %c0_161, %c4_162, %c4_163] : memref<2x1x22x22xf32, #tpu.memory_space<vmem>>, vector<2x1x16x16xf32>
    %c32 = arith.constant 32 : index
    %433 = memref.load %arg1[%c32] : memref<98xf32, #tpu.memory_space<smem>>
    %c81 = arith.constant 81 : index
    %434 = memref.load %arg1[%c81] : memref<98xf32, #tpu.memory_space<smem>>
    %435 = vector.extract_strided_slice %432 {offsets = [0, 0, 0, 0], sizes = [1, 1, 16, 16], strides = [1, 1, 1, 1]} : vector<2x1x16x16xf32> to vector<1x1x16x16xf32>
    %436 = vector.shape_cast %435 : vector<1x1x16x16xf32> to vector<1x16x16xf32>
    %437 = vector.broadcast %433 : f32 to vector<1x16x16xf32>
    %438 = arith.mulf %437, %436 : vector<1x16x16xf32>
    %439 = arith.addf %431, %438 : vector<1x16x16xf32>
    %440 = vector.extract_strided_slice %432 {offsets = [1, 0, 0, 0], sizes = [1, 1, 16, 16], strides = [1, 1, 1, 1]} : vector<2x1x16x16xf32> to vector<1x1x16x16xf32>
    %441 = vector.shape_cast %440 : vector<1x1x16x16xf32> to vector<1x16x16xf32>
    %442 = vector.broadcast %434 : f32 to vector<1x16x16xf32>
    %443 = arith.mulf %442, %441 : vector<1x16x16xf32>
    %444 = arith.addf %439, %443 : vector<1x16x16xf32>
    %c0_164 = arith.constant 0 : index
    %c0_165 = arith.constant 0 : index
    %c4_166 = arith.constant 4 : index
    %c5_167 = arith.constant 5 : index
    %445 = vector.load %arg4[%c0_164, %c0_165, %c4_166, %c5_167] : memref<2x1x22x22xf32, #tpu.memory_space<vmem>>, vector<2x1x16x16xf32>
    %c33 = arith.constant 33 : index
    %446 = memref.load %arg1[%c33] : memref<98xf32, #tpu.memory_space<smem>>
    %c82 = arith.constant 82 : index
    %447 = memref.load %arg1[%c82] : memref<98xf32, #tpu.memory_space<smem>>
    %448 = vector.extract_strided_slice %445 {offsets = [0, 0, 0, 0], sizes = [1, 1, 16, 16], strides = [1, 1, 1, 1]} : vector<2x1x16x16xf32> to vector<1x1x16x16xf32>
    %449 = vector.shape_cast %448 : vector<1x1x16x16xf32> to vector<1x16x16xf32>
    %450 = vector.broadcast %446 : f32 to vector<1x16x16xf32>
    %451 = arith.mulf %450, %449 : vector<1x16x16xf32>
    %452 = arith.addf %444, %451 : vector<1x16x16xf32>
    %453 = vector.extract_strided_slice %445 {offsets = [1, 0, 0, 0], sizes = [1, 1, 16, 16], strides = [1, 1, 1, 1]} : vector<2x1x16x16xf32> to vector<1x1x16x16xf32>
    %454 = vector.shape_cast %453 : vector<1x1x16x16xf32> to vector<1x16x16xf32>
    %455 = vector.broadcast %447 : f32 to vector<1x16x16xf32>
    %456 = arith.mulf %455, %454 : vector<1x16x16xf32>
    %457 = arith.addf %452, %456 : vector<1x16x16xf32>
    %c0_168 = arith.constant 0 : index
    %c0_169 = arith.constant 0 : index
    %c4_170 = arith.constant 4 : index
    %c6_171 = arith.constant 6 : index
    %458 = vector.load %arg4[%c0_168, %c0_169, %c4_170, %c6_171] : memref<2x1x22x22xf32, #tpu.memory_space<vmem>>, vector<2x1x16x16xf32>
    %c34 = arith.constant 34 : index
    %459 = memref.load %arg1[%c34] : memref<98xf32, #tpu.memory_space<smem>>
    %c83 = arith.constant 83 : index
    %460 = memref.load %arg1[%c83] : memref<98xf32, #tpu.memory_space<smem>>
    %461 = vector.extract_strided_slice %458 {offsets = [0, 0, 0, 0], sizes = [1, 1, 16, 16], strides = [1, 1, 1, 1]} : vector<2x1x16x16xf32> to vector<1x1x16x16xf32>
    %462 = vector.shape_cast %461 : vector<1x1x16x16xf32> to vector<1x16x16xf32>
    %463 = vector.broadcast %459 : f32 to vector<1x16x16xf32>
    %464 = arith.mulf %463, %462 : vector<1x16x16xf32>
    %465 = arith.addf %457, %464 : vector<1x16x16xf32>
    %466 = vector.extract_strided_slice %458 {offsets = [1, 0, 0, 0], sizes = [1, 1, 16, 16], strides = [1, 1, 1, 1]} : vector<2x1x16x16xf32> to vector<1x1x16x16xf32>
    %467 = vector.shape_cast %466 : vector<1x1x16x16xf32> to vector<1x16x16xf32>
    %468 = vector.broadcast %460 : f32 to vector<1x16x16xf32>
    %469 = arith.mulf %468, %467 : vector<1x16x16xf32>
    %470 = arith.addf %465, %469 : vector<1x16x16xf32>
    %c0_172 = arith.constant 0 : index
    %c0_173 = arith.constant 0 : index
    %c5_174 = arith.constant 5 : index
    %c0_175 = arith.constant 0 : index
    %471 = vector.load %arg4[%c0_172, %c0_173, %c5_174, %c0_175] : memref<2x1x22x22xf32, #tpu.memory_space<vmem>>, vector<2x1x16x16xf32>
    %c35 = arith.constant 35 : index
    %472 = memref.load %arg1[%c35] : memref<98xf32, #tpu.memory_space<smem>>
    %c84 = arith.constant 84 : index
    %473 = memref.load %arg1[%c84] : memref<98xf32, #tpu.memory_space<smem>>
    %474 = vector.extract_strided_slice %471 {offsets = [0, 0, 0, 0], sizes = [1, 1, 16, 16], strides = [1, 1, 1, 1]} : vector<2x1x16x16xf32> to vector<1x1x16x16xf32>
    %475 = vector.shape_cast %474 : vector<1x1x16x16xf32> to vector<1x16x16xf32>
    %476 = vector.broadcast %472 : f32 to vector<1x16x16xf32>
    %477 = arith.mulf %476, %475 : vector<1x16x16xf32>
    %478 = arith.addf %470, %477 : vector<1x16x16xf32>
    %479 = vector.extract_strided_slice %471 {offsets = [1, 0, 0, 0], sizes = [1, 1, 16, 16], strides = [1, 1, 1, 1]} : vector<2x1x16x16xf32> to vector<1x1x16x16xf32>
    %480 = vector.shape_cast %479 : vector<1x1x16x16xf32> to vector<1x16x16xf32>
    %481 = vector.broadcast %473 : f32 to vector<1x16x16xf32>
    %482 = arith.mulf %481, %480 : vector<1x16x16xf32>
    %483 = arith.addf %478, %482 : vector<1x16x16xf32>
    %c0_176 = arith.constant 0 : index
    %c0_177 = arith.constant 0 : index
    %c5_178 = arith.constant 5 : index
    %c1_179 = arith.constant 1 : index
    %484 = vector.load %arg4[%c0_176, %c0_177, %c5_178, %c1_179] : memref<2x1x22x22xf32, #tpu.memory_space<vmem>>, vector<2x1x16x16xf32>
    %c36 = arith.constant 36 : index
    %485 = memref.load %arg1[%c36] : memref<98xf32, #tpu.memory_space<smem>>
    %c85 = arith.constant 85 : index
    %486 = memref.load %arg1[%c85] : memref<98xf32, #tpu.memory_space<smem>>
    %487 = vector.extract_strided_slice %484 {offsets = [0, 0, 0, 0], sizes = [1, 1, 16, 16], strides = [1, 1, 1, 1]} : vector<2x1x16x16xf32> to vector<1x1x16x16xf32>
    %488 = vector.shape_cast %487 : vector<1x1x16x16xf32> to vector<1x16x16xf32>
    %489 = vector.broadcast %485 : f32 to vector<1x16x16xf32>
    %490 = arith.mulf %489, %488 : vector<1x16x16xf32>
    %491 = arith.addf %483, %490 : vector<1x16x16xf32>
    %492 = vector.extract_strided_slice %484 {offsets = [1, 0, 0, 0], sizes = [1, 1, 16, 16], strides = [1, 1, 1, 1]} : vector<2x1x16x16xf32> to vector<1x1x16x16xf32>
    %493 = vector.shape_cast %492 : vector<1x1x16x16xf32> to vector<1x16x16xf32>
    %494 = vector.broadcast %486 : f32 to vector<1x16x16xf32>
    %495 = arith.mulf %494, %493 : vector<1x16x16xf32>
    %496 = arith.addf %491, %495 : vector<1x16x16xf32>
    %c0_180 = arith.constant 0 : index
    %c0_181 = arith.constant 0 : index
    %c5_182 = arith.constant 5 : index
    %c2_183 = arith.constant 2 : index
    %497 = vector.load %arg4[%c0_180, %c0_181, %c5_182, %c2_183] : memref<2x1x22x22xf32, #tpu.memory_space<vmem>>, vector<2x1x16x16xf32>
    %c37 = arith.constant 37 : index
    %498 = memref.load %arg1[%c37] : memref<98xf32, #tpu.memory_space<smem>>
    %c86 = arith.constant 86 : index
    %499 = memref.load %arg1[%c86] : memref<98xf32, #tpu.memory_space<smem>>
    %500 = vector.extract_strided_slice %497 {offsets = [0, 0, 0, 0], sizes = [1, 1, 16, 16], strides = [1, 1, 1, 1]} : vector<2x1x16x16xf32> to vector<1x1x16x16xf32>
    %501 = vector.shape_cast %500 : vector<1x1x16x16xf32> to vector<1x16x16xf32>
    %502 = vector.broadcast %498 : f32 to vector<1x16x16xf32>
    %503 = arith.mulf %502, %501 : vector<1x16x16xf32>
    %504 = arith.addf %496, %503 : vector<1x16x16xf32>
    %505 = vector.extract_strided_slice %497 {offsets = [1, 0, 0, 0], sizes = [1, 1, 16, 16], strides = [1, 1, 1, 1]} : vector<2x1x16x16xf32> to vector<1x1x16x16xf32>
    %506 = vector.shape_cast %505 : vector<1x1x16x16xf32> to vector<1x16x16xf32>
    %507 = vector.broadcast %499 : f32 to vector<1x16x16xf32>
    %508 = arith.mulf %507, %506 : vector<1x16x16xf32>
    %509 = arith.addf %504, %508 : vector<1x16x16xf32>
    %c0_184 = arith.constant 0 : index
    %c0_185 = arith.constant 0 : index
    %c5_186 = arith.constant 5 : index
    %c3_187 = arith.constant 3 : index
    %510 = vector.load %arg4[%c0_184, %c0_185, %c5_186, %c3_187] : memref<2x1x22x22xf32, #tpu.memory_space<vmem>>, vector<2x1x16x16xf32>
    %c38 = arith.constant 38 : index
    %511 = memref.load %arg1[%c38] : memref<98xf32, #tpu.memory_space<smem>>
    %c87 = arith.constant 87 : index
    %512 = memref.load %arg1[%c87] : memref<98xf32, #tpu.memory_space<smem>>
    %513 = vector.extract_strided_slice %510 {offsets = [0, 0, 0, 0], sizes = [1, 1, 16, 16], strides = [1, 1, 1, 1]} : vector<2x1x16x16xf32> to vector<1x1x16x16xf32>
    %514 = vector.shape_cast %513 : vector<1x1x16x16xf32> to vector<1x16x16xf32>
    %515 = vector.broadcast %511 : f32 to vector<1x16x16xf32>
    %516 = arith.mulf %515, %514 : vector<1x16x16xf32>
    %517 = arith.addf %509, %516 : vector<1x16x16xf32>
    %518 = vector.extract_strided_slice %510 {offsets = [1, 0, 0, 0], sizes = [1, 1, 16, 16], strides = [1, 1, 1, 1]} : vector<2x1x16x16xf32> to vector<1x1x16x16xf32>
    %519 = vector.shape_cast %518 : vector<1x1x16x16xf32> to vector<1x16x16xf32>
    %520 = vector.broadcast %512 : f32 to vector<1x16x16xf32>
    %521 = arith.mulf %520, %519 : vector<1x16x16xf32>
    %522 = arith.addf %517, %521 : vector<1x16x16xf32>
    %c0_188 = arith.constant 0 : index
    %c0_189 = arith.constant 0 : index
    %c5_190 = arith.constant 5 : index
    %c4_191 = arith.constant 4 : index
    %523 = vector.load %arg4[%c0_188, %c0_189, %c5_190, %c4_191] : memref<2x1x22x22xf32, #tpu.memory_space<vmem>>, vector<2x1x16x16xf32>
    %c39 = arith.constant 39 : index
    %524 = memref.load %arg1[%c39] : memref<98xf32, #tpu.memory_space<smem>>
    %c88 = arith.constant 88 : index
    %525 = memref.load %arg1[%c88] : memref<98xf32, #tpu.memory_space<smem>>
    %526 = vector.extract_strided_slice %523 {offsets = [0, 0, 0, 0], sizes = [1, 1, 16, 16], strides = [1, 1, 1, 1]} : vector<2x1x16x16xf32> to vector<1x1x16x16xf32>
    %527 = vector.shape_cast %526 : vector<1x1x16x16xf32> to vector<1x16x16xf32>
    %528 = vector.broadcast %524 : f32 to vector<1x16x16xf32>
    %529 = arith.mulf %528, %527 : vector<1x16x16xf32>
    %530 = arith.addf %522, %529 : vector<1x16x16xf32>
    %531 = vector.extract_strided_slice %523 {offsets = [1, 0, 0, 0], sizes = [1, 1, 16, 16], strides = [1, 1, 1, 1]} : vector<2x1x16x16xf32> to vector<1x1x16x16xf32>
    %532 = vector.shape_cast %531 : vector<1x1x16x16xf32> to vector<1x16x16xf32>
    %533 = vector.broadcast %525 : f32 to vector<1x16x16xf32>
    %534 = arith.mulf %533, %532 : vector<1x16x16xf32>
    %535 = arith.addf %530, %534 : vector<1x16x16xf32>
    %c0_192 = arith.constant 0 : index
    %c0_193 = arith.constant 0 : index
    %c5_194 = arith.constant 5 : index
    %c5_195 = arith.constant 5 : index
    %536 = vector.load %arg4[%c0_192, %c0_193, %c5_194, %c5_195] : memref<2x1x22x22xf32, #tpu.memory_space<vmem>>, vector<2x1x16x16xf32>
    %c40 = arith.constant 40 : index
    %537 = memref.load %arg1[%c40] : memref<98xf32, #tpu.memory_space<smem>>
    %c89 = arith.constant 89 : index
    %538 = memref.load %arg1[%c89] : memref<98xf32, #tpu.memory_space<smem>>
    %539 = vector.extract_strided_slice %536 {offsets = [0, 0, 0, 0], sizes = [1, 1, 16, 16], strides = [1, 1, 1, 1]} : vector<2x1x16x16xf32> to vector<1x1x16x16xf32>
    %540 = vector.shape_cast %539 : vector<1x1x16x16xf32> to vector<1x16x16xf32>
    %541 = vector.broadcast %537 : f32 to vector<1x16x16xf32>
    %542 = arith.mulf %541, %540 : vector<1x16x16xf32>
    %543 = arith.addf %535, %542 : vector<1x16x16xf32>
    %544 = vector.extract_strided_slice %536 {offsets = [1, 0, 0, 0], sizes = [1, 1, 16, 16], strides = [1, 1, 1, 1]} : vector<2x1x16x16xf32> to vector<1x1x16x16xf32>
    %545 = vector.shape_cast %544 : vector<1x1x16x16xf32> to vector<1x16x16xf32>
    %546 = vector.broadcast %538 : f32 to vector<1x16x16xf32>
    %547 = arith.mulf %546, %545 : vector<1x16x16xf32>
    %548 = arith.addf %543, %547 : vector<1x16x16xf32>
    %c0_196 = arith.constant 0 : index
    %c0_197 = arith.constant 0 : index
    %c5_198 = arith.constant 5 : index
    %c6_199 = arith.constant 6 : index
    %549 = vector.load %arg4[%c0_196, %c0_197, %c5_198, %c6_199] : memref<2x1x22x22xf32, #tpu.memory_space<vmem>>, vector<2x1x16x16xf32>
    %c41 = arith.constant 41 : index
    %550 = memref.load %arg1[%c41] : memref<98xf32, #tpu.memory_space<smem>>
    %c90 = arith.constant 90 : index
    %551 = memref.load %arg1[%c90] : memref<98xf32, #tpu.memory_space<smem>>
    %552 = vector.extract_strided_slice %549 {offsets = [0, 0, 0, 0], sizes = [1, 1, 16, 16], strides = [1, 1, 1, 1]} : vector<2x1x16x16xf32> to vector<1x1x16x16xf32>
    %553 = vector.shape_cast %552 : vector<1x1x16x16xf32> to vector<1x16x16xf32>
    %554 = vector.broadcast %550 : f32 to vector<1x16x16xf32>
    %555 = arith.mulf %554, %553 : vector<1x16x16xf32>
    %556 = arith.addf %548, %555 : vector<1x16x16xf32>
    %557 = vector.extract_strided_slice %549 {offsets = [1, 0, 0, 0], sizes = [1, 1, 16, 16], strides = [1, 1, 1, 1]} : vector<2x1x16x16xf32> to vector<1x1x16x16xf32>
    %558 = vector.shape_cast %557 : vector<1x1x16x16xf32> to vector<1x16x16xf32>
    %559 = vector.broadcast %551 : f32 to vector<1x16x16xf32>
    %560 = arith.mulf %559, %558 : vector<1x16x16xf32>
    %561 = arith.addf %556, %560 : vector<1x16x16xf32>
    %c0_200 = arith.constant 0 : index
    %c0_201 = arith.constant 0 : index
    %c6_202 = arith.constant 6 : index
    %c0_203 = arith.constant 0 : index
    %562 = vector.load %arg4[%c0_200, %c0_201, %c6_202, %c0_203] : memref<2x1x22x22xf32, #tpu.memory_space<vmem>>, vector<2x1x16x16xf32>
    %c42 = arith.constant 42 : index
    %563 = memref.load %arg1[%c42] : memref<98xf32, #tpu.memory_space<smem>>
    %c91 = arith.constant 91 : index
    %564 = memref.load %arg1[%c91] : memref<98xf32, #tpu.memory_space<smem>>
    %565 = vector.extract_strided_slice %562 {offsets = [0, 0, 0, 0], sizes = [1, 1, 16, 16], strides = [1, 1, 1, 1]} : vector<2x1x16x16xf32> to vector<1x1x16x16xf32>
    %566 = vector.shape_cast %565 : vector<1x1x16x16xf32> to vector<1x16x16xf32>
    %567 = vector.broadcast %563 : f32 to vector<1x16x16xf32>
    %568 = arith.mulf %567, %566 : vector<1x16x16xf32>
    %569 = arith.addf %561, %568 : vector<1x16x16xf32>
    %570 = vector.extract_strided_slice %562 {offsets = [1, 0, 0, 0], sizes = [1, 1, 16, 16], strides = [1, 1, 1, 1]} : vector<2x1x16x16xf32> to vector<1x1x16x16xf32>
    %571 = vector.shape_cast %570 : vector<1x1x16x16xf32> to vector<1x16x16xf32>
    %572 = vector.broadcast %564 : f32 to vector<1x16x16xf32>
    %573 = arith.mulf %572, %571 : vector<1x16x16xf32>
    %574 = arith.addf %569, %573 : vector<1x16x16xf32>
    %c0_204 = arith.constant 0 : index
    %c0_205 = arith.constant 0 : index
    %c6_206 = arith.constant 6 : index
    %c1_207 = arith.constant 1 : index
    %575 = vector.load %arg4[%c0_204, %c0_205, %c6_206, %c1_207] : memref<2x1x22x22xf32, #tpu.memory_space<vmem>>, vector<2x1x16x16xf32>
    %c43 = arith.constant 43 : index
    %576 = memref.load %arg1[%c43] : memref<98xf32, #tpu.memory_space<smem>>
    %c92 = arith.constant 92 : index
    %577 = memref.load %arg1[%c92] : memref<98xf32, #tpu.memory_space<smem>>
    %578 = vector.extract_strided_slice %575 {offsets = [0, 0, 0, 0], sizes = [1, 1, 16, 16], strides = [1, 1, 1, 1]} : vector<2x1x16x16xf32> to vector<1x1x16x16xf32>
    %579 = vector.shape_cast %578 : vector<1x1x16x16xf32> to vector<1x16x16xf32>
    %580 = vector.broadcast %576 : f32 to vector<1x16x16xf32>
    %581 = arith.mulf %580, %579 : vector<1x16x16xf32>
    %582 = arith.addf %574, %581 : vector<1x16x16xf32>
    %583 = vector.extract_strided_slice %575 {offsets = [1, 0, 0, 0], sizes = [1, 1, 16, 16], strides = [1, 1, 1, 1]} : vector<2x1x16x16xf32> to vector<1x1x16x16xf32>
    %584 = vector.shape_cast %583 : vector<1x1x16x16xf32> to vector<1x16x16xf32>
    %585 = vector.broadcast %577 : f32 to vector<1x16x16xf32>
    %586 = arith.mulf %585, %584 : vector<1x16x16xf32>
    %587 = arith.addf %582, %586 : vector<1x16x16xf32>
    %c0_208 = arith.constant 0 : index
    %c0_209 = arith.constant 0 : index
    %c6_210 = arith.constant 6 : index
    %c2_211 = arith.constant 2 : index
    %588 = vector.load %arg4[%c0_208, %c0_209, %c6_210, %c2_211] : memref<2x1x22x22xf32, #tpu.memory_space<vmem>>, vector<2x1x16x16xf32>
    %c44 = arith.constant 44 : index
    %589 = memref.load %arg1[%c44] : memref<98xf32, #tpu.memory_space<smem>>
    %c93 = arith.constant 93 : index
    %590 = memref.load %arg1[%c93] : memref<98xf32, #tpu.memory_space<smem>>
    %591 = vector.extract_strided_slice %588 {offsets = [0, 0, 0, 0], sizes = [1, 1, 16, 16], strides = [1, 1, 1, 1]} : vector<2x1x16x16xf32> to vector<1x1x16x16xf32>
    %592 = vector.shape_cast %591 : vector<1x1x16x16xf32> to vector<1x16x16xf32>
    %593 = vector.broadcast %589 : f32 to vector<1x16x16xf32>
    %594 = arith.mulf %593, %592 : vector<1x16x16xf32>
    %595 = arith.addf %587, %594 : vector<1x16x16xf32>
    %596 = vector.extract_strided_slice %588 {offsets = [1, 0, 0, 0], sizes = [1, 1, 16, 16], strides = [1, 1, 1, 1]} : vector<2x1x16x16xf32> to vector<1x1x16x16xf32>
    %597 = vector.shape_cast %596 : vector<1x1x16x16xf32> to vector<1x16x16xf32>
    %598 = vector.broadcast %590 : f32 to vector<1x16x16xf32>
    %599 = arith.mulf %598, %597 : vector<1x16x16xf32>
    %600 = arith.addf %595, %599 : vector<1x16x16xf32>
    %c0_212 = arith.constant 0 : index
    %c0_213 = arith.constant 0 : index
    %c6_214 = arith.constant 6 : index
    %c3_215 = arith.constant 3 : index
    %601 = vector.load %arg4[%c0_212, %c0_213, %c6_214, %c3_215] : memref<2x1x22x22xf32, #tpu.memory_space<vmem>>, vector<2x1x16x16xf32>
    %c45 = arith.constant 45 : index
    %602 = memref.load %arg1[%c45] : memref<98xf32, #tpu.memory_space<smem>>
    %c94 = arith.constant 94 : index
    %603 = memref.load %arg1[%c94] : memref<98xf32, #tpu.memory_space<smem>>
    %604 = vector.extract_strided_slice %601 {offsets = [0, 0, 0, 0], sizes = [1, 1, 16, 16], strides = [1, 1, 1, 1]} : vector<2x1x16x16xf32> to vector<1x1x16x16xf32>
    %605 = vector.shape_cast %604 : vector<1x1x16x16xf32> to vector<1x16x16xf32>
    %606 = vector.broadcast %602 : f32 to vector<1x16x16xf32>
    %607 = arith.mulf %606, %605 : vector<1x16x16xf32>
    %608 = arith.addf %600, %607 : vector<1x16x16xf32>
    %609 = vector.extract_strided_slice %601 {offsets = [1, 0, 0, 0], sizes = [1, 1, 16, 16], strides = [1, 1, 1, 1]} : vector<2x1x16x16xf32> to vector<1x1x16x16xf32>
    %610 = vector.shape_cast %609 : vector<1x1x16x16xf32> to vector<1x16x16xf32>
    %611 = vector.broadcast %603 : f32 to vector<1x16x16xf32>
    %612 = arith.mulf %611, %610 : vector<1x16x16xf32>
    %613 = arith.addf %608, %612 : vector<1x16x16xf32>
    %c0_216 = arith.constant 0 : index
    %c0_217 = arith.constant 0 : index
    %c6_218 = arith.constant 6 : index
    %c4_219 = arith.constant 4 : index
    %614 = vector.load %arg4[%c0_216, %c0_217, %c6_218, %c4_219] : memref<2x1x22x22xf32, #tpu.memory_space<vmem>>, vector<2x1x16x16xf32>
    %c46 = arith.constant 46 : index
    %615 = memref.load %arg1[%c46] : memref<98xf32, #tpu.memory_space<smem>>
    %c95 = arith.constant 95 : index
    %616 = memref.load %arg1[%c95] : memref<98xf32, #tpu.memory_space<smem>>
    %617 = vector.extract_strided_slice %614 {offsets = [0, 0, 0, 0], sizes = [1, 1, 16, 16], strides = [1, 1, 1, 1]} : vector<2x1x16x16xf32> to vector<1x1x16x16xf32>
    %618 = vector.shape_cast %617 : vector<1x1x16x16xf32> to vector<1x16x16xf32>
    %619 = vector.broadcast %615 : f32 to vector<1x16x16xf32>
    %620 = arith.mulf %619, %618 : vector<1x16x16xf32>
    %621 = arith.addf %613, %620 : vector<1x16x16xf32>
    %622 = vector.extract_strided_slice %614 {offsets = [1, 0, 0, 0], sizes = [1, 1, 16, 16], strides = [1, 1, 1, 1]} : vector<2x1x16x16xf32> to vector<1x1x16x16xf32>
    %623 = vector.shape_cast %622 : vector<1x1x16x16xf32> to vector<1x16x16xf32>
    %624 = vector.broadcast %616 : f32 to vector<1x16x16xf32>
    %625 = arith.mulf %624, %623 : vector<1x16x16xf32>
    %626 = arith.addf %621, %625 : vector<1x16x16xf32>
    %c0_220 = arith.constant 0 : index
    %c0_221 = arith.constant 0 : index
    %c6_222 = arith.constant 6 : index
    %c5_223 = arith.constant 5 : index
    %627 = vector.load %arg4[%c0_220, %c0_221, %c6_222, %c5_223] : memref<2x1x22x22xf32, #tpu.memory_space<vmem>>, vector<2x1x16x16xf32>
    %c47 = arith.constant 47 : index
    %628 = memref.load %arg1[%c47] : memref<98xf32, #tpu.memory_space<smem>>
    %c96 = arith.constant 96 : index
    %629 = memref.load %arg1[%c96] : memref<98xf32, #tpu.memory_space<smem>>
    %630 = vector.extract_strided_slice %627 {offsets = [0, 0, 0, 0], sizes = [1, 1, 16, 16], strides = [1, 1, 1, 1]} : vector<2x1x16x16xf32> to vector<1x1x16x16xf32>
    %631 = vector.shape_cast %630 : vector<1x1x16x16xf32> to vector<1x16x16xf32>
    %632 = vector.broadcast %628 : f32 to vector<1x16x16xf32>
    %633 = arith.mulf %632, %631 : vector<1x16x16xf32>
    %634 = arith.addf %626, %633 : vector<1x16x16xf32>
    %635 = vector.extract_strided_slice %627 {offsets = [1, 0, 0, 0], sizes = [1, 1, 16, 16], strides = [1, 1, 1, 1]} : vector<2x1x16x16xf32> to vector<1x1x16x16xf32>
    %636 = vector.shape_cast %635 : vector<1x1x16x16xf32> to vector<1x16x16xf32>
    %637 = vector.broadcast %629 : f32 to vector<1x16x16xf32>
    %638 = arith.mulf %637, %636 : vector<1x16x16xf32>
    %639 = arith.addf %634, %638 : vector<1x16x16xf32>
    %c0_224 = arith.constant 0 : index
    %c0_225 = arith.constant 0 : index
    %c6_226 = arith.constant 6 : index
    %c6_227 = arith.constant 6 : index
    %640 = vector.load %arg4[%c0_224, %c0_225, %c6_226, %c6_227] : memref<2x1x22x22xf32, #tpu.memory_space<vmem>>, vector<2x1x16x16xf32>
    %c48 = arith.constant 48 : index
    %641 = memref.load %arg1[%c48] : memref<98xf32, #tpu.memory_space<smem>>
    %c97 = arith.constant 97 : index
    %642 = memref.load %arg1[%c97] : memref<98xf32, #tpu.memory_space<smem>>
    %643 = vector.extract_strided_slice %640 {offsets = [0, 0, 0, 0], sizes = [1, 1, 16, 16], strides = [1, 1, 1, 1]} : vector<2x1x16x16xf32> to vector<1x1x16x16xf32>
    %644 = vector.shape_cast %643 : vector<1x1x16x16xf32> to vector<1x16x16xf32>
    %645 = vector.broadcast %641 : f32 to vector<1x16x16xf32>
    %646 = arith.mulf %645, %644 : vector<1x16x16xf32>
    %647 = arith.addf %639, %646 : vector<1x16x16xf32>
    %648 = vector.extract_strided_slice %640 {offsets = [1, 0, 0, 0], sizes = [1, 1, 16, 16], strides = [1, 1, 1, 1]} : vector<2x1x16x16xf32> to vector<1x1x16x16xf32>
    %649 = vector.shape_cast %648 : vector<1x1x16x16xf32> to vector<1x16x16xf32>
    %650 = vector.broadcast %642 : f32 to vector<1x16x16xf32>
    %651 = arith.mulf %650, %649 : vector<1x16x16xf32>
    %652 = arith.addf %647, %651 : vector<1x16x16xf32>
    %653 = arith.negf %652 : vector<1x16x16xf32>
    %654 = math.exp %653 : vector<1x16x16xf32>
    %cst_228 = arith.constant 1.000000e+00 : f32
    %655 = vector.broadcast %cst_228 : f32 to vector<1x16x16xf32>
    %656 = arith.addf %655, %654 : vector<1x16x16xf32>
    %657 = arith.divf %655, %656 : vector<1x16x16xf32>
    %c0_229 = arith.constant 0 : index
    %c0_230 = arith.constant 0 : index
    %c0_231 = arith.constant 0 : index
    %658 = vector.load %arg3[%c0_229, %c0_230, %c0_231] : memref<1x16x16xf32, #tpu.memory_space<vmem>>, vector<1x16x16xf32>
    tpu.vector_store %arg3[%c0_229, %c0_230, %c0_231], %657 {strides = array<i32>} : memref<1x16x16xf32, #tpu.memory_space<vmem>>, vector<1x16x16xf32>,
    return
  }
  func.func @transform_0(%arg0: i32) -> i32 {
    %c0_i32 = arith.constant 0 : i32
    %c0_i32_0 = arith.constant 0 : i32
    return %c0_i32 : i32
  }
  func.func @transform_1(%arg0: i32) -> (i32, i32, i32, i32) {
    %c0_i32 = arith.constant 0 : i32
    %c0_i32_0 = arith.constant 0 : i32
    %c0_i32_1 = arith.constant 0 : i32
    %c0_i32_2 = arith.constant 0 : i32
    return %arg0, %c0_i32, %c0_i32_0, %c0_i32_1 : i32, i32, i32, i32
  }
  func.func @transform_2(%arg0: i32) -> (i32, i32, i32) {
    %c0_i32 = arith.constant 0 : i32
    %c0_i32_0 = arith.constant 0 : i32
    %c0_i32_1 = arith.constant 0 : i32
    return %arg0, %c0_i32, %c0_i32_0 : i32, i32, i32
  }
}

</mosaic_0001>

<bundles_post_ra>
// kernel: tpu_custom_call.1
= control target key start
LH: loop header
LB: loop body
LE: loop exit
PB: predicated region body
PF: predicated region fallthrough
CT: control target
= control target key end

     0   :  { %7 = vsyncpa [#allocation6], 0  ;;  %s2853_s0 = inlined_call_operand.hbm [shape: f32[98], index: 0, kind: input, shape index: {}]   ;;  %s2854_s1 = inlined_call_operand.hbm [shape: f32[2,4,16,16], index: 1, kind: input, shape index: {}]   ;;  %s2855_s2 = inlined_call_operand.hbm [shape: f32[2,16,16], index: 2, kind: output, shape index: {}]  }
   0x1   :  { %8 = vsyncpa [#allocation4], 0 }
   0x2   :  { %10 = vsyncpa [#allocation4 + $0x1], 0 }
   0x3   :  { %11 = vsyncpa [#allocation5], 0 }
   0x4   :  { %13 = vsyncpa [#allocation5 + $0x1], 0  ;;  %s1982_s9 = smov 0   ;;  %s1984_s10 = smov 0  }
   0x5   :  { %s1986_s11 = smov 0   ;;  %s1988_s12 = smov 0  }
   0x6 LB: > { %s2003_s13 = sadd.s32 4294967295, %s1950_s12   ;;  %s1649_s14 = sadd.s32 4294967294, %s1950_s12   ;;  %s1950_s12 = sphi %s1988_s12, %s2877_s12   ;;  %s1946_s11 = sphi %s1986_s11, %s2876_s11   ;;  %s1942_s10 = sphi %s1984_s10, %s2875_s10   ;;  %s1938_s9 = sphi %s1982_s9, %s2874_s9  }
   0x7   : > { %s2007_s15 = sadd.s32 1, %s1950_s12   ;;  %s47_s16 = sadd.s32 1, %s1946_s11 }
   0x8   : > { %s44_s17 = ssub.s32 %s1950_s12, %s2007_s15  ;;  %p54_p0 = scmp.ne.s32.totalorder %s1946_s11, %s1942_s10 }
   0x9   : > { %p45_p1 = scmp.eq.s32.totalorder %s44_s17, 0  ;;  %p55_p2 = scmp.eq.s32.totalorder %s1950_s12, 0 }
   0xa   : > { %p60_p3 = scmp.ne.s32.totalorder %s1942_s10, %s1938_s9  ;;  %p2856_p4 = scmp.eq.s32.totalorder %s2003_s13, 0 }
   0xb   : > { %s2019_s18 = scalar_select %p45_p1, %s1946_s11, %s47_s16  }
   0xc   : > { %p2021_p5 = por %p55_p2, %p54_p0  ;;  %p2027_p6 = por %p2856_p4, %p60_p3 }
   0xd   : > { %p84_p7 = scmp.eq.s32.totalorder %s2003_s13, 1  ;;  %p90_p8 = scmp.eq.s32.totalorder %s1649_s14, 1 }
   0xe   : > { %s2861_s20 = scalar_select %p2027_p6, 1, 0 }
   0xf   : > { %p1650_p9 = scmp.ge.s32.totalorder %s1950_s12, 1  ;;  %p97_p10 = scmp.lt.s32.totalorder %s1950_s12, 3 }
  0x10   : > { %p2034_p11 = por %p84_p7, %p54_p0  ;;  %p2038_p12 = por %p90_p8, %p60_p3 }
  0x11   : > { %p2042_p13 = pnand %p1650_p9, %p97_p10  ;;  %p1787_p4 = scmp.lt.s32.totalorder %s1950_s12, 2 }
  0x12   : > { %s2862_s21 = scalar_select %p2034_p11, 1, 0 }
  0x13   : > { %s2863_s22 = scalar_select %p2038_p12, 1, 0 }
  0x14   : > { %s2864_s23 = scalar_select %p2042_p13, 1, 0 }
  0x15   : > { %p1774_p2 = pneg %p2042_p13  ;;  %s119_s24 = sand.u32 1, %s1946_s11  }
  0x16   : > { %s1764_s25 = sshll.u32 %s1950_s12, 10  ;;  %p2865_p6 = scmp.eq.s32.totalorder %s2003_s13, 0 }
  0x17   : > { %p2056_p7 = pnand %p1787_p4, %p2021_p5  ;;  %s1653_s27 = sshll.u32 %s119_s24, 6 }
  0x18   : > { %p1775_p0 = pnand %p1774_p2, %p2865_p6  ;;  %s1952_s28 = smov [#allocation3]  }
  0x19   : > { %s2066_s5 = scalar_lea.hbm %s2854_s1, %s1764_s25  ;;  %s123_s6 = scalar_lea.vmem [#allocation7], %s1653_s27 }
  0x1a   : > { %1777 = dma.hbm_to_smem (!%p1775_p0), %s2853_s0, 16, %s1952_s28, [#allocation6]  }
  0x1b   : > { %s130_s7 = sshll.u32 %s123_s6, 4  ;;  %s2070_s8 = scalar_lea.sflag [#allocation4], %s119_s24  ;;  %s2068_s7 = int_to_ptr.vmem [resolvable:$true] %s130_s7 }
  0x1c   : > { %s1854_s14 = scalar_lea.hbm %s2066_s5, 1024  ;;  %p1856_p4 = pneg %p2056_p7 }
  0x1d   : > { %p1855_p3 = scmp.ne.s32.totalorder %s2066_s5, %s1854_s14  ;;  %s1859_s19 = scalar_lea.hbm %s2854_s1, 2048 }
  0x1e   : > { %p1860_p8 = scmp.lt.s32.totalorder %s2066_s5, %s2854_s1  ;;  %p1861_p9 = scmp.lt.s32.totalorder %s1859_s19, %s1854_s14 }
  0x1f   : > { %p1857_p5 = pnand %p1856_p4, %p1855_p3 }
  0x20   : > { %p1862_p10 = por %p1861_p9, %p1860_p8 }
  0x21   : > { %p1858_p6 = pneg %p1857_p5 }
  0x23   : > { %p1863_p2 = pnand %p1862_p10, %p1858_p6 }
  0x25   : > { %1866 = shalt.err (!%p1863_p2)
}
  0x26   : > { %s1867_s24 = scalar_lea.vmem %s2068_s7, 1024  ;;  %s1953_s27 = smov [#allocation7]  }
  0x27   : > { %p1868_p0 = scmp.ne.s32.totalorder %s2068_s7, %s1867_s24  ;;  %s1872_s29 = sshll.u32 %s1953_s27, 4  ;;  %s1873_s29 = int_to_ptr.vmem [resolvable:$false] %s1872_s29 }
  0x28   : > { %s1874_s30 = scalar_lea.vmem %s1873_s29, 2048  ;;  %p1875_p5 = scmp.lt.s32.totalorder %s2068_s7, %s1873_s29 }
  0x29   : > { %p1870_p1 = pnand %p1868_p0, %p1856_p4  ;;  %p1876_p12 = scmp.lt.s32.totalorder %s1874_s30, %s1867_s24 }
  0x2b   : > { %p1871_p3 = pneg %p1870_p1  ;;  %p1877_p11 = por %p1876_p12, %p1875_p5 }
  0x2d   : > { %p1878_p13 = pnand %p1877_p11, %p1871_p3 }
  0x2f   : > { %1881 = shalt.err (!%p1878_p13)
}
  0x30   : > { %s1954_s3 = smov 128   ;;  %s1955_s4 = smov 8  }
  0x31   : > { %1781 = dma.hbm_to_vmem [thread:$0]  (!%p2056_p7), %s2066_s5, 1024, %s2068_s7, %s2070_s8, %s1954_s3, %s1954_s3, %s1955_s4  }
  0x32   : > { %p2867_p4 = scmp.ne.s32.totalorder %s2864_s23, 0 }
  0x33   : > { %p2868_p1 = scmp.eq.s32.totalorder (!%p2867_p4), %s2003_s13, 0 }
  0x34   : > { %142 = sbr.rel (%p2867_p4) target bundleno = 695 (0x2b7), region = 28 }
  0x39   : > { %1925 = dma.done.wait (%p2868_p1), [#allocation6], 16   ;;  %p2869_p6 = pmov %p2868_p1 }
  0x3a   : > { %s2098_s6 = sand.u32 1, %s1942_s10   ;;  %p2870_p11 = scmp.ne.s32.totalorder %s2861_s20, 0 }
  0x3b   : > { %1927 = vsyncadd (%p2869_p6), [#allocation6], 4294967280  ;;  %s1658_s14 = sshll.u32 %s2098_s6, 6  ;;  %s149_s16 = scalar_lea.sflag [#allocation4], %s2098_s6 }
  0x3c   : > { %s152_s17 = scalar_lea.vmem [#allocation7], %s1658_s14 }
  0x3d   : > { %1929 = dma.done.wait (%p2870_p11), %s149_s16, 1024  }
  0x3e   : > { %1931 = vsyncadd (%p2870_p11), %s149_s16, 4294966272 }
  0x3f   : > { %157 = sfence }
  0x40   : > { %v174_v0 = vld [vmem:[%s152_s17] sm:$0xff]  ;;  %v176_v1 = vld [vmem:[%s152_s17 + $0x10] sm:$0xff]  ;;  %vm182_vm0 = vcmask 130048   ;;  %vm211_vm1 = vcmask 174080   ;;  %v175_v8 = vld [vmem:[%s152_s17 + $0x8] sm:$0xff]  ;;  %s1956_s20 = smov 3  }
  0x41   : > { %v178_v2 = vld [vmem:[%s152_s17 + $0x20] sm:$0xff]  ;;  %v180_v3 = vld [vmem:[%s152_s17 + $0x30] sm:$0xff]  ;;  %v197_v4 = vsel %vm182_vm0, %v174_v0, -inf  ;;  %v198_v5 = vsel %vm182_vm0, %v176_v1, -inf  ;;  %v183_v7 = vsel %vm182_vm0, %v174_v0, 0.0  ;;  %v184_v11 = vsel %vm182_vm0, %v176_v1, 0.0 }
  0x42   : > { %v199_v6 = vsel %vm182_vm0, %v178_v2, -inf  ;;  %v201_v10 = vsel %vm182_vm0, %v180_v3, -inf  ;;  %v186_v12 = vsel %vm182_vm0, %v178_v2, 0.0  ;;  %v177_v13 = vld [vmem:[%s152_s17 + $0x18] sm:$0xff]  ;;  %v179_v14 = vld [vmem:[%s152_s17 + $0x28] sm:$0xff]  ;;  %v185_v17 = vadd.f32 %v184_v11, %v183_v7  ;;  %s1662_s23 = sld [smem:[#allocation3 + $0x32]] }
  0x43   : > { %v200_v9 = vmax.f32 %v197_v4, %v199_v6  ;;  %v181_v15 = vld [vmem:[%s152_s17 + $0x38] sm:$0xff]  ;;  %v202_v16 = vmax.f32 %v198_v5, %v201_v10  ;;  %v188_v18 = vsel %vm182_vm0, %v180_v3, 0.0  ;;  %v204_v19 = vsel %vm182_vm0, %v175_v8, -inf  ;;  %s2126_s26 = sld [smem:[#allocation3 + $0x31]]  ;;  %s1958_s25 = smov 127  }
  0x44   : > { %v205_v20 = vsel %vm182_vm0, %v177_v13, -inf  ;;  %v206_v21 = vsel %vm182_vm0, %v179_v14, -inf  ;;  %v208_v22 = vsel %vm182_vm0, %v181_v15, -inf  ;;  %v190_v23 = vsel %vm182_vm0, %v175_v8, 0.0  ;;  %s252_s5 = sld [smem:[#allocation3]]  ;;  %s1959_s24 = smov 126  }
  0x45   : > { %v203_v24 = vmax.f32 %v200_v9, %v202_v16  ;;  %v187_v25 = vadd.f32 %v186_v12, %v185_v17  ;;  %v207_v26 = vmax.f32 %v204_v19, %v206_v21  ;;  %v209_v27 = vmax.f32 %v205_v20, %v208_v22  ;;  %s2128_s7 = sld [smem:[#allocation3 + $0x33]]  ;;  %s1960_s29 = smov 125  }
  0x46   : > { %v191_v28 = vsel %vm182_vm0, %v177_v13, 0.0  ;;  %v193_v29 = vsel %vm182_vm0, %v179_v14, 0.0  ;;  %v1957_v33 = vmov 0.0   ;;  %vm216_vm2 = vcmask 23552   ;;  %s2130_s8 = sld [smem:[#allocation3 + $0x34]]  ;;  %s1961_s3 = smov 124  }
  0x47   : > { %239 = vrot.lane.b32.xlu1 %v203_v24, %s1956_s20  ;;  %v189_v30 = vadd.f32 %v188_v18, %v187_v25  ;;  %v210_v31 = vmax.f32 %v207_v26, %v209_v27  ;;  %v192_v32 = vadd.f32 %v191_v28, %v190_v23  ;;  %213 = vst.msk [vmem:[#allocation2 + $0x18] sm:$0x7] %vm211_vm1, %v1957_v33  ;;  %212 = vst.msk [vmem:[#allocation2] sm:$0x7] %vm211_vm1, %v1957_v33  ;;  %vm221_vm3 = vcmask 179352   ;;  %s2136_s19 = sld [smem:[#allocation3 + $0x35]] }
  0x48   : > { %214 = vst.msk [vmem:[#allocation2 + $0x13] sm:$0x7] %vm211_vm1, %v1957_v33  ;;  %215 = vst.msk [vmem:[#allocation2 + $0x2b] sm:$0x7] %vm211_vm1, %v1957_v33  ;;  %v195_v34 = vsel %vm182_vm0, %v181_v15, 0.0  ;;  %vm234_vm4 = vcmask 154648   ;;  %v279_v41 = vstv %s1662_s23 }
  0x49   : > { %219 = vst.msk [vmem:[#allocation2 + $0x1b] sm:$0xff] %vm216_vm2, %v1957_v33  ;;  %217 = vst.msk [vmem:[#allocation2 + $0x3] sm:$0xff] %vm216_vm2, %v1957_v33  ;;  %228 = vrot.lane.b32.xlu0 %v189_v30, %s1956_s20  ;;  %v194_v35 = vadd.f32 %v193_v29, %v192_v32  ;;  %v259_v42 = vstv %s2126_s26  ;;  %s1670_s28 = sld [smem:[#allocation3 + $0x36]]  ;;  %s1962_s14 = smov 123  }
  0x4a   : > { %218 = vst.msk [vmem:[#allocation2 + $0xb] sm:$0xff] %vm216_vm2, %v1957_v33  ;;  %220 = vst.msk [vmem:[#allocation2 + $0x23] sm:$0xff] %vm216_vm2, %v1957_v33  ;;  %v254_v44 = vstv %s252_s5  ;;  %s1672_s27 = sld [smem:[#allocation3 + $0x37]]  ;;  %s1963_s17 = smov 122  }
  0x4b   : > { %224 = vst.msk [vmem:[#allocation2 + $0x1b] sm:$0xff] %vm221_vm3, %v1957_v33  ;;  %222 = vst.msk [vmem:[#allocation2 + $0x3] sm:$0xff] %vm221_vm3, %v1957_v33  ;;  %241 = vrot.lane.b32.xlu1 %v210_v31, %s1956_s20  ;;  %v196_v36 = vadd.f32 %v195_v34, %v194_v35  ;;  %v307_v47 = vstv %s2128_s7  ;;  %s1676_s30 = sld [smem:[#allocation3 + $0x39]]  ;;  %p2871_p13 = scmp.ne.s32.totalorder %s2862_s21, 0 }
  0x4c   : > { %223 = vst.msk [vmem:[#allocation2 + $0xb] sm:$0xff] %vm221_vm3, %v1957_v33  ;;  %225 = vst.msk [vmem:[#allocation2 + $0x23] sm:$0xff] %vm221_vm3, %v1957_v33  ;;  %v335_v55 = vstv %s2130_s8  ;;  %s1678_s4 = sld [smem:[#allocation3 + $0x3a]] }
  0x4d   : > { %230 = vrot.lane.b32.xlu0 %v196_v36, %s1956_s20  ;;  %v363_v61 = vstv %s2136_s19  ;;  %s1680_s16 = sld [smem:[#allocation3 + $0x3b]] }
  0x4e   : > { %s1682_s20 = sld [smem:[#allocation3 + $0x3c]] }
  0x4f   : > { %v391_v0 = vstv %s1670_s28  ;;  %s1684_s23 = sld [smem:[#allocation3 + $0x3d]] }
  0x50   : > { %v419_v3 = vstv %s1672_s27  ;;  %s1686_s26 = sld [smem:[#allocation3 + $0x3e]] }
  0x51   : > { %v463_v7 = vstv %s1676_s30  ;;  %s1690_s5 = sld [smem:[#allocation3 + $0x40]] }
  0x52   : > { %v491_v10 = vstv %s1678_s4  ;;  %s1692_s7 = sld [smem:[#allocation3 + $0x41]] }
  0x53   : > { %v519_v14 = vstv %s1680_s16  ;;  %s1694_s8 = sld [smem:[#allocation3 + $0x42]] }
  0x54   : > { %v547_v17 = vstv %s1682_s20  ;;  %s1696_s19 = sld [smem:[#allocation3 + $0x43]] }
  0x55   : > { %v575_v20 = vstv %s1684_s23  ;;  %s1661_s28 = sld [smem:[#allocation3 + $0x1]] }
  0x56   : > { %v603_v23 = vstv %s1686_s26  ;;  %s1663_s27 = sld [smem:[#allocation3 + $0x2]] }
  0x57   : > { %v647_v27 = vstv %s1690_s5  ;;  %s1665_s30 = sld [smem:[#allocation3 + $0x3]] }
  0x58   : > { %v675_v30 = vstv %s1692_s7  ;;  %s1667_s4 = sld [smem:[#allocation3 + $0x4]] }
  0x59   : > { %v703_v34 = vstv %s1694_s8  ;;  %s1669_s16 = sld [smem:[#allocation3 + $0x5]] }
  0x5a   : > { %s1671_s20 = sld [smem:[#allocation3 + $0x6]] }
  0x5b   : > { %s1675_s23 = sld [smem:[#allocation3 + $0x8]] }
  0x5c   : > { %s1677_s26 = sld [smem:[#allocation3 + $0x9]] }
  0x5d   : > { %s1679_s5 = sld [smem:[#allocation3 + $0xa]] }
  0x5e   : > { %s1681_s7 = sld [smem:[#allocation3 + $0xb]] }
  0x5f   : > { %s1683_s8 = sld [smem:[#allocation3 + $0xc]] }
  0xb9   : > { %v240_v37 = vpop.permute.xlu1 %239 }
  0xba   : > { %246 = vst.msk [vmem:[#allocation2 + $0x1b] sm:$0xff] %vm234_vm4, %v240_v37  ;;  %v731_v37 = vstv %s1696_s19  ;;  %s1685_s19 = sld [smem:[#allocation3 + $0xd]] }
  0xbb   : > { %v229_v38 = vpop.permute.xlu0 %228 }
  0xbc   : > { %235 = vst.msk [vmem:[#allocation2 + $0x3] sm:$0xff] %vm234_vm4, %v229_v38  ;;  %v266_v38 = vstv %s1661_s28  ;;  %s1689_s28 = sld [smem:[#allocation3 + $0xf]] }
  0xbd   : > { %v242_v39 = vpop.permute.xlu1 %241 }
  0xbe   : > { %247 = vst.msk [vmem:[#allocation2 + $0x23] sm:$0xff] %vm234_vm4, %v242_v39 }
  0xbf   : > { %v231_v40 = vpop.permute.xlu0 %230 }
  0xc0   : > { %236 = vst.msk [vmem:[#allocation2 + $0xb] sm:$0xff] %vm234_vm4, %v231_v40 }
  0xc1   : > { %v250_v43 = vld [vmem:[#allocation2 + $0x18] sm:$0xff] }
  0xc2   : > { %v280_v45 = vmul.f32 %v279_v41, %v250_v43  ;;  %v260_v48 = vmul.f32 %v259_v42, %v250_v43  ;;  %v308_v52 = vmul.f32 %v307_v47, %v250_v43  ;;  %v336_v59 = vmul.f32 %v335_v55, %v250_v43  ;;  %v2157_v5 = vld [vmem:[#allocation2 + $0x19] sm:$0xff] }
  0xc3   : > { %v2133_v46 = vld [vmem:[#allocation2] sm:$0xff]  ;;  %v364_v62 = vmul.f32 %v363_v61, %v250_v43  ;;  %v392_v1 = vmul.f32 %v391_v0, %v250_v43  ;;  %v420_v4 = vmul.f32 %v419_v3, %v250_v43  ;;  %v464_v8 = vmul.f32 %v463_v7, %v2157_v5 }
  0xc4   : > { %v255_v49 = vmul.f32 %v254_v44, %v2133_v46  ;;  %284 = vrot.lane.b32.xlu0 %v280_v45, %s1958_s25  ;;  %v492_v12 = vmul.f32 %v491_v10, %v2157_v5  ;;  %v520_v15 = vmul.f32 %v519_v14, %v2157_v5  ;;  %v548_v18 = vmul.f32 %v547_v17, %v2157_v5  ;;  %v2183_v25 = vld [vmem:[#allocation2 + $0x1a] sm:$0xff] }
  0xc5   : > { %v251_v50 = vld [vmem:[#allocation2 + $0x20] sm:$0xff]  ;;  %v576_v21 = vmul.f32 %v575_v20, %v2157_v5  ;;  %v604_v24 = vmul.f32 %v603_v23, %v2157_v5  ;;  %v648_v28 = vmul.f32 %v647_v27, %v2183_v25  ;;  %v676_v32 = vmul.f32 %v675_v30, %v2183_v25 }
  0xc6   : > { %v2140_v51 = vadd.f32 %v260_v48, %v255_v49  ;;  %v281_v54 = vmul.f32 %v279_v41, %v251_v50  ;;  %v261_v56 = vmul.f32 %v259_v42, %v251_v50  ;;  %v309_v60 = vmul.f32 %v307_v47, %v251_v50  ;;  %v2162_v11 = vld [vmem:[#allocation2 + $0x21] sm:$0xff] }
  0xc7   : > { %v2142_v53 = vld [vmem:[#allocation2 + $0x8] sm:$0xff]  ;;  %v337_v63 = vmul.f32 %v335_v55, %v251_v50  ;;  %v365_v2 = vmul.f32 %v363_v61, %v251_v50  ;;  %v393_v6 = vmul.f32 %v391_v0, %v251_v50  ;;  %v421_v9 = vmul.f32 %v419_v3, %v251_v50 }
  0xc8   : > { %v256_v57 = vmul.f32 %v254_v44, %v2142_v53  ;;  %312 = vrot.lane.b32.xlu0 %v308_v52, %s1959_s24  ;;  %286 = vrot.lane.b32.xlu1 %v281_v54, %s1958_s25  ;;  %v465_v13 = vmul.f32 %v463_v7, %v2162_v11  ;;  %v493_v16 = vmul.f32 %v491_v10, %v2162_v11  ;;  %v2190_v31 = vld [vmem:[#allocation2 + $0x22] sm:$0xff]  ;;  %v294_v43 = vstv %s1663_s27  ;;  %s1691_s27 = sld [smem:[#allocation3 + $0x10]] }
  0xc9   : > { %v521_v19 = vmul.f32 %v519_v14, %v2162_v11  ;;  %v549_v22 = vmul.f32 %v547_v17, %v2162_v11  ;;  %v577_v26 = vmul.f32 %v575_v20, %v2162_v11  ;;  %v605_v29 = vmul.f32 %v603_v23, %v2162_v11  ;;  %v2227_v61 = vld [vmem:[#allocation2 + $0x1] sm:$0xff]  ;;  %v2234_v3 = vld [vmem:[#allocation2 + $0x9] sm:$0xff] }
  0xca   : > { %v2148_v58 = vadd.f32 %v261_v56, %v256_v57  ;;  %v649_v33 = vmul.f32 %v647_v27, %v2190_v31  ;;  %v704_v35 = vmul.f32 %v703_v34, %v2183_v25  ;;  %v677_v36 = vmul.f32 %v675_v30, %v2190_v31  ;;  %v2255_v17 = vld [vmem:[#allocation2 + $0x2] sm:$0xff]  ;;  %v2262_v23 = vld [vmem:[#allocation2 + $0xa] sm:$0xff] }
  0xcb   : > { %v732_v39 = vmul.f32 %v731_v37, %v2183_v25  ;;  %v705_v40 = vmul.f32 %v703_v34, %v2190_v31  ;;  %v267_v41 = vmul.f32 %v266_v38, %v2133_v46  ;;  %v733_v42 = vmul.f32 %v731_v37, %v2190_v31 }
  0xcc   : > { %340 = vrot.lane.b32.xlu0 %v336_v59, %s1960_s29  ;;  %314 = vrot.lane.b32.xlu1 %v309_v60, %s1959_s24  ;;  %v295_v44 = vmul.f32 %v294_v43, %v2133_v46  ;;  %v268_v45 = vmul.f32 %v266_v38, %v2142_v53  ;;  %v322_v47 = vstv %s1665_s30  ;;  %v296_v49 = vmul.f32 %v294_v43, %v2142_v53  ;;  %s1693_s30 = sld [smem:[#allocation3 + $0x11]] }
  0xcd   : > { %v323_v48 = vmul.f32 %v322_v47, %v2133_v46  ;;  %v350_v50 = vstv %s1667_s4  ;;  %v324_v54 = vmul.f32 %v322_v47, %v2142_v53  ;;  %v378_v55 = vstv %s1669_s16  ;;  %s1695_s4 = sld [smem:[#allocation3 + $0x12]] }
  0xce   : > { %v351_v52 = vmul.f32 %v350_v50, %v2133_v46  ;;  %v379_v56 = vmul.f32 %v378_v55, %v2133_v46  ;;  %v352_v57 = vmul.f32 %v350_v50, %v2142_v53  ;;  %v406_v59 = vstv %s1671_s20  ;;  %s1697_s16 = sld [smem:[#allocation3 + $0x13]] }
  0xcf   : > { %v407_v60 = vmul.f32 %v406_v59, %v2133_v46  ;;  %s1698_s20 = sld [smem:[#allocation3 + $0x44]] }
  0xd0   : > { %368 = vrot.lane.b32.xlu0 %v364_v62, %s1961_s3  ;;  %342 = vrot.lane.b32.xlu1 %v337_v63, %s1960_s29  ;;  %v380_v62 = vmul.f32 %v378_v55, %v2142_v53  ;;  %v450_v63 = vstv %s1675_s23  ;;  %s2286_s23 = sld [smem:[#allocation3 + $0x14]] }
  0xd1   : > { %v451_v0 = vmul.f32 %v450_v63, %v2227_v61 }
  0xd3   : > { %v718_v34 = vstv %s1695_s4  ;;  %s1710_s4 = sld [smem:[#allocation3 + $0x4a]] }
  0xd4   : > { %396 = vrot.lane.b32.xlu0 %v392_v1, %s1962_s14  ;;  %370 = vrot.lane.b32.xlu1 %v365_v2, %s1961_s3  ;;  %v408_v1 = vmul.f32 %v406_v59, %v2142_v53  ;;  %v478_v2 = vstv %s1677_s26  ;;  %v720_v43 = vmul.f32 %v718_v34, %v2262_v23  ;;  %s2296_s26 = sld [smem:[#allocation3 + $0x45]] }
  0xd5   : > { %v479_v46 = vmul.f32 %v478_v2, %v2227_v61  ;;  %v480_v7 = vmul.f32 %v478_v2, %v2234_v3 }
  0xd6   : > { %v774_v50 = vstv %s2286_s23  ;;  %s2416_s23 = sld [smem:[#allocation3 + $0x1b]] }
  0xd8   : > { %424 = vrot.lane.b32.xlu0 %v420_v4, %s1963_s17  ;;  %398 = vrot.lane.b32.xlu1 %v393_v6, %s1962_s14  ;;  %v452_v4 = vmul.f32 %v450_v63, %v2234_v3  ;;  %v506_v6 = vstv %s1679_s5  ;;  %s2307_s5 = sld [smem:[#allocation3 + $0x16]] }
  0xd9   : > { %v507_v53 = vmul.f32 %v506_v6, %v2227_v61  ;;  %v508_v10 = vmul.f32 %v506_v6, %v2234_v3 }
  0xdc   : > { %468 = vrot.lane.b32.xlu0 %v464_v8, %s1958_s25  ;;  %426 = vrot.lane.b32.xlu1 %v421_v9, %s1963_s17  ;;  %v534_v8 = vstv %s1681_s7  ;;  %s2318_s7 = sld [smem:[#allocation3 + $0x47]] }
  0xdd   : > { %v535_v9 = vmul.f32 %v534_v8, %v2227_v61  ;;  %v536_v14 = vmul.f32 %v534_v8, %v2234_v3  ;;  %v2346_v8 = vld [vmem:[#allocation2 + $0xb] sm:$0xff] }
  0xe0   : > { %496 = vrot.lane.b32.xlu0 %v492_v12, %s1959_s24  ;;  %470 = vrot.lane.b32.xlu1 %v465_v13, %s1958_s25  ;;  %v562_v12 = vstv %s1683_s8  ;;  %s2331_s8 = sld [smem:[#allocation3 + $0x17]] }
  0xe1   : > { %v563_v13 = vmul.f32 %v562_v12, %v2227_v61 }
  0xe4   : > { %524 = vrot.lane.b32.xlu0 %v520_v15, %s1960_s29  ;;  %498 = vrot.lane.b32.xlu1 %v493_v16, %s1959_s24  ;;  %v590_v15 = vstv %s1685_s19  ;;  %s2344_s19 = sld [smem:[#allocation3 + $0x48]] }
  0xe5   : > { %v591_v16 = vmul.f32 %v590_v15, %v2227_v61 }
  0xe8   : > { %552 = vrot.lane.b32.xlu0 %v548_v18, %s1961_s3  ;;  %526 = vrot.lane.b32.xlu1 %v521_v19, %s1960_s29  ;;  %v564_v18 = vmul.f32 %v562_v12, %v2234_v3  ;;  %v634_v19 = vstv %s1689_s28  ;;  %s2357_s28 = sld [smem:[#allocation3 + $0x18]] }
  0xe9   : > { %v635_v20 = vmul.f32 %v634_v19, %v2255_v17  ;;  %v636_v27 = vmul.f32 %v634_v19, %v2262_v23 }
  0xec   : > { %580 = vrot.lane.b32.xlu0 %v576_v21, %s1962_s14  ;;  %554 = vrot.lane.b32.xlu1 %v549_v22, %s1961_s3  ;;  %v592_v21 = vmul.f32 %v590_v15, %v2234_v3  ;;  %v662_v22 = vstv %s1691_s27  ;;  %v2359_v15 = vld [vmem:[#allocation2 + $0x23] sm:$0xff]  ;;  %s1708_s27 = sld [smem:[#allocation3 + $0x49]] }
  0xf0   : > { %608 = vrot.lane.b32.xlu0 %v604_v24, %s1963_s17  ;;  %582 = vrot.lane.b32.xlu1 %v577_v26, %s1962_s14  ;;  %v663_v26 = vmul.f32 %v662_v22, %v2255_v17 }
  0xf4   : > { %652 = vrot.lane.b32.xlu0 %v648_v28, %s1958_s25  ;;  %610 = vrot.lane.b32.xlu1 %v605_v29, %s1963_s17  ;;  %v690_v28 = vstv %s1693_s30  ;;  %s1709_s30 = sld [smem:[#allocation3 + $0x19]] }
  0xf5   : > { %v691_v30 = vmul.f32 %v690_v28, %v2255_v17  ;;  %v692_v38 = vmul.f32 %v690_v28, %v2262_v23 }
  0xf8   : > { %680 = vrot.lane.b32.xlu0 %v676_v32, %s1959_s24  ;;  %654 = vrot.lane.b32.xlu1 %v649_v33, %s1958_s25  ;;  %v664_v33 = vmul.f32 %v662_v22, %v2262_v23 }
  0xfc   : > { %708 = vrot.lane.b32.xlu0 %v704_v35, %s1960_s29  ;;  %682 = vrot.lane.b32.xlu1 %v677_v36, %s1959_s24  ;;  %v719_v36 = vmul.f32 %v718_v34, %v2255_v17 }
 0x100   : > { %736 = vrot.lane.b32.xlu0 %v732_v39, %s1961_s3  ;;  %710 = vrot.lane.b32.xlu1 %v705_v40, %s1960_s29  ;;  %v746_v39 = vstv %s1697_s16  ;;  %s2395_s16 = sld [smem:[#allocation3 + $0x1a]] }
 0x104   : > { %271 = vrot.lane.b32.xlu0 %v267_v41, %s1958_s25  ;;  %738 = vrot.lane.b32.xlu1 %v733_v42, %s1961_s3  ;;  %v747_v41 = vmul.f32 %v746_v39, %v2255_v17 }
 0x108   : > { %299 = vrot.lane.b32.xlu0 %v295_v44, %s1959_s24  ;;  %273 = vrot.lane.b32.xlu1 %v268_v45, %s1958_s25  ;;  %v759_v44 = vstv %s1698_s20  ;;  %s2405_s20 = sld [smem:[#allocation3 + $0x4b]] }
 0x109   : > { %v760_v47 = vmul.f32 %v759_v44, %v2183_v25 }
 0x10c   : > { %327 = vrot.lane.b32.xlu0 %v323_v48, %s1960_s29  ;;  %301 = vrot.lane.b32.xlu1 %v296_v49, %s1959_s24  ;;  %v748_v49 = vmul.f32 %v746_v39, %v2262_v23  ;;  %v887_v39 = vstv %s1708_s27  ;;  %s2472_s27 = sld [smem:[#allocation3 + $0x38]] }
 0x110   : > { %355 = vrot.lane.b32.xlu0 %v351_v52, %s1961_s3  ;;  %329 = vrot.lane.b32.xlu1 %v324_v54, %s1960_s29  ;;  %v775_v54 = vmul.f32 %v774_v50, %v2255_v17 }
 0x114   : > { %383 = vrot.lane.b32.xlu0 %v379_v56, %s1962_s14  ;;  %357 = vrot.lane.b32.xlu1 %v352_v57, %s1961_s3  ;;  %v761_v56 = vmul.f32 %v759_v44, %v2190_v31  ;;  %v787_v57 = vstv %s2296_s26  ;;  %s2427_s26 = sld [smem:[#allocation3 + $0x4c]] }
 0x118   : > { %411 = vrot.lane.b32.xlu0 %v407_v60, %s1963_s17  ;;  %385 = vrot.lane.b32.xlu1 %v380_v62, %s1962_s14  ;;  %v788_v60 = vmul.f32 %v787_v57, %v2183_v25  ;;  %v2325_v62 = vld [vmem:[#allocation2 + $0x3] sm:$0xff] }
 0x11c   : > { %455 = vrot.lane.b32.xlu0 %v451_v0, %s1958_s25  ;;  %413 = vrot.lane.b32.xlu1 %v408_v1, %s1963_s17  ;;  %v776_v0 = vmul.f32 %v774_v50, %v2262_v23  ;;  %v818_v1 = vstv %s2307_s5  ;;  %s2437_s5 = sld [smem:[#allocation3 + $0x1d]] }
 0x120   : > { %483 = vrot.lane.b32.xlu0 %v479_v46, %s1959_s24  ;;  %457 = vrot.lane.b32.xlu1 %v452_v4, %s1958_s25  ;;  %v819_v46 = vmul.f32 %v818_v1, %v2325_v62  ;;  %v2338_v4 = vld [vmem:[#allocation2 + $0x1b] sm:$0xff] }
 0x124   : > { %511 = vrot.lane.b32.xlu0 %v507_v53, %s1960_s29  ;;  %485 = vrot.lane.b32.xlu1 %v480_v7, %s1959_s24  ;;  %v789_v53 = vmul.f32 %v787_v57, %v2190_v31  ;;  %v831_v7 = vstv %s2318_s7  ;;  %v889_v57 = vmul.f32 %v887_v39, %v2359_v15  ;;  %s2445_s7 = sld [smem:[#allocation3 + $0x4e]] }
 0x128   : > { %539 = vrot.lane.b32.xlu0 %v535_v9, %s1961_s3  ;;  %513 = vrot.lane.b32.xlu1 %v508_v10, %s1960_s29  ;;  %v832_v10 = vmul.f32 %v831_v7, %v2338_v4 }
 0x12c   : > { %567 = vrot.lane.b32.xlu0 %v563_v13, %s1962_s14  ;;  %541 = vrot.lane.b32.xlu1 %v536_v14, %s1961_s3  ;;  %v820_v13 = vmul.f32 %v818_v1, %v2346_v8  ;;  %v846_v14 = vstv %s2331_s8  ;;  %s2457_s8 = sld [smem:[#allocation3 + $0x1e]] }
 0x12d   : > { %v848_v28 = vmul.f32 %v846_v14, %v2346_v8 }
 0x130   : > { %595 = vrot.lane.b32.xlu0 %v591_v16, %s1963_s17  ;;  %569 = vrot.lane.b32.xlu1 %v564_v18, %s1962_s14  ;;  %v847_v18 = vmul.f32 %v846_v14, %v2325_v62 }
 0x134   : > { %639 = vrot.lane.b32.xlu0 %v635_v20, %s1958_s25  ;;  %597 = vrot.lane.b32.xlu1 %v592_v21, %s1963_s17  ;;  %v833_v20 = vmul.f32 %v831_v7, %v2359_v15  ;;  %v859_v21 = vstv %s2344_s19  ;;  %v930_v7 = vstv %s2395_s16  ;;  %s2462_s19 = sld [smem:[#allocation3 + $0x7]] }
 0x135   : > { %s2507_s16 = sld [smem:[#allocation3 + $0x20]] }
 0x136   : > { %v2266_v24 = vpop.permute.xlu0 %284 }
 0x138   : > { %667 = vrot.lane.b32.xlu0 %v663_v26, %s1959_s24  ;;  %641 = vrot.lane.b32.xlu1 %v636_v27, %s1958_s25  ;;  %v860_v26 = vmul.f32 %v859_v21, %v2338_v4 }
 0x13a   : > { %v2272_v29 = vpop.permute.xlu0 %312  ;;  %v2275_v32 = vpop.permute.xlu1 %286 }
 0x13c   : > { %695 = vrot.lane.b32.xlu0 %v691_v30, %s1960_s29  ;;  %669 = vrot.lane.b32.xlu1 %v664_v33, %s1959_s24  ;;  %v874_v30 = vstv %s2357_s28  ;;  %s2470_s28 = sld [smem:[#allocation3 + $0x4f]] }
 0x13d   : > { %v875_v34 = vmul.f32 %v874_v30, %v2325_v62 }
 0x13e   : > { %v2280_v35 = vpop.permute.xlu0 %340  ;;  %v2283_v37 = vpop.permute.xlu1 %314 }
 0x140   : > { %723 = vrot.lane.b32.xlu0 %v719_v36, %s1961_s3  ;;  %697 = vrot.lane.b32.xlu1 %v692_v38, %s1960_s29  ;;  %v861_v38 = vmul.f32 %v859_v21, %v2359_v15 }
 0x142   : > { %v2290_v40 = vpop.permute.xlu0 %368  ;;  %v2293_v42 = vpop.permute.xlu1 %342 }
 0x144   : > { %751 = vrot.lane.b32.xlu0 %v747_v41, %s1962_s14  ;;  %725 = vrot.lane.b32.xlu1 %v720_v43, %s1961_s3  ;;  %v888_v43 = vmul.f32 %v887_v39, %v2338_v4 }
 0x146   : > { %v2300_v45 = vpop.permute.xlu0 %396  ;;  %v2303_v48 = vpop.permute.xlu1 %370 }
 0x148   : > { %764 = vrot.lane.b32.xlu0 %v760_v47, %s1962_s14  ;;  %753 = vrot.lane.b32.xlu1 %v748_v49, %s1962_s14  ;;  %v876_v47 = vmul.f32 %v874_v30, %v2346_v8  ;;  %v902_v49 = vstv %s1709_s30  ;;  %s2483_s30 = sld [smem:[#allocation3 + $0x1f]] }
 0x14a   : > { %v2311_v52 = vpop.permute.xlu0 %424  ;;  %v2314_v55 = vpop.permute.xlu1 %398 }
 0x14c   : > { %779 = vrot.lane.b32.xlu0 %v775_v54, %s1963_s17  ;;  %766 = vrot.lane.b32.xlu1 %v761_v56, %s1962_s14  ;;  %v903_v54 = vmul.f32 %v902_v49, %v2325_v62 }
 0x14e   : > { %v2322_v59 = vpop.permute.xlu0 %468  ;;  %v2327_v63 = vpop.permute.xlu1 %426 }
 0x150   : > { %792 = vrot.lane.b32.xlu0 %v788_v60, %s1963_s17  ;;  %781 = vrot.lane.b32.xlu1 %v776_v0, %s1963_s17  ;;  %v915_v60 = vstv %s1710_s4  ;;  %s2495_s4 = sld [smem:[#allocation3 + $0x50]] }
 0x151   : > { %v916_v1 = vmul.f32 %v915_v60, %v2338_v4 }
 0x152   : > { %v2335_v2 = vpop.permute.xlu0 %496  ;;  %v2340_v6 = vpop.permute.xlu1 %470 }
 0x154   : > { %823 = vrot.lane.b32.xlu0 %v819_v46, %s1958_s25  ;;  %794 = vrot.lane.b32.xlu1 %v789_v53, %s1963_s17  ;;  %v904_v53 = vmul.f32 %v902_v49, %v2346_v8 }
 0x156   : > { %v2350_v9 = vpop.permute.xlu0 %524  ;;  %v2353_v12 = vpop.permute.xlu1 %498 }
 0x158   : > { %836 = vrot.lane.b32.xlu0 %v832_v10, %s1958_s25  ;;  %825 = vrot.lane.b32.xlu1 %v820_v13, %s1958_s25  ;;  %v931_v13 = vmul.f32 %v930_v7, %v2325_v62 }
 0x15a   : > { %v2363_v16 = vpop.permute.xlu0 %552  ;;  %v2366_v19 = vpop.permute.xlu1 %526 }
 0x15c   : > { %851 = vrot.lane.b32.xlu0 %v847_v18, %s1959_s24  ;;  %838 = vrot.lane.b32.xlu1 %v833_v20, %s1958_s25  ;;  %v917_v18 = vmul.f32 %v915_v60, %v2359_v15  ;;  %v943_v20 = vstv %s2405_s20  ;;  %s2516_s20 = sld [smem:[#allocation3 + $0x51]] }
 0x15e   : > { %v2372_v22 = vpop.permute.xlu0 %580  ;;  %v2375_v27 = vpop.permute.xlu1 %554 }
 0x160   : > { %864 = vrot.lane.b32.xlu0 %v860_v26, %s1959_s24  ;;  %853 = vrot.lane.b32.xlu1 %v848_v28, %s1959_s24  ;;  %v944_v26 = vmul.f32 %v943_v20, %v2338_v4 }
 0x162   : > { %v2381_v33 = vpop.permute.xlu0 %608  ;;  %v2384_v36 = vpop.permute.xlu1 %582 }
 0x164   : > { %879 = vrot.lane.b32.xlu0 %v875_v34, %s1960_s29  ;;  %866 = vrot.lane.b32.xlu1 %v861_v38, %s1959_s24  ;;  %v932_v34 = vmul.f32 %v930_v7, %v2346_v8  ;;  %v958_v38 = vstv %s2416_s23  ;;  %s2525_s23 = sld [smem:[#allocation3 + $0x21]] }
 0x166   : > { %v2389_v41 = vpop.permute.xlu0 %652  ;;  %v2392_v44 = vpop.permute.xlu1 %610 }
 0x168   : > { %892 = vrot.lane.b32.xlu0 %v888_v43, %s1960_s29  ;;  %881 = vrot.lane.b32.xlu1 %v876_v47, %s1960_s29  ;;  %v959_v47 = vmul.f32 %v958_v38, %v2325_v62 }
 0x16a   : > { %v2399_v50 = vpop.permute.xlu0 %680  ;;  %v2402_v56 = vpop.permute.xlu1 %654 }
 0x16c   : > { %907 = vrot.lane.b32.xlu0 %v903_v54, %s1961_s3  ;;  %894 = vrot.lane.b32.xlu1 %v889_v57, %s1960_s29  ;;  %v945_v57 = vmul.f32 %v943_v20, %v2359_v15  ;;  %v960_v20 = vmul.f32 %v958_v38, %v2346_v8 }
 0x16e   : > { %v2409_v0 = vpop.permute.xlu0 %708  ;;  %v2412_v46 = vpop.permute.xlu1 %682 }
 0x170   : > { %920 = vrot.lane.b32.xlu0 %v916_v1, %s1961_s3  ;;  %909 = vrot.lane.b32.xlu1 %v904_v53, %s1961_s3 }
 0x172   : > { %v2420_v10 = vpop.permute.xlu0 %736  ;;  %v2423_v14 = vpop.permute.xlu1 %710 }
 0x174   : > { %935 = vrot.lane.b32.xlu0 %v931_v13, %s1962_s14  ;;  %922 = vrot.lane.b32.xlu1 %v917_v18, %s1961_s3 }
 0x176   : > { %v272_v21 = vpop.permute.xlu0 %271  ;;  %v2432_v28 = vpop.permute.xlu1 %738 }
 0x177   : > { %v277_v30 = vadd.f32 %v272_v21, %v2140_v51  ;;  %v971_v51 = vstv %s2427_s26  ;;  %v2454_v21 = vld [vmem:[#allocation2 + $0x4] sm:$0xff]  ;;  %s2534_s26 = sld [smem:[#allocation3 + $0x52]] }
 0x178   : > { %948 = vrot.lane.b32.xlu0 %v944_v26, %s1962_s14  ;;  %937 = vrot.lane.b32.xlu1 %v932_v34, %s1962_s14  ;;  %v972_v7 = vmul.f32 %v971_v51, %v2338_v4  ;;  %v1002_v26 = vstv %s2437_s5  ;;  %s2539_s5 = sld [smem:[#allocation3 + $0xe]] }
 0x179   : > { %v290_v39 = vadd.f32 %v2266_v24, %v277_v30  ;;  %v1003_v34 = vmul.f32 %v1002_v26, %v2454_v21 }
 0x17a   : > { %v300_v43 = vpop.permute.xlu0 %299  ;;  %v274_v49 = vpop.permute.xlu1 %273 }
 0x17b   : > { %v305_v54 = vadd.f32 %v300_v43, %v290_v39  ;;  %v278_v60 = vadd.f32 %v274_v49, %v2148_v58  ;;  %v973_v43 = vmul.f32 %v971_v51, %v2359_v15  ;;  %v1015_v49 = vstv %s2445_s7  ;;  %s2545_s7 = sld [smem:[#allocation3 + $0x22]] }
 0x17c   : > { %963 = vrot.lane.b32.xlu0 %v959_v47, %s1963_s17  ;;  %950 = vrot.lane.b32.xlu1 %v945_v57, %s1962_s14  ;;  %v2467_v47 = vld [vmem:[#allocation2 + $0x1c] sm:$0xff] }
 0x17d   : > { %v318_v1 = vadd.f32 %v2272_v29, %v305_v54  ;;  %v291_v24 = vadd.f32 %v2275_v32, %v278_v60  ;;  %v2475_v54 = vld [vmem:[#allocation2 + $0xc] sm:$0xff]  ;;  %v1016_v60 = vmul.f32 %v1015_v49, %v2467_v47 }
 0x17e   : > { %v328_v53 = vpop.permute.xlu0 %327  ;;  %v302_v13 = vpop.permute.xlu1 %301 }
 0x17f   : > { %v333_v18 = vadd.f32 %v328_v53, %v318_v1  ;;  %v306_v58 = vadd.f32 %v302_v13, %v291_v24  ;;  %v1004_v53 = vmul.f32 %v1002_v26, %v2475_v54 }
 0x180   : > { %976 = vrot.lane.b32.xlu0 %v972_v7, %s1963_s17  ;;  %965 = vrot.lane.b32.xlu1 %v960_v20, %s1963_s17  ;;  %v1030_v7 = vstv %s2457_s8  ;;  %s2547_s8 = sld [smem:[#allocation3 + $0x3f]] }
 0x181   : > { %v346_v29 = vadd.f32 %v2280_v35, %v333_v18  ;;  %v319_v32 = vadd.f32 %v2283_v37, %v306_v58 }
 0x182   : > { %v356_v30 = vpop.permute.xlu0 %355  ;;  %v330_v38 = vpop.permute.xlu1 %329 }
 0x183   : > { %v361_v39 = vadd.f32 %v356_v30, %v346_v29  ;;  %v334_v35 = vadd.f32 %v330_v38, %v319_v32  ;;  %v1031_v29 = vmul.f32 %v1030_v7, %v2454_v21  ;;  %v443_v38 = vstv %s2472_s27  ;;  %s2578_s27 = sld [smem:[#allocation3 + $0x55]] }
 0x184   : > { %1007 = vrot.lane.b32.xlu0 %v1003_v34, %s1958_s25  ;;  %978 = vrot.lane.b32.xlu1 %v973_v43, %s1963_s17  ;;  %v1043_v34 = vstv %s2470_s28  ;;  %s2566_s28 = sld [smem:[#allocation3 + $0x24]] }
 0x185   : > { %v374_v37 = vadd.f32 %v2290_v40, %v361_v39  ;;  %v347_v57 = vadd.f32 %v2293_v42, %v334_v35  ;;  %v2486_v40 = vld [vmem:[#allocation2 + $0x24] sm:$0xff]  ;;  %v438_v42 = vstv %s2462_s19  ;;  %s2556_s19 = sld [smem:[#allocation3 + $0x53]] }
 0x186   : > { %v384_v51 = vpop.permute.xlu0 %383  ;;  %v358_v1 = vpop.permute.xlu1 %357  ;;  %v1017_v30 = vmul.f32 %v1015_v49, %v2486_v40  ;;  %v444_v49 = vmul.f32 %v443_v38, %v2157_v5 }
 0x187   : > { %v389_v24 = vadd.f32 %v384_v51, %v374_v37  ;;  %v362_v13 = vadd.f32 %v358_v1, %v347_v57  ;;  %v1044_v37 = vmul.f32 %v1043_v34, %v2467_v47  ;;  %v1058_v1 = vstv %s2483_s30  ;;  %s2589_s30 = sld [smem:[#allocation3 + $0x25]] }
 0x188   : > { %1020 = vrot.lane.b32.xlu0 %v1016_v60, %s1958_s25  ;;  %1009 = vrot.lane.b32.xlu1 %v1004_v53, %s1958_s25  ;;  %v1032_v60 = vmul.f32 %v1030_v7, %v2475_v54  ;;  %v1059_v5 = vmul.f32 %v1058_v1, %v2454_v21  ;;  %v1045_v7 = vmul.f32 %v1043_v34, %v2486_v40 }
 0x189   : > { %v402_v18 = vadd.f32 %v2300_v45, %v389_v24  ;;  %v375_v20 = vadd.f32 %v2303_v48, %v362_v13  ;;  %v439_v45 = vmul.f32 %v438_v42, %v2227_v61  ;;  %v1060_v34 = vmul.f32 %v1058_v1, %v2475_v54 }
 0x18a   : > { %v412_v58 = vpop.permute.xlu0 %411  ;;  %v386_v26 = vpop.permute.xlu1 %385 }
 0x18b   : > { %v417_v32 = vadd.f32 %v412_v58, %v402_v18  ;;  %v390_v39 = vadd.f32 %v386_v26, %v375_v20  ;;  %v1071_v20 = vstv %s2495_s4  ;;  %v445_v58 = vmul.f32 %v443_v38, %v2162_v11  ;;  %s2600_s4 = sld [smem:[#allocation3 + $0x56]] }
 0x18c   : > { %1035 = vrot.lane.b32.xlu0 %v1031_v29, %s1959_s24  ;;  %1022 = vrot.lane.b32.xlu1 %v1017_v30, %s1958_s25  ;;  %v1072_v26 = vmul.f32 %v1071_v20, %v2467_v47 }
 0x18d   : > { %v430_v43 = vadd.f32 %v2311_v52, %v417_v32  ;;  %v403_v48 = vadd.f32 %v2314_v55, %v390_v39  ;;  %v440_v55 = vmul.f32 %v438_v42, %v2234_v3  ;;  %v1086_v39 = vstv %s2507_s16  ;;  %s2611_s16 = sld [smem:[#allocation3 + $0x26]] }
 0x18e   : > { %v456_v35 = vpop.permute.xlu0 %455  ;;  %v414_v51 = vpop.permute.xlu1 %413 }
 0x18f   : > { %v441_v57 = vadd.f32 %v439_v45, %v430_v43  ;;  %v418_v61 = vadd.f32 %v414_v51, %v403_v48  ;;  %v1087_v43 = vmul.f32 %v1086_v39, %v2454_v21 }
 0x190   : > { %1048 = vrot.lane.b32.xlu0 %v1044_v37, %s1959_s24  ;;  %1037 = vrot.lane.b32.xlu1 %v1032_v60, %s1959_s24  ;;  %v1073_v37 = vmul.f32 %v1071_v20, %v2486_v40  ;;  %v1127_v20 = vstv %s2534_s26  ;;  %s2626_s26 = sld [smem:[#allocation3 + $0x46]] }
 0x191   : > { %v446_v52 = vadd.f32 %v444_v49, %v441_v57  ;;  %v431_v24 = vadd.f32 %v2327_v63, %v418_v61  ;;  %v1099_v49 = vstv %s2516_s20  ;;  %s2618_s20 = sld [smem:[#allocation3 + $0x15]] }
 0x192   : > { %v484_v53 = vpop.permute.xlu0 %483  ;;  %v458_v18 = vpop.permute.xlu1 %457  ;;  %v1100_v60 = vmul.f32 %v1099_v49, %v2467_v47 }
 0x193   : > { %v461_v13 = vadd.f32 %v456_v35, %v446_v52  ;;  %v442_v29 = vadd.f32 %v440_v55, %v431_v24  ;;  %v1088_v52 = vmul.f32 %v1086_v39, %v2475_v54  ;;  %v1114_v55 = vstv %s2525_s23  ;;  %s2624_s23 = sld [smem:[#allocation3 + $0x57]] }
 0x194   : > { %1063 = vrot.lane.b32.xlu0 %v1059_v5, %s1960_s29  ;;  %1050 = vrot.lane.b32.xlu1 %v1045_v7, %s1959_s24  ;;  %v1115_v5 = vmul.f32 %v1114_v55, %v2454_v21  ;;  %v1101_v7 = vmul.f32 %v1099_v49, %v2486_v40 }
 0x195   : > { %v474_v3 = vadd.f32 %v2322_v59, %v461_v13  ;;  %v447_v63 = vadd.f32 %v445_v58, %v442_v29 }
 0x196   : > { %v512_v42 = vpop.permute.xlu0 %511  ;;  %v486_v30 = vpop.permute.xlu1 %485 }
 0x197   : > { %v489_v32 = vadd.f32 %v484_v53, %v474_v3  ;;  %v462_v11 = vadd.f32 %v458_v18, %v447_v63  ;;  %v1128_v63 = vmul.f32 %v1127_v20, %v2467_v47 }
 0x198   : > { %1076 = vrot.lane.b32.xlu0 %v1072_v26, %s1960_s29  ;;  %1065 = vrot.lane.b32.xlu1 %v1060_v34, %s1960_s29  ;;  %v627_v34 = vstv %s2547_s8  ;;  %s2654_s8 = sld [smem:[#allocation3 + $0x28]] }
 0x199   : > { %v502_v38 = vadd.f32 %v2335_v2, %v489_v32  ;;  %v475_v59 = vadd.f32 %v2340_v6, %v462_v11  ;;  %v1116_v32 = vmul.f32 %v1114_v55, %v2475_v54 }
 0x19a   : > { %v540_v45 = vpop.permute.xlu0 %539  ;;  %v514_v35 = vpop.permute.xlu1 %513 }
 0x19b   : > { %v517_v48 = vadd.f32 %v512_v42, %v502_v38  ;;  %v490_v57 = vadd.f32 %v486_v30, %v475_v59  ;;  %v1142_v30 = vstv %s2545_s7  ;;  %s2644_s7 = sld [smem:[#allocation3 + $0x58]] }
 0x19c   : > { %1091 = vrot.lane.b32.xlu0 %v1087_v43, %s1961_s3  ;;  %1078 = vrot.lane.b32.xlu1 %v1073_v37, %s1960_s29  ;;  %v1143_v59 = vmul.f32 %v1142_v30, %v2454_v21  ;;  %v1155_v37 = vstv %s2556_s19  ;;  %s2662_s19 = sld [smem:[#allocation3 + $0x59]] }
 0x19d   : > { %v530_v2 = vadd.f32 %v2350_v9, %v517_v48  ;;  %v503_v6 = vadd.f32 %v2353_v12, %v490_v57 }
 0x19e   : > { %v568_v51 = vpop.permute.xlu0 %567  ;;  %v542_v61 = vpop.permute.xlu1 %541 }
 0x19f   : > { %v545_v1 = vadd.f32 %v540_v45, %v530_v2  ;;  %v518_v9 = vadd.f32 %v514_v35, %v503_v6  ;;  %v628_v45 = vmul.f32 %v627_v34, %v2183_v25  ;;  %v1129_v35 = vmul.f32 %v1127_v20, %v2486_v40 }
 0x1a0   : > { %1104 = vrot.lane.b32.xlu0 %v1100_v60, %s1961_s3  ;;  %1093 = vrot.lane.b32.xlu1 %v1088_v52, %s1961_s3  ;;  %v1156_v25 = vmul.f32 %v1155_v37, %v2467_v47  ;;  %v2586_v60 = vld [vmem:[#allocation2 + $0x5] sm:$0xff] }
 0x1a1   : > { %v558_v24 = vadd.f32 %v2363_v16, %v545_v1  ;;  %v531_v12 = vadd.f32 %v2366_v19, %v518_v9  ;;  %v622_v19 = vstv %s2539_s5  ;;  %v1186_v1 = vstv %s2566_s28  ;;  %s2635_s5 = sld [smem:[#allocation3 + $0x27]] }
 0x1a2   : > { %v596_v53 = vpop.permute.xlu0 %595  ;;  %v570_v18 = vpop.permute.xlu1 %569  ;;  %v1187_v9 = vmul.f32 %v1186_v1, %v2586_v60  ;;  %s2670_s28 = sld [smem:[#allocation3 + $0x29]] }
 0x1a3   : > { %v573_v13 = vadd.f32 %v568_v51, %v558_v24  ;;  %v546_v58 = vadd.f32 %v542_v61, %v531_v12  ;;  %v1144_v51 = vmul.f32 %v1142_v30, %v2475_v54  ;;  %v629_v61 = vmul.f32 %v627_v34, %v2190_v31 }
 0x1a4   : > { %1119 = vrot.lane.b32.xlu0 %v1115_v5, %s1962_s14  ;;  %1106 = vrot.lane.b32.xlu1 %v1101_v7, %s1961_s3  ;;  %v2597_v5 = vld [vmem:[#allocation2 + $0x1d] sm:$0xff] }
 0x1a5   : > { %v586_v16 = vadd.f32 %v2372_v22, %v573_v13  ;;  %v559_v29 = vadd.f32 %v2375_v27, %v546_v58  ;;  %v623_v22 = vmul.f32 %v622_v19, %v2255_v17  ;;  %v1199_v13 = vstv %s2578_s27  ;;  %s2677_s27 = sld [smem:[#allocation3 + $0x5a]] }
 0x1a6   : > { %v640_v3 = vpop.permute.xlu0 %639  ;;  %v598_v26 = vpop.permute.xlu1 %597  ;;  %v1200_v58 = vmul.f32 %v1199_v13, %v2597_v5 }
 0x1a7   : > { %v601_v42 = vadd.f32 %v596_v53, %v586_v16  ;;  %v574_v39 = vadd.f32 %v570_v18, %v559_v29  ;;  %v1157_v53 = vmul.f32 %v1155_v37, %v2486_v40  ;;  %v806_v37 = vstv %s2618_s20  ;;  %s2709_s20 = sld [smem:[#allocation3 + $0x5d]] }
 0x1a8   : > { %1132 = vrot.lane.b32.xlu0 %v1128_v63, %s1962_s14  ;;  %1121 = vrot.lane.b32.xlu1 %v1116_v32, %s1962_s14 }
 0x1a9   : > { %v614_v11 = vadd.f32 %v2381_v33, %v601_v42  ;;  %v587_v27 = vadd.f32 %v2384_v36, %v574_v39  ;;  %v624_v36 = vmul.f32 %v622_v19, %v2262_v23  ;;  %v2614_v42 = vld [vmem:[#allocation2 + $0x25] sm:$0xff] }
 0x1aa   : > { %v668_v38 = vpop.permute.xlu0 %667  ;;  %v642_v48 = vpop.permute.xlu1 %641  ;;  %v1201_v39 = vmul.f32 %v1199_v13, %v2614_v42 }
 0x1ab   : > { %v625_v43 = vadd.f32 %v623_v22, %v614_v11  ;;  %v602_v17 = vadd.f32 %v598_v26, %v587_v27  ;;  %v1227_v22 = vstv %s2600_s4  ;;  %s2691_s4 = sld [smem:[#allocation3 + $0x5c]] }
 0x1ac   : > { %1147 = vrot.lane.b32.xlu0 %v1143_v59, %s1963_s17  ;;  %1134 = vrot.lane.b32.xlu1 %v1129_v35, %s1962_s14 }
 0x1ad   : > { %v630_v33 = vadd.f32 %v628_v45, %v625_v43  ;;  %v615_v49 = vadd.f32 %v2392_v44, %v602_v17 }
 0x1ae   : > { %v696_v57 = vpop.permute.xlu0 %695  ;;  %v670_v6 = vpop.permute.xlu1 %669 }
 0x1af   : > { %v645_v2 = vadd.f32 %v640_v3, %v630_v33  ;;  %v626_v52 = vadd.f32 %v624_v36, %v615_v49  ;;  %v1214_v3 = vstv %s2589_s30  ;;  %s2684_s30 = sld [smem:[#allocation3 + $0x2b]] }
 0x1b0   : > { %1160 = vrot.lane.b32.xlu0 %v1156_v25, %s1963_s17  ;;  %1149 = vrot.lane.b32.xlu1 %v1144_v51, %s1963_s17  ;;  %v1215_v32 = vmul.f32 %v1214_v3, %v2586_v60  ;;  %v1255_v25 = vstv %s2624_s23  ;;  %v807_v51 = vmul.f32 %v806_v37, %v2325_v62  ;;  %s2718_s23 = sld [smem:[#allocation3 + $0x2d]] }
 0x1b1   : > { %v658_v23 = vadd.f32 %v2389_v41, %v645_v2  ;;  %v631_v44 = vadd.f32 %v629_v61, %v626_v52  ;;  %v2603_v41 = vld [vmem:[#allocation2 + $0xd] sm:$0xff]  ;;  %v811_v2 = vstv %s2626_s26  ;;  %v1256_v52 = vmul.f32 %v1255_v25, %v2597_v5  ;;  %s2723_s26 = sld [smem:[#allocation3 + $0x1c]] }
 0x1b2   : > { %v724_v55 = vpop.permute.xlu0 %723  ;;  %v698_v12 = vpop.permute.xlu1 %697  ;;  %v1188_v29 = vmul.f32 %v1186_v1, %v2603_v41  ;;  %v1216_v43 = vmul.f32 %v1214_v3, %v2603_v41 }
 0x1b3   : > { %v673_v24 = vadd.f32 %v668_v38, %v658_v23  ;;  %v646_v31 = vadd.f32 %v642_v48, %v631_v44  ;;  %v1228_v38 = vmul.f32 %v1227_v22, %v2597_v5  ;;  %v1242_v48 = vstv %s2611_s16  ;;  %s2700_s16 = sld [smem:[#allocation3 + $0x2c]] }
 0x1b4   : > { %1191 = vrot.lane.b32.xlu0 %v1187_v9, %s1958_s25  ;;  %1162 = vrot.lane.b32.xlu1 %v1157_v53, %s1963_s17  ;;  %v1243_v33 = vmul.f32 %v1242_v48, %v2586_v60  ;;  %v812_v23 = vmul.f32 %v811_v2, %v2338_v4  ;;  %v1244_v9 = vmul.f32 %v1242_v48, %v2603_v41 }
 0x1b5   : > { %v686_v18 = vadd.f32 %v2399_v50, %v673_v24  ;;  %v659_v7 = vadd.f32 %v2402_v56, %v646_v31  ;;  %v1270_v24 = vstv %s2635_s5  ;;  %v808_v53 = vmul.f32 %v806_v37, %v2346_v8  ;;  %s2727_s5 = sld [smem:[#allocation3 + $0x4d]] }
 0x1b6   : > { %v752_v20 = vpop.permute.xlu0 %751  ;;  %v726_v19 = vpop.permute.xlu1 %725  ;;  %v1271_v4 = vmul.f32 %v1270_v24, %v2586_v60 }
 0x1b7   : > { %v701_v16 = vadd.f32 %v696_v57, %v686_v18  ;;  %v674_v63 = vadd.f32 %v670_v6, %v659_v7  ;;  %v1229_v57 = vmul.f32 %v1227_v22, %v2614_v42 }
 0x1b8   : > { %1204 = vrot.lane.b32.xlu0 %v1200_v58, %s1958_s25  ;;  %1193 = vrot.lane.b32.xlu1 %v1188_v29, %s1958_s25  ;;  %v1283_v58 = vstv %s2644_s7  ;;  %s2731_s7 = sld [smem:[#allocation3 + $0x5e]] }
 0x1b9   : > { %v714_v50 = vadd.f32 %v2409_v0, %v701_v16  ;;  %v687_v56 = vadd.f32 %v2412_v46, %v674_v63  ;;  %v813_v16 = vmul.f32 %v811_v2, %v2359_v15  ;;  %v1284_v63 = vmul.f32 %v1283_v58, %v2597_v5 }
 0x1ba   : > { %v765_v26 = vpop.permute.xlu0 %764  ;;  %v754_v34 = vpop.permute.xlu1 %753 }
 0x1bb   : > { %v729_v30 = vadd.f32 %v724_v55, %v714_v50  ;;  %v702_v0 = vadd.f32 %v698_v12, %v687_v56 }
 0x1bc   : > { %1219 = vrot.lane.b32.xlu0 %v1215_v32, %s1959_s24  ;;  %1206 = vrot.lane.b32.xlu1 %v1201_v39, %s1958_s25  ;;  %v1298_v32 = vstv %s2654_s8  ;;  %s2738_s8 = sld [smem:[#allocation3 + $0x2e]] }
 0x1bd   : > { %v742_v11 = vadd.f32 %v2420_v10, %v729_v30  ;;  %v715_v46 = vadd.f32 %v2423_v14, %v702_v0  ;;  %v1299_v39 = vmul.f32 %v1298_v32, %v2586_v60  ;;  %v1300_v48 = vmul.f32 %v1298_v32, %v2603_v41 }
 0x1be   : > { %v780_v27 = vpop.permute.xlu0 %779  ;;  %v767_v45 = vpop.permute.xlu1 %766 }
 0x1bf   : > { %v757_v59 = vadd.f32 %v752_v20, %v742_v11  ;;  %v730_v35 = vadd.f32 %v726_v19, %v715_v46  ;;  %v1257_v20 = vmul.f32 %v1255_v25, %v2614_v42  ;;  %v1285_v11 = vmul.f32 %v1283_v58, %v2614_v42 }
 0x1c0   : > { %1232 = vrot.lane.b32.xlu0 %v1228_v38, %s1959_s24  ;;  %1221 = vrot.lane.b32.xlu1 %v1216_v43, %s1959_s24  ;;  %v1311_v46 = vstv %s2662_s19  ;;  %v1398_v58 = vstv %s2700_s16  ;;  %s2756_s19 = sld [smem:[#allocation3 + $0x2f]] }
 0x1c1   : > { %v770_v10 = vadd.f32 %v765_v26, %v757_v59  ;;  %v743_v14 = vadd.f32 %v2432_v28, %v730_v35  ;;  %v1272_v26 = vmul.f32 %v1270_v24, %v2603_v41  ;;  %v1312_v59 = vmul.f32 %v1311_v46, %v2597_v5 }
 0x1c2   : > { %v793_v17 = vpop.permute.xlu0 %792  ;;  %v782_v49 = vpop.permute.xlu1 %781  ;;  %v1326_v35 = vstv %s2670_s28  ;;  %s1755_s28 = sld [smem:[#allocation3 + $0x30]] }
 0x1c3   : > { %v785_v36 = vadd.f32 %v780_v27, %v770_v10  ;;  %v758_v6 = vadd.f32 %v754_v34, %v743_v14  ;;  %v1327_v14 = vmul.f32 %v1326_v35, %v2586_v60 }
 0x1c4   : > { %1247 = vrot.lane.b32.xlu0 %v1243_v33, %s1960_s29  ;;  %1234 = vrot.lane.b32.xlu1 %v1229_v57, %s1959_s24 }
 0x1c5   : > { %v798_v1 = vadd.f32 %v793_v17, %v785_v36  ;;  %v771_v28 = vadd.f32 %v767_v45, %v758_v6  ;;  %v1313_v36 = vmul.f32 %v1311_v46, %v2614_v42  ;;  %v995_v46 = vstv %s2727_s5 }
 0x1c6   : > { %v824_v61 = vpop.permute.xlu0 %823  ;;  %v795_v55 = vpop.permute.xlu1 %794 }
 0x1c7   : > { %v809_v44 = vadd.f32 %v807_v51, %v798_v1  ;;  %v786_v12 = vadd.f32 %v782_v49, %v771_v28  ;;  %v1339_v49 = vstv %s2677_s27  ;;  %v1328_v1 = vmul.f32 %v1326_v35, %v2603_v41  ;;  %v2697_v28 = vld [vmem:[#allocation2 + $0x6] sm:$0xff]  ;;  %s1744_s27 = sld [smem:[#allocation3 + $0x5b]] }
 0x1c8   : > { %1260 = vrot.lane.b32.xlu0 %v1256_v52, %s1960_s29  ;;  %1249 = vrot.lane.b32.xlu1 %v1244_v9, %s1960_s29  ;;  %v1340_v2 = vmul.f32 %v1339_v49, %v2597_v5  ;;  %v1341_v24 = vmul.f32 %v1339_v49, %v2614_v42  ;;  %v1439_v35 = vstv %s2731_s7  ;;  %s1551_s7 = scalar_lea.sflag [#allocation5], %s2098_s6 }
 0x1c9   : > { %v814_v62 = vadd.f32 %v812_v23, %v809_v44  ;;  %v799_v13 = vadd.f32 %v795_v55, %v786_v12  ;;  %v2706_v12 = vld [vmem:[#allocation2 + $0x1e] sm:$0xff] }
 0x1ca   : > { %v837_v31 = vpop.permute.xlu0 %836  ;;  %v826_v7 = vpop.permute.xlu1 %825 }
 0x1cb   : > { %v829_v18 = vadd.f32 %v824_v61, %v814_v62  ;;  %v810_v19 = vadd.f32 %v808_v53, %v799_v13  ;;  %v1370_v61 = vstv %s2684_s30  ;;  %v1383_v62 = vstv %s2691_s4  ;;  %v2712_v13 = vld [vmem:[#allocation2 + $0xe] sm:$0xff]  ;;  %s1659_s30 = sshll.u32 %s2098_s6, 4  ;;  %s1765_s4 = sshll.u32 %s2003_s13, 8 }
 0x1cc   : > { %1275 = vrot.lane.b32.xlu0 %v1271_v4, %s1961_s3  ;;  %1262 = vrot.lane.b32.xlu1 %v1257_v20, %s1960_s29  ;;  %v1371_v44 = vmul.f32 %v1370_v61, %v2697_v28  ;;  %v1384_v4 = vmul.f32 %v1383_v62, %v2706_v12  ;;  %v1372_v20 = vmul.f32 %v1370_v61, %v2712_v13  ;;  %s173_s16 = scalar_lea.vmem [#allocation8], %s1659_s30  ;;  %s2807_s5 = scalar_lea.hbm %s2855_s2, %s1765_s4 }
 0x1cd   : > { %v842_v29 = vadd.f32 %v837_v31, %v829_v18  ;;  %v815_v8 = vadd.f32 %v813_v16, %v810_v19  ;;  %v2721_v19 = vld [vmem:[#allocation2 + $0x26] sm:$0xff]  ;;  %s1964_s13 = smov [#allocation8]  }
 0x1ce   : > { %v852_v3 = vpop.permute.xlu0 %851  ;;  %v839_v50 = vpop.permute.xlu1 %838 }
 0x1cf   : > { %v857_v56 = vadd.f32 %v852_v3, %v842_v29  ;;  %v830_v30 = vadd.f32 %v826_v7, %v815_v8  ;;  %v1399_v8 = vmul.f32 %v1398_v58, %v2697_v28 }
 0x1d0   : > { %1288 = vrot.lane.b32.xlu0 %v1284_v63, %s1961_s3  ;;  %1277 = vrot.lane.b32.xlu1 %v1272_v26, %s1961_s3 }
 0x1d1   : > { %v843_v15 = vadd.f32 %v839_v50, %v830_v30  ;;  %v1385_v50 = vmul.f32 %v1383_v62, %v2721_v19 }
 0x1d2   : > { %v865_v34 = vpop.permute.xlu0 %864  ;;  %v854_v22 = vpop.permute.xlu1 %853 }
 0x1d3   : > { %v870_v0 = vadd.f32 %v865_v34, %v857_v56  ;;  %v858_v27 = vadd.f32 %v854_v22, %v843_v15  ;;  %v1411_v56 = vstv %s2709_s20  ;;  %v1400_v34 = vmul.f32 %v1398_v58, %v2712_v13  ;;  %s1564_s20 = sshll.u32 %s173_s16, 4  ;;  %s2809_s20 = int_to_ptr.vmem [resolvable:$true] %s1564_s20 }
 0x1d4   : > { %1303 = vrot.lane.b32.xlu0 %v1299_v39, %s1962_s14  ;;  %1290 = vrot.lane.b32.xlu1 %v1285_v11, %s1961_s3  ;;  %v1412_v30 = vmul.f32 %v1411_v56, %v2706_v12  ;;  %v1426_v39 = vstv %s2718_s23 }
 0x1d5   : > { %v1428_v49 = vmul.f32 %v1426_v39, %v2712_v13 }
 0x1d6   : > { %v880_v38 = vpop.permute.xlu0 %879  ;;  %v867_v45 = vpop.permute.xlu1 %866 }
 0x1d7   : > { %v885_v43 = vadd.f32 %v880_v38, %v870_v0  ;;  %v871_v10 = vadd.f32 %v867_v45, %v858_v27  ;;  %v990_v0 = vstv %s2723_s26  ;;  %v1427_v38 = vmul.f32 %v1426_v39, %v2697_v28 }
 0x1d8   : > { %1316 = vrot.lane.b32.xlu0 %v1312_v59, %s1962_s14  ;;  %1305 = vrot.lane.b32.xlu1 %v1300_v48, %s1962_s14  ;;  %v991_v45 = vmul.f32 %v990_v0, %v2454_v21  ;;  %v1413_v48 = vmul.f32 %v1411_v56, %v2721_v19 }
 0x1da   : > { %v893_v37 = vpop.permute.xlu0 %892  ;;  %v882_v17 = vpop.permute.xlu1 %881 }
 0x1db   : > { %v898_v33 = vadd.f32 %v893_v37, %v885_v43  ;;  %v886_v57 = vadd.f32 %v882_v17, %v871_v10  ;;  %v996_v10 = vmul.f32 %v995_v46, %v2467_v47  ;;  %v997_v47 = vmul.f32 %v995_v46, %v2486_v40 }
 0x1dc   : > { %1331 = vrot.lane.b32.xlu0 %v1327_v14, %s1963_s17  ;;  %1318 = vrot.lane.b32.xlu1 %v1313_v36, %s1962_s14 }
 0x1de   : > { %v908_v25 = vpop.permute.xlu0 %907  ;;  %v895_v6 = vpop.permute.xlu1 %894 }
 0x1df   : > { %v913_v51 = vadd.f32 %v908_v25, %v898_v33  ;;  %v899_v52 = vadd.f32 %v895_v6, %v886_v57  ;;  %v1440_v33 = vmul.f32 %v1439_v35, %v2706_v12  ;;  %v1454_v57 = vstv %s2738_s8  ;;  %s1882_s8 = scalar_lea.vmem %s2809_s20, 256 }
 0x1e0   : > { %1344 = vrot.lane.b32.xlu0 %v1340_v2, %s1963_s17  ;;  %1333 = vrot.lane.b32.xlu1 %v1328_v1, %s1963_s17  ;;  %v992_v25 = vmul.f32 %v990_v0, %v2475_v54  ;;  %v1455_v1 = vmul.f32 %v1454_v57, %v2697_v28  ;;  %p1883_p12 = scmp.ne.s32.totalorder %s2809_s20, %s1882_s8 }
 0x1e2   : > { %v921_v23 = vpop.permute.xlu0 %920  ;;  %v910_v55 = vpop.permute.xlu1 %909  ;;  %p1884_p7 = pnand %p1883_p12, %p2871_p13 }
 0x1e3   : > { %v926_v9 = vadd.f32 %v921_v23, %v913_v51  ;;  %v914_v53 = vadd.f32 %v910_v55, %v899_v52  ;;  %v1441_v52 = vmul.f32 %v1439_v35, %v2721_v19 }
 0x1e4   : > { %1375 = vrot.lane.b32.xlu0 %v1371_v44, %s1958_s25  ;;  %1346 = vrot.lane.b32.xlu1 %v1341_v24, %s1963_s17  ;;  %v1482_v24 = vstv %s2756_s19  ;;  %p1885_p8 = pneg %p1884_p7 }
 0x1e6   : > { %v936_v31 = vpop.permute.xlu0 %935  ;;  %v923_v18 = vpop.permute.xlu1 %922 }
 0x1e7   : > { %v941_v7 = vadd.f32 %v936_v31, %v926_v9  ;;  %v927_v16 = vadd.f32 %v923_v18, %v914_v53  ;;  %v1456_v9 = vmul.f32 %v1454_v57, %v2712_v13  ;;  %v1483_v53 = vmul.f32 %v1482_v24, %v2697_v28 }
 0x1e8   : > { %1388 = vrot.lane.b32.xlu0 %v1384_v4, %s1958_s25  ;;  %1377 = vrot.lane.b32.xlu1 %v1372_v20, %s1958_s25 }
 0x1ea   : > { %v949_v29 = vpop.permute.xlu0 %948  ;;  %v938_v3 = vpop.permute.xlu1 %937 }
 0x1eb   : > { %v954_v63 = vadd.f32 %v949_v29, %v941_v7  ;;  %v942_v26 = vadd.f32 %v938_v3, %v927_v16  ;;  %v1484_v16 = vmul.f32 %v1482_v24, %v2712_v13  ;;  %v1510_v29 = vstv %s1755_s28 }
 0x1ec   : > { %1403 = vrot.lane.b32.xlu0 %v1399_v8, %s1959_s24  ;;  %1390 = vrot.lane.b32.xlu1 %v1385_v50, %s1958_s25  ;;  %s2748_s25 = sld [smem:[#allocation3 + $0x5f]]  ;;  %v1511_v3 = vmul.f32 %v1510_v29, %v2697_v28  ;;  %v1512_v39 = vmul.f32 %v1510_v29, %v2712_v13 }
 0x1ee   : > { %v964_v32 = vpop.permute.xlu0 %963  ;;  %v951_v15 = vpop.permute.xlu1 %950 }
 0x1ef   : > { %v955_v22 = vadd.f32 %v951_v15, %v942_v26  ;;  %v969_v11 = vadd.f32 %v964_v32, %v954_v63 }
 0x1f0   : > { %1416 = vrot.lane.b32.xlu0 %v1412_v30, %s1959_s24  ;;  %1405 = vrot.lane.b32.xlu1 %v1400_v34, %s1959_s24 }
 0x1f2   : > { %v977_v27 = vpop.permute.xlu0 %976  ;;  %v966_v59 = vpop.permute.xlu1 %965  ;;  %v1467_v23 = vstv %s2748_s25  ;;  %s1886_s25 = sshll.u32 %s1964_s13, 4  ;;  %s1887_s25 = int_to_ptr.vmem [resolvable:$false] %s1886_s25 }
 0x1f3   : > { %v982_v43 = vadd.f32 %v977_v27, %v969_v11  ;;  %v970_v14 = vadd.f32 %v966_v59, %v955_v22  ;;  %v1468_v55 = vmul.f32 %v1467_v23, %v2706_v12  ;;  %v1469_v4 = vmul.f32 %v1467_v23, %v2721_v19  ;;  %s1888_s19 = scalar_lea.vmem %s1887_s25, 512  ;;  %p1889_p9 = scmp.lt.s32.totalorder %s2809_s20, %s1887_s25 }
 0x1f4   : > { %1431 = vrot.lane.b32.xlu0 %v1427_v38, %s1960_s29  ;;  %1418 = vrot.lane.b32.xlu1 %v1413_v48, %s1959_s24  ;;  %s2765_s24 = sld [smem:[#allocation3 + $0x60]]  ;;  %p1890_p10 = scmp.lt.s32.totalorder %s1888_s19, %s1882_s8 }
 0x1f5   : > { %v993_v37 = vadd.f32 %v991_v45, %v982_v43 }
 0x1f6   : > { %v1008_v17 = vpop.permute.xlu0 %1007  ;;  %v979_v21 = vpop.permute.xlu1 %978  ;;  %p1891_p2 = por %p1890_p10, %p1889_p9 }
 0x1f7   : > { %v998_v36 = vadd.f32 %v996_v10, %v993_v37  ;;  %v983_v2 = vadd.f32 %v979_v21, %v970_v14 }
 0x1f8   : > { %1444 = vrot.lane.b32.xlu0 %v1440_v33, %s1960_s29  ;;  %1433 = vrot.lane.b32.xlu1 %v1428_v49, %s1960_s29  ;;  %p1892_p0 = pnand %p1891_p2, %p1885_p8 }
 0x1f9   : > { %v994_v6 = vadd.f32 %v992_v25, %v983_v2  ;;  %v1013_v63 = vadd.f32 %v1008_v17, %v998_v36 }
 0x1fa   : > { %v1021_v51 = vpop.permute.xlu0 %1020  ;;  %v1010_v61 = vpop.permute.xlu1 %1009  ;;  %v1495_v18 = vstv %s2765_s24 }
 0x1fb   : > { %v999_v54 = vadd.f32 %v997_v47, %v994_v6  ;;  %v1496_v20 = vmul.f32 %v1495_v18, %v2706_v12  ;;  %v1497_v56 = vmul.f32 %v1495_v18, %v2721_v19  ;;  %v1026_v15 = vadd.f32 %v1021_v51, %v1013_v63 }
 0x1fc   : > { %1459 = vrot.lane.b32.xlu0 %v1455_v1, %s1961_s3  ;;  %1446 = vrot.lane.b32.xlu1 %v1441_v52, %s1960_s29  ;;  %s1756_s29 = sld [smem:[#allocation3 + $0x61]] }
 0x1fd   : > { %v1014_v22 = vadd.f32 %v1010_v61, %v999_v54 }
 0x1fe   : > { %v1036_v44 = vpop.permute.xlu0 %1035  ;;  %v1023_v40 = vpop.permute.xlu1 %1022 }
 0x1ff   : > { %v1041_v0 = vadd.f32 %v1036_v44, %v1026_v15  ;;  %v1027_v59 = vadd.f32 %v1023_v40, %v1014_v22 }
 0x200   : > { %1472 = vrot.lane.b32.xlu0 %v1468_v55, %s1961_s3  ;;  %1461 = vrot.lane.b32.xlu1 %v1456_v9, %s1961_s3 }
 0x202   : > { %v1049_v62 = vpop.permute.xlu0 %1048  ;;  %v1038_v31 = vpop.permute.xlu1 %1037  ;;  %v1523_v26 = vstv %s1756_s29 }
 0x203   : > { %v1524_v30 = vmul.f32 %v1523_v26, %v2706_v12  ;;  %v1054_v46 = vadd.f32 %v1049_v62, %v1041_v0  ;;  %v1525_v38 = vmul.f32 %v1523_v26, %v2721_v19  ;;  %v1042_v43 = vadd.f32 %v1038_v31, %v1027_v59 }
 0x204   : > { %1487 = vrot.lane.b32.xlu0 %v1483_v53, %s1962_s14  ;;  %1474 = vrot.lane.b32.xlu1 %v1469_v4, %s1961_s3  ;;  %s1729_s3 = sld [smem:[#allocation3 + $0x23]] }
 0x206   : > { %v1064_v7 = vpop.permute.xlu0 %1063  ;;  %v1051_v58 = vpop.permute.xlu1 %1050 }
 0x207   : > { %v1069_v45 = vadd.f32 %v1064_v7, %v1054_v46  ;;  %v1055_v37 = vadd.f32 %v1051_v58, %v1042_v43 }
 0x208   : > { %1500 = vrot.lane.b32.xlu0 %v1496_v20, %s1962_s14  ;;  %1489 = vrot.lane.b32.xlu1 %v1484_v16, %s1962_s14 }
 0x20a   : > { %v1077_v8 = vpop.permute.xlu0 %1076  ;;  %v1066_v50 = vpop.permute.xlu1 %1065  ;;  %v1174_v1 = vstv %s1729_s3 }
 0x20b   : > { %v1082_v35 = vadd.f32 %v1077_v8, %v1069_v45  ;;  %v1070_v17 = vadd.f32 %v1066_v50, %v1055_v37  ;;  %v1175_v55 = vmul.f32 %v1174_v1, %v2586_v60  ;;  %v1176_v7 = vmul.f32 %v1174_v1, %v2603_v41 }
 0x20c   : > { %1515 = vrot.lane.b32.xlu0 %v1511_v3, %s1963_s17  ;;  %1502 = vrot.lane.b32.xlu1 %v1497_v56, %s1962_s14  ;;  %s1730_s14 = sld [smem:[#allocation3 + $0x54]] }
 0x20e   : > { %v1092_v32 = vpop.permute.xlu0 %1091  ;;  %v1079_v34 = vpop.permute.xlu1 %1078 }
 0x20f   : > { %v1097_v14 = vadd.f32 %v1092_v32, %v1082_v35  ;;  %v1083_v49 = vadd.f32 %v1079_v34, %v1070_v17 }
 0x210   : > { %1528 = vrot.lane.b32.xlu0 %v1524_v30, %s1963_s17  ;;  %1517 = vrot.lane.b32.xlu1 %v1512_v39, %s1963_s17 }
 0x212   : > { %v1105_v11 = vpop.permute.xlu0 %1104  ;;  %v1094_v27 = vpop.permute.xlu1 %1093  ;;  %v1179_v54 = vstv %s1730_s14 }
 0x213   : > { %v1110_v36 = vadd.f32 %v1105_v11, %v1097_v14  ;;  %v1098_v25 = vadd.f32 %v1094_v27, %v1083_v49  ;;  %v1180_v62 = vmul.f32 %v1179_v54, %v2597_v5  ;;  %v1181_v16 = vmul.f32 %v1179_v54, %v2614_v42 }
 0x214   : > { %1530 = vrot.lane.b32.xlu1 %v1525_v38, %s1963_s17  ;;  %s1743_s17 = sld [smem:[#allocation3 + $0x2a]] }
 0x216   : > { %v1120_v48 = vpop.permute.xlu0 %1119  ;;  %v1107_v10 = vpop.permute.xlu1 %1106 }
 0x217   : > { %v1125_v57 = vadd.f32 %v1120_v48, %v1110_v36  ;;  %v1111_v51 = vadd.f32 %v1107_v10, %v1098_v25 }
 0x21a   : > { %v1133_v33 = vpop.permute.xlu0 %1132  ;;  %v1122_v21 = vpop.permute.xlu1 %1121 }
 0x21b   : > { %v1138_v47 = vadd.f32 %v1133_v33, %v1125_v57  ;;  %v1126_v52 = vadd.f32 %v1122_v21, %v1111_v51 }
 0x21e   : > { %v1148_v2 = vpop.permute.xlu0 %1147  ;;  %v1135_v6 = vpop.permute.xlu1 %1134 }
 0x21f   : > { %v1153_v61 = vadd.f32 %v1148_v2, %v1138_v47  ;;  %v1139_v9 = vadd.f32 %v1135_v6, %v1126_v52  ;;  %v1358_v6 = vstv %s1743_s17  ;;  %v1363_v52 = vstv %s1744_s27 }
 0x220   : > { %v1359_v54 = vmul.f32 %v1358_v6, %v2697_v28 }
 0x222   : > { %v1161_v23 = vpop.permute.xlu0 %1160  ;;  %v1150_v44 = vpop.permute.xlu1 %1149 }
 0x223   : > { %v1166_v40 = vadd.f32 %v1161_v23, %v1153_v61  ;;  %v1154_v53 = vadd.f32 %v1150_v44, %v1139_v9  ;;  %v1364_v9 = vmul.f32 %v1363_v52, %v2706_v12 }
 0x225   : > { %v1177_v24 = vadd.f32 %v1175_v55, %v1166_v40 }
 0x226   : > { %v1192_v31 = vpop.permute.xlu0 %1191  ;;  %v1163_v4 = vpop.permute.xlu1 %1162 }
 0x227   : > { %v1182_v18 = vadd.f32 %v1180_v62, %v1177_v24  ;;  %v1167_v20 = vadd.f32 %v1163_v4, %v1154_v53  ;;  %v1360_v4 = vmul.f32 %v1358_v6, %v2712_v13 }
 0x229   : > { %v1178_v58 = vadd.f32 %v1176_v7, %v1167_v20  ;;  %v1197_v30 = vadd.f32 %v1192_v31, %v1182_v18  ;;  %v1365_v20 = vmul.f32 %v1363_v52, %v2721_v19 }
 0x22a   : > { %v1205_v29 = vpop.permute.xlu0 %1204  ;;  %v1194_v8 = vpop.permute.xlu1 %1193 }
 0x22b   : > { %v1183_v3 = vadd.f32 %v1181_v16, %v1178_v58  ;;  %v1210_v39 = vadd.f32 %v1205_v29, %v1197_v30 }
 0x22d   : > { %v1198_v41 = vadd.f32 %v1194_v8, %v1183_v3 }
 0x22e   : > { %v1220_v63 = vpop.permute.xlu0 %1219  ;;  %v1207_v60 = vpop.permute.xlu1 %1206 }
 0x22f   : > { %v1225_v0 = vadd.f32 %v1220_v63, %v1210_v39  ;;  %v1211_v27 = vadd.f32 %v1207_v60, %v1198_v41 }
 0x232   : > { %v1233_v50 = vpop.permute.xlu0 %1232  ;;  %v1222_v56 = vpop.permute.xlu1 %1221 }
 0x233   : > { %v1238_v46 = vadd.f32 %v1233_v50, %v1225_v0  ;;  %v1226_v59 = vadd.f32 %v1222_v56, %v1211_v27 }
 0x236   : > { %v1248_v26 = vpop.permute.xlu0 %1247  ;;  %v1235_v32 = vpop.permute.xlu1 %1234 }
 0x237   : > { %v1253_v38 = vadd.f32 %v1248_v26, %v1238_v46  ;;  %v1239_v35 = vadd.f32 %v1235_v32, %v1226_v59 }
 0x23a   : > { %v1261_v5 = vpop.permute.xlu0 %1260  ;;  %v1250_v15 = vpop.permute.xlu1 %1249 }
 0x23b   : > { %v1266_v43 = vadd.f32 %v1261_v5, %v1253_v38  ;;  %v1254_v37 = vadd.f32 %v1250_v15, %v1239_v35 }
 0x23e   : > { %v1276_v34 = vpop.permute.xlu0 %1275  ;;  %v1263_v22 = vpop.permute.xlu1 %1262 }
 0x23f   : > { %v1281_v10 = vadd.f32 %v1276_v34, %v1266_v43  ;;  %v1267_v36 = vadd.f32 %v1263_v22, %v1254_v37 }
 0x242   : > { %v1289_v11 = vpop.permute.xlu0 %1288  ;;  %v1278_v42 = vpop.permute.xlu1 %1277 }
 0x243   : > { %v1294_v17 = vadd.f32 %v1289_v11, %v1281_v10  ;;  %v1282_v49 = vadd.f32 %v1278_v42, %v1267_v36 }
 0x246   : > { %v1304_v45 = vpop.permute.xlu0 %1303  ;;  %v1291_v48 = vpop.permute.xlu1 %1290 }
 0x247   : > { %v1309_v21 = vadd.f32 %v1304_v45, %v1294_v17  ;;  %v1295_v47 = vadd.f32 %v1291_v48, %v1282_v49 }
 0x24a   : > { %v1317_v14 = vpop.permute.xlu0 %1316  ;;  %v1306_v33 = vpop.permute.xlu1 %1305 }
 0x24b   : > { %v1322_v25 = vadd.f32 %v1317_v14, %v1309_v21  ;;  %v1310_v1 = vadd.f32 %v1306_v33, %v1295_v47 }
 0x24e   : > { %v1332_v57 = vpop.permute.xlu0 %1331  ;;  %v1319_v2 = vpop.permute.xlu1 %1318 }
 0x24f   : > { %v1337_v51 = vadd.f32 %v1332_v57, %v1322_v25  ;;  %v1323_v55 = vadd.f32 %v1319_v2, %v1310_v1 }
 0x252   : > { %v1345_v61 = vpop.permute.xlu0 %1344  ;;  %v1334_v23 = vpop.permute.xlu1 %1333 }
 0x253   : > { %v1350_v44 = vadd.f32 %v1345_v61, %v1337_v51  ;;  %v1338_v24 = vadd.f32 %v1334_v23, %v1323_v55 }
 0x255   : > { %v1361_v40 = vadd.f32 %v1359_v54, %v1350_v44 }
 0x256   : > { %v1376_v62 = vpop.permute.xlu0 %1375  ;;  %v1347_v53 = vpop.permute.xlu1 %1346 }
 0x257   : > { %v1366_v31 = vadd.f32 %v1364_v9, %v1361_v40  ;;  %v1351_v18 = vadd.f32 %v1347_v53, %v1338_v24 }
 0x259   : > { %v1362_v7 = vadd.f32 %v1360_v4, %v1351_v18  ;;  %v1381_v56 = vadd.f32 %v1376_v62, %v1366_v31 }
 0x25a   : > { %v1389_v58 = vpop.permute.xlu0 %1388  ;;  %v1378_v16 = vpop.permute.xlu1 %1377 }
 0x25b   : > { %v1367_v29 = vadd.f32 %v1365_v20, %v1362_v7  ;;  %v1394_v5 = vadd.f32 %v1389_v58, %v1381_v56 }
 0x25d   : > { %v1382_v13 = vadd.f32 %v1378_v16, %v1367_v29 }
 0x25e   : > { %v1404_v8 = vpop.permute.xlu0 %1403  ;;  %v1391_v28 = vpop.permute.xlu1 %1390 }
 0x25f   : > { %v1409_v15 = vadd.f32 %v1404_v8, %v1394_v5  ;;  %v1395_v22 = vadd.f32 %v1391_v28, %v1382_v13 }
 0x262   : > { %v1417_v3 = vpop.permute.xlu0 %1416  ;;  %v1406_v63 = vpop.permute.xlu1 %1405 }
 0x263   : > { %v1422_v39 = vadd.f32 %v1417_v3, %v1409_v15  ;;  %v1410_v0 = vadd.f32 %v1406_v63, %v1395_v22 }
 0x266   : > { %v1432_v60 = vpop.permute.xlu0 %1431  ;;  %v1419_v50 = vpop.permute.xlu1 %1418 }
 0x267   : > { %v1437_v41 = vadd.f32 %v1432_v60, %v1422_v39  ;;  %v1423_v27 = vadd.f32 %v1419_v50, %v1410_v0 }
 0x26a   : > { %v1445_v12 = vpop.permute.xlu0 %1444  ;;  %v1434_v26 = vpop.permute.xlu1 %1433 }
 0x26b   : > { %v1450_v46 = vadd.f32 %v1445_v12, %v1437_v41  ;;  %v1438_v59 = vadd.f32 %v1434_v26, %v1423_v27 }
 0x26e   : > { %v1460_v32 = vpop.permute.xlu0 %1459  ;;  %v1447_v30 = vpop.permute.xlu1 %1446 }
 0x26f   : > { %v1465_v38 = vadd.f32 %v1460_v32, %v1450_v46  ;;  %v1451_v35 = vadd.f32 %v1447_v30, %v1438_v59 }
 0x272   : > { %v1473_v34 = vpop.permute.xlu0 %1472  ;;  %v1462_v19 = vpop.permute.xlu1 %1461 }
 0x273   : > { %v1478_v43 = vadd.f32 %v1473_v34, %v1465_v38  ;;  %v1466_v37 = vadd.f32 %v1462_v19, %v1451_v35 }
 0x276   : > { %v1488_v11 = vpop.permute.xlu0 %1487  ;;  %v1475_v42 = vpop.permute.xlu1 %1474 }
 0x277   : > { %v1493_v10 = vadd.f32 %v1488_v11, %v1478_v43  ;;  %v1479_v36 = vadd.f32 %v1475_v42, %v1466_v37 }
 0x27a   : > { %v1501_v45 = vpop.permute.xlu0 %1500  ;;  %v1490_v48 = vpop.permute.xlu1 %1489 }
 0x27b   : > { %v1506_v17 = vadd.f32 %v1501_v45, %v1493_v10  ;;  %v1494_v49 = vadd.f32 %v1490_v48, %v1479_v36 }
 0x27e   : > { %v1516_v14 = vpop.permute.xlu0 %1515  ;;  %v1503_v33 = vpop.permute.xlu1 %1502 }
 0x27f   : > { %v1521_v21 = vadd.f32 %v1516_v14, %v1506_v17  ;;  %v1507_v47 = vadd.f32 %v1503_v33, %v1494_v49 }
 0x282   : > { %v1529_v57 = vpop.permute.xlu0 %1528  ;;  %v1518_v25 = vpop.permute.xlu1 %1517 }
 0x283   : > { %v1534_v2 = vadd.f32 %v1529_v57, %v1521_v21  ;;  %v1522_v51 = vadd.f32 %v1518_v25, %v1507_v47 }
 0x285   : > { %v1757_v6 = vmul.f32 -1.442695, %v1534_v2 }
 0x286   : > { %v1531_v1 = vpop.permute.xlu1 %1530 }
 0x287   : > { %1835 = vpow2.f32 %v1757_v6  ;;  %v1535_v61 = vadd.f32 %v1531_v1, %v1522_v51 }
 0x289   : > { %v1758_v52 = vmul.f32 -1.442695, %v1535_v61 }
 0x28b   : > { %1837 = vpow2.f32 %v1758_v52 }
 0x294   : > { %v1836_v23 = vpop.eup %1835 }
 0x295   : > { %v1542_v54 = vadd.f32 1.0, %v1836_v23 }
 0x297   : > { %1839 = vrcp.f32 %v1542_v54 }
 0x298   : > { %v1838_v44 = vpop.eup %1837 }
 0x299   : > { %v1543_v55 = vadd.f32 1.0, %v1838_v44 }
 0x29b   : > { %1841 = vrcp.f32 %v1543_v55 }
 0x2a4   : > { %v1840_v40 = vpop.eup %1839 }
 0x2a5   : > { %1548 = vst.msk [vmem:[%s173_s16] sm:$0xff] %vm182_vm0, %v1840_v40 }
 0x2a8   : > { %v1842_v9 = vpop.eup %1841 }
 0x2a9   : > { %1549 = vst.msk [vmem:[%s173_s16 + $0x8] sm:$0xff] %vm182_vm0, %v1842_v9 }
 0x2aa   : > { %1895 = shalt.err (!%p1892_p0)
}
 0x2ab   : > { %s1896_s24 = scalar_lea.hbm %s2807_s5, 256  ;;  %s1900_s3 = scalar_lea.hbm %s2855_s2, 512 }
 0x2ac   : > { %p1897_p3 = scmp.ne.s32.totalorder %s2807_s5, %s1896_s24  ;;  %p1901_p1 = scmp.lt.s32.totalorder %s2807_s5, %s2855_s2 }
 0x2ad   : > { %p1902_p6 = scmp.lt.s32.totalorder %s1900_s3, %s1896_s24 }
 0x2ae   : > { %p1898_p5 = pnand %p1897_p3, %p2871_p13 }
 0x2af   : > { %p1903_p11 = por %p1902_p6, %p1901_p1 }
 0x2b0   : > { %p1899_p4 = pneg %p1898_p5 }
 0x2b2   : > { %p1904_p12 = pnand %p1903_p11, %p1899_p4 }
 0x2b4   : > { %1907 = shalt.err (!%p1904_p12)
}
 0x2b5   : > { %s1965_s27 = smov 128   ;;  %s1966_s30 = smov 8  }
 0x2b6   : > { %1772 = dma.vmem_to_hbm [thread:$0]  (%p2871_p13), %s2809_s20, 256, %s2807_s5, %s1551_s7, %s1965_s27, %s1965_s27, %s1966_s30  }
 0x2b7 PF: > { %s1579_s4 = sand.u32 1, %s1938_s9   ;;  %p2872_p7 = scmp.ne.s32.totalorder %s2863_s22, 0 }
 0x2b8   : > { %p2873_p8 = scmp.ge.s32.totalorder %s1950_s12, 2  ;;  %s1580_s16 = scalar_lea.sflag [#allocation5], %s1579_s4 }
 0x2ba   : > { %p1783_p9 = pnand %p2873_p8, %p2872_p7 }
 0x2bc   : > { %p1784_p10 = pneg %p1783_p9 }
 0x2be   : > { %1933 = dma.done.wait (%p1784_p10), %s1580_s16, 256  }
 0x2bf   : > { %1935 = vsyncadd (%p1784_p10), %s1580_s16, 4294967040  ;;  %p16_p2 = scmp.ge.s32.totalorder %s2007_s15, 4   ;;  %s2874_s9 = smov %s1942_s10 }
 0x2c0   : > { %s2875_s10 = smov %s1946_s11  ;;  %s2876_s11 = smov %s2019_s18 }
 0x2c1   : > { %s2877_s12 = smov %s2007_s15  ;;  %18 = sbr.rel (!%p16_p2) target bundleno = 6 (0x6), region = 79 }
 0x2c6   :  { %1585 = vsyncpa [#allocation4], 1 }
 0x2c7   :  { %1587 = vsyncpa [#allocation4 + $0x1], 1 }
 0x2c8   :  { %1588 = vsyncpa [#allocation5], 1 }
 0x2c9   :  { %1590 = vsyncpa [#allocation5 + $0x1], 1 }
 0x2ca   :  { %1591 = vsyncpa [#allocation6], 1 }
 0x2cb   :  { %1593 = vsyncpa [#allocation6 + $0x1], 1 }

</bundles_post_ra>
